<compile_context>
chip_gen: v5e
topology: v5e:2x2
jax: 0.10.0
libtpu: 0.0.40
codegen_flags: <defaults>
</compile_context>

<pallas_src>
import numpy as np
import jax
import jax.numpy as jnp
from jax.experimental import pallas as pl
from jax.experimental.pallas import tpu as pltpu


def _round_up(x, m):
    return ((x + m - 1) // m) * m


# ----------------------------------------------------------------------------
# Kernels
# ----------------------------------------------------------------------------

def _char_cnn_kernel(x_ref, w_ref, b_ref, o_ref):
    """Fused conv1d (as one matmul) + bias + ReLU + max-pool over word length.

    x: [TM*W, KD] bf16 (rows grouped per word), w: [KD, F] bf16, b: [1, F] f32
    o: [TM, F] f32
    """
    tm, f = o_ref.shape
    w_len = x_ref.shape[0] // tm
    y = jnp.dot(x_ref[...], w_ref[...],
                preferred_element_type=jnp.float32)        # [TM*W, F]
    y = jnp.maximum(y + b_ref[...], 0.0)
    o_ref[...] = jnp.max(y.reshape(tm, w_len, f), axis=1)  # max over taps


def _concat_linear_kernel(a_ref, b_ref, w1_ref, w2_ref, bias_ref, o_ref):
    """hidden_state_transform(concat(a, b)) = a@W1 + b@W2 + bias (concat fused)."""
    o_ref[...] = (
        jnp.dot(a_ref[...], w1_ref[...], preferred_element_type=jnp.float32)
        + jnp.dot(b_ref[...], w2_ref[...], preferred_element_type=jnp.float32)
        + bias_ref[...])


def _make_graph_stack_kernel(n_iter, n_layer, n_head, hh, leaky_alpha):
    """All graph iterations fused; node features stay resident in VMEM/vregs."""
    leaky_alpha = float(leaky_alpha)
    contract_last = (((1,), (1,)), ((), ()))   # contract last dims, no batch dims

    def kernel(node_ref, fixed_ref, wd_ref, bd_ref, wa_ref, asrc_ref, adst_ref,
               out_ref, nxt_ref):
        bb, n, d = node_ref.shape
        m = bb * n
        inv_sqrt_d = float(1.0 / np.sqrt(d))

        adj_fixed = fixed_ref[...]          # [bb, n, n] f32 (exp() hoisted to wrapper)
        wd = wd_ref[...]                    # [n_layer, d, d] bf16
        bd = bd_ref[...]                    # [n_layer, d]    f32
        wa = wa_ref[...]                    # [d, d]          bf16 (all heads fused)
        asrc = asrc_ref[...]                # [n_head, hh]    f32
        adst = adst_ref[...]                # [n_head, hh]    f32

        h = node_ref[...].reshape(m, d)     # [m, d] f32

        for _ in range(n_iter):
            # --- DynamicGraphAdjacentMatrix ---------------------------------
            # TODO(synk): exact graph_attention_layer.DynamicGraphAdjacentMatrix
            # source unavailable; standard n_layer MLP + scaled bilinear score.
            g = h
            for l in range(n_layer):
                g = jnp.maximum(
                    jnp.dot(g.astype(jnp.bfloat16), wd[l],
                            preferred_element_type=jnp.float32)
                    + bd[l:l + 1, :], 0.0)

            # --- MultiHeadGraphAttentionLayer: all head projections in ONE
            #     lane-dense [m, d] x [d, d] matmul ----------------------------
            wh_all = jnp.dot(h.astype(jnp.bfloat16), wa,
                             preferred_element_type=jnp.float32)        # [m, d]

            for bi in range(bb):
                r0 = bi * n
                g_b = g[r0:r0 + n, :].astype(jnp.bfloat16)              # [n, d]
                a_dyn = jax.lax.dot_general(
                    g_b, g_b, contract_last,
                    preferred_element_type=jnp.float32) * inv_sqrt_d    # [n, n]
                adj_b = adj_fixed[bi] + a_dyn
                pos_b = adj_b > 0
                wh_b = wh_all[r0:r0 + n, :]                             # [n, d]
                h_b = h[r0:r0 + n, :]                                   # [n, d]

                for hd in range(n_head):
                    lo = hd * hh
                    wh = wh_b[:, lo:lo + hh]                            # [n, hh]
                    # src score: VPU lane-reduce; dst score: tiny row matmul.
                    f_src = jnp.sum(wh * asrc[hd:hd + 1, :], axis=-1,
                                    keepdims=True)                      # [n, 1]
                    f_dst = jax.lax.dot_general(
                        adst[hd:hd + 1, :], wh, contract_last,
                        preferred_element_type=jnp.float32)             # [1, n]
                    e = f_src + f_dst                                   # [n, n]
                    e = jnp.where(e > 0, e, leaky_alpha * e)            # LeakyReLU
                    logit = jnp.where(pos_b, e, -1e9)
                    logit = logit - jnp.max(logit, axis=-1, keepdims=True)
                    p = jnp.exp(logit)
                    p = p * pl.reciprocal(
                        jnp.sum(p, axis=-1, keepdims=True), approx=True)
                    oh = jnp.dot(p.astype(jnp.bfloat16),
                                 wh.astype(jnp.bfloat16),
                                 preferred_element_type=jnp.float32)    # [n, hh]
                    elu = jnp.where(oh > 0, oh,
                                    jnp.exp(jnp.minimum(oh, 0.0)) - 1.0)
                    # residual + head output written straight into the slab
                    nxt_ref[r0:r0 + n, lo:lo + hh] = h_b[:, lo:lo + hh] + elu

            h = nxt_ref[...]

        out_ref[...] = h.reshape(bb, n, d)

    return kernel


def _pool_output_kernel(x_ref, w_ref, b_ref, o_ref):
    """o = max over nodes, then classifier head:  max_n(x) @ W + b."""
    pooled = jnp.max(x_ref[...], axis=1)                                # [TB, D]
    o_ref[...] = jnp.dot(pooled.astype(w_ref.dtype), w_ref[...],
                         preferred_element_type=jnp.float32) + b_ref[...]


# ----------------------------------------------------------------------------
# pallas_call wrappers (tiled, "parallel" grids)
# ----------------------------------------------------------------------------

_PAR = pltpu.CompilerParams(dimension_semantics=("parallel",))


def _char_cnn(x2, w, b, m, w_len, row_tile=512):
    kd = x2.shape[-1]
    f = w.shape[-1]
    tm = m if m <= row_tile else row_tile       # row_tile is a multiple of 8
    return pl.pallas_call(
        _char_cnn_kernel,
        out_shape=jax.ShapeDtypeStruct((m, f), jnp.float32),
        grid=(pl.cdiv(m, tm),),
        in_specs=[
            pl.BlockSpec((tm * w_len, kd), lambda i: (i, 0)),
            pl.BlockSpec((kd, f), lambda i: (0, 0)),
            pl.BlockSpec((1, f), lambda i: (0, 0)),
        ],
        out_specs=pl.BlockSpec((tm, f), lambda i: (i, 0)),
        compiler_params=_PAR,
    )(x2, w, b)


def _concat_linear(a, b, w1, w2, bias, row_tile=512):
    m, da = a.shape
    db = b.shape[-1]
    d = w1.shape[-1]
    tm = m if m <= row_tile else row_tile
    return pl.pallas_call(
        _concat_linear_kernel,
        out_shape=jax.ShapeDtypeStruct((m, d), jnp.float32),
        grid=(pl.cdiv(m, tm),),
        in_specs=[
            pl.BlockSpec((tm, da), lambda i: (i, 0)),
            pl.BlockSpec((tm, db), lambda i: (i, 0)),
            pl.BlockSpec((da, d), lambda i: (0, 0)),
            pl.BlockSpec((db, d), lambda i: (0, 0)),
            pl.BlockSpec((1, d), lambda i: (0, 0)),
        ],
        out_specs=pl.BlockSpec((tm, d), lambda i: (i, 0)),
        compiler_params=_PAR,
    )(a, b, w1, w2, bias)


def _graph_stack(node, exp_fixed, wd, bd, wa_all, asrc, adst, *, n_iter, n_layer,
                 n_head, hh, leaky_alpha, batch_tile=8):
    b, n, d = node.shape
    bb = b if b <= batch_tile else batch_tile
    kernel = _make_graph_stack_kernel(n_iter, n_layer, n_head, hh, leaky_alpha)
    return pl.pallas_call(
        kernel,
        out_shape=jax.ShapeDtypeStruct((b, n, d), jnp.float32),
        grid=(pl.cdiv(b, bb),),
        in_specs=[
            pl.BlockSpec((bb, n, d), lambda i: (i, 0, 0)),
            pl.BlockSpec((bb, n, n), lambda i: (i, 0, 0)),
            pl.BlockSpec((n_layer, d, d), lambda i: (0, 0, 0)),
            pl.BlockSpec((n_layer, d), lambda i: (0, 0)),
            pl.BlockSpec((d, d), lambda i: (0, 0)),
            pl.BlockSpec((n_head, hh), lambda i: (0, 0)),
            pl.BlockSpec((n_head, hh), lambda i: (0, 0)),
        ],
        out_specs=pl.BlockSpec((bb, n, d), lambda i: (i, 0, 0)),
        scratch_shapes=[pltpu.VMEM((bb * n, d), jnp.float32)],
        compiler_params=_PAR,
    )(node, exp_fixed, wd, bd, wa_all, asrc, adst)


def _pool_and_output(node, w_out, b_out, batch_tile=256):
    b, n, d = node.shape
    c = w_out.shape[-1]
    tb = b if b <= batch_tile else batch_tile
    return pl.pallas_call(
        _pool_output_kernel,
        out_shape=jax.ShapeDtypeStruct((b, c), jnp.float32),
        grid=(pl.cdiv(b, tb),),
        in_specs=[
            pl.BlockSpec((tb, n, d), lambda i: (i, 0, 0)),
            pl.BlockSpec((d, c), lambda i: (0, 0)),
            pl.BlockSpec((1, c), lambda i: (0, 0)),
        ],
        out_specs=pl.BlockSpec((tb, c), lambda i: (i, 0)),
        compiler_params=_PAR,
    )(node, w_out, b_out)


# ----------------------------------------------------------------------------
# Shared helpers (used by the kernel path and the pure-JAX reference)
# ----------------------------------------------------------------------------

def _prep_compute_params(p):
    """bf16 copies of MXU weights + fused per-head projection matrix."""
    n_head, d, hh = p['wa'].shape
    return {
        'char_w': p['char_w'].astype(jnp.bfloat16),
        'ht_w1': p['ht_w1'].astype(jnp.bfloat16),
        'ht_w2': p['ht_w2'].astype(jnp.bfloat16),
        'wd': p['wd'].astype(jnp.bfloat16),
        'wa_all': jnp.transpose(p['wa'], (1, 0, 2)).reshape(d, n_head * hh)
                  .astype(jnp.bfloat16),
        'out_w': p['out_w'].astype(jnp.bfloat16),
    }


def _char_unfold(char_table, sentences_char, k, pad):
    """Static im2col for the character conv1d.  Returns [B, N, W, K*Dc] bf16."""
    w = sentences_char.shape[-1]
    cemb = jnp.take(char_table, sentences_char, axis=0).astype(jnp.bfloat16)
    cpad = jnp.pad(cemb, ((0, 0), (0, 0), (pad, pad), (0, 0)))
    return jnp.concatenate([cpad[:, :, t:t + w, :] for t in range(k)], axis=-1)


# ----------------------------------------------------------------------------
# Forward pass (jitted; Pallas kernels for all dense compute)
# ----------------------------------------------------------------------------

def _forward_impl(params, sentences, sentences_char, fixed_graph, *, mixed,
                  hidden, n_layer, n_head, leaky_alpha, graph_itr, char_kernel,
                  char_pad, n_classes):
    B, N = sentences.shape
    W = sentences_char.shape[-1]
    cp = _prep_compute_params(params)

    # Embedding lookups stay in XLA (gathers); cast to bf16 for the MXU path.
    word = jnp.take(params['word_emb'], sentences, axis=0)               # [B,N,Ew]
    if mixed:
        word = jnp.concatenate(
            [word, jnp.take(params['word_emb2'], sentences, axis=0)], axis=-1)
    word = word.astype(jnp.bfloat16)

    xunf = _char_unfold(params['char_emb'], sentences_char,
                        char_kernel, char_pad)                           # [B,N,W,KD]
    M = B * N
    KD = xunf.shape[-1]
    x2 = xunf.reshape(M * W, KD)                                         # pure reshape

    char_feat = _char_cnn(x2, cp['char_w'], params['char_b'], M, W)      # [M,Fp] f32

    node = _concat_linear(word.reshape(M, word.shape[-1]),
                          char_feat.astype(jnp.bfloat16),
                          cp['ht_w1'], cp['ht_w2'], params['ht_b'])      # [M,D] f32
    D = node.shape[-1]
    node = node.reshape(B, N, D)

    # exp(fixed_graph) hoisted: computed exactly once for all graph iterations.
    exp_fixed = jnp.exp(fixed_graph.astype(jnp.float32))

    if graph_itr > 0:
        node = _graph_stack(node, exp_fixed, cp['wd'], params['bd'],
                            cp['wa_all'], params['asrc'], params['adst'],
                            n_iter=graph_itr, n_layer=n_layer, n_head=n_head,
                            hh=hidden, leaky_alpha=leaky_alpha)

    logits = _pool_and_output(node, cp['out_w'], params['out_b'])        # [B,C]
    if n_classes == 2:
        return logits[:, 0]
    return logits


class SequenceGraphModelWithGraphAttention:
    """JAX/Pallas port of model.sentence_pair_graph.SequenceGraphModelWithGraphAttention."""

    def __init__(self, word_embedding, character_number, mixed, hidden_size,
                 graph_itr, dynamic_graph_n_layer, graph_attention_n_head,
                 leaky_alpha, character_embedding_dim=32, character_n_filters=200,
                 character_kernel_size=5, character_padding=2, n_classes=2,
                 rng=None):
        if rng is None:
            rng = jax.random.PRNGKey(0)
        word_dim = word_embedding.shape[1]
        embed_dim = word_dim * (2 if mixed else 1)
        d_model = hidden_size * graph_attention_n_head
        out_dim = 1 if n_classes == 2 else n_classes
        f = character_n_filters
        f_pad = _round_up(f, 128)           # lane-dense char filter dim (exact padding)
        kd = character_kernel_size * character_embedding_dim

        ks = jax.random.split(rng, 10)

        def dense(key, shape, scale=None):
            scale = (1.0 / np.sqrt(shape[-2])) if scale is None else scale
            return jax.random.normal(key, shape, dtype=jnp.float32) * scale

        char_w = jnp.pad(dense(ks[2], (kd, f)), ((0, 0), (0, f_pad - f)))
        ht_w2 = jnp.pad(dense(ks[4], (f, d_model)), ((0, f_pad - f), (0, 0)))

        p = {
            'word_emb': jnp.asarray(word_embedding, dtype=jnp.float32),
            'char_emb': dense(ks[1], (character_number, character_embedding_dim), 0.1),
            'char_w': char_w,
            'char_b': jnp.zeros((1, f_pad), jnp.float32),
            'ht_w1': dense(ks[3], (embed_dim, d_model)),
            'ht_w2': ht_w2,
            'ht_b': jnp.zeros((1, d_model), jnp.float32),
            'wd': dense(ks[5], (dynamic_graph_n_layer, d_model, d_model)),
            'bd': jnp.zeros((dynamic_graph_n_layer, d_model), jnp.float32),
            'wa': dense(ks[6], (graph_attention_n_head, d_model, hidden_size)),
            'asrc': dense(ks[7], (graph_attention_n_head, hidden_size),
                          1.0 / np.sqrt(hidden_size)),
            'adst': dense(ks[8], (graph_attention_n_head, hidden_size),
                          1.0 / np.sqrt(hidden_size)),
            'out_w': dense(ks[9], (d_model, out_dim)),
            'out_b': jnp.zeros((1, out_dim), jnp.float32),
        }
        if mixed:
            p['word_emb2'] = dense(ks[0], word_embedding.shape, 0.1)
        self.params = p

        self._cfg = dict(mixed=mixed, hidden=hidden_size,
                         n_layer=dynamic_graph_n_layer,
                         n_head=graph_attention_n_head,
                         leaky_alpha=float(leaky_alpha), graph_itr=graph_itr,
                         char_kernel=character_kernel_size,
                         char_pad=character_padding, n_classes=n_classes)
        cfg = self._cfg
        self._jit_forward = jax.jit(
            lambda prm, s, c, g: _forward_impl(prm, s, c, g, **cfg))

    def forward(self, sentences, sentences_char, fixed_graph):
        return self._jit_forward(self.params, sentences, sentences_char, fixed_graph)


# ----------------------------------------------------------------------------
# Pure-JAX reference (same parameterization / precision policy, no Pallas)
# ----------------------------------------------------------------------------

def _reference_forward(params, sentences, sentences_char, fixed_graph, cfg):
    cp = _prep_compute_params(params)
    word = jnp.take(params['word_emb'], sentences, axis=0)
    if cfg['mixed']:
        word = jnp.concatenate(
            [word, jnp.take(params['word_emb2'], sentences, axis=0)], axis=-1)
    word = word.astype(jnp.bfloat16)

    xunf = _char_unfold(params['char_emb'], sentences_char,
                        cfg['char_kernel'], cfg['char_pad'])
    y = jnp.einsum('bnwk,kf->bnwf', xunf, cp['char_w'],
                   preferred_element_type=jnp.float32) + params['char_b'][0]
    char_feat = jnp.max(jnp.maximum(y, 0.0), axis=2)                     # [B,N,Fp]

    node = (jnp.einsum('bne,ed->bnd', word, cp['ht_w1'],
                       preferred_element_type=jnp.float32)
            + jnp.einsum('bnf,fd->bnd', char_feat.astype(jnp.bfloat16),
                         cp['ht_w2'], preferred_element_type=jnp.float32)
            + params['ht_b'][0])

    exp_fixed = jnp.exp(fixed_graph.astype(jnp.float32))
    D = node.shape[-1]
    hh = cfg['hidden']
    inv_sqrt_d = 1.0 / np.sqrt(D)
    for _ in range(cfg['graph_itr']):
        h = node
        g = h
        for l in range(cfg['n_layer']):
            g = jnp.maximum(
                jnp.einsum('bnd,de->bne', g.astype(jnp.bfloat16), cp['wd'][l],
                           preferred_element_type=jnp.float32)
                + params['bd'][l], 0.0)
        a_dyn = jnp.einsum('bnd,bmd->bnm', g.astype(jnp.bfloat16),
                           g.astype(jnp.bfloat16),
                           preferred_element_type=jnp.float32) * inv_sqrt_d
        adj = exp_fixed + a_dyn
        wh_all = jnp.einsum('bnd,de->bne', h.astype(jnp.bfloat16), cp['wa_all'],
                            preferred_element_type=jnp.float32)
        outs = []
        for hd in range(cfg['n_head']):
            lo = hd * hh
            wh = wh_all[..., lo:lo + hh]
            f_src = jnp.sum(wh * params['asrc'][hd], axis=-1)
            f_dst = jnp.sum(wh * params['adst'][hd], axis=-1)
            e = f_src[:, :, None] + f_dst[:, None, :]
            e = jnp.where(e > 0, e, cfg['leaky_alpha'] * e)
            logits = jnp.where(adj > 0, e, -1e9)
            logits = logits - jnp.max(logits, axis=-1, keepdims=True)
            p = jnp.exp(logits)
            p = p / jnp.sum(p, axis=-1, keepdims=True)
            oh = jnp.einsum('bnm,bmk->bnk', p.astype(jnp.bfloat16),
                            wh.astype(jnp.bfloat16),
                            preferred_element_type=jnp.float32)
            elu = jnp.where(oh > 0, oh, jnp.exp(jnp.minimum(oh, 0.0)) - 1.0)
            outs.append(h[..., lo:lo + hh] + elu)
        node = jnp.concatenate(outs, axis=-1)

    pooled = jnp.max(node, axis=1)
    logits = jnp.einsum('bd,dc->bc', pooled.astype(jnp.bfloat16), cp['out_w'],
                        preferred_element_type=jnp.float32) + params['out_b'][0]
    if cfg['n_classes'] == 2:
        return logits[:, 0]
    return logits


# ----------------------------------------------------------------------------
# Demo / self-test
# ----------------------------------------------------------------------------

if __name__ == "__main__":
    key = jax.random.PRNGKey(0)
    k_emb, k_model, k_s, k_c, k_g = jax.random.split(key, 5)

    B, N, W = 2, 16, 8                 # batch, nodes (seq), chars per word
    vocab, word_dim = 50, 32
    char_number = 30
    hidden_size, n_head = 32, 4        # D = hidden * heads = 128 (lane-dense)

    word_embedding = np.asarray(
        jax.random.normal(k_emb, (vocab, word_dim)) * 0.1, dtype=np.float32)

    model = SequenceGraphModelWithGraphAttention(
        word_embedding=word_embedding,
        character_number=char_number,
        mixed=False,
        hidden_size=hidden_size,
        graph_itr=2,
        dynamic_graph_n_layer=2,
        graph_attention_n_head=n_head,
        leaky_alpha=0.2,
        character_embedding_dim=16,
        character_n_filters=32,
        character_kernel_size=5,
        character_padding=2,
        n_classes=2,
        rng=k_model,
    )

    sentences = jax.random.randint(k_s, (B, N), 0, vocab, dtype=jnp.int32)
    sentences_char = jax.random.randint(k_c, (B, N, W), 0, char_number, dtype=jnp.int32)
    fixed_graph = jax.random.normal(k_g, (B, N, N), dtype=jnp.float32) * 0.5

    out = model.forward(sentences, sentences_char, fixed_graph)
    out = jax.block_until_ready(out)
    assert out.shape == (B,), out.shape
    assert bool(jnp.all(jnp.isfinite(out)))

    ref = _reference_forward(model.params, sentences, sentences_char,
                             fixed_graph, model._cfg)
    ref = jax.block_until_ready(ref)
    # bf16 MXU operands + approx-reciprocal softmax => moderate tolerance.
    np.testing.assert_allclose(np.asarray(out), np.asarray(ref),
                               rtol=3e-2, atol=3e-2)

    print("KERNEL_OK")
</pallas_src>

<mosaic_0001>
module attributes {stable_mosaic.version = 11 : i64} {
  func.func @_char_cnn_kernel(%arg0: i32, %arg1: memref<256x80xbf16, #tpu.memory_space<vmem>>, %arg2: memref<80x128xbf16, #tpu.memory_space<vmem>>, %arg3: memref<1x128xf32, #tpu.memory_space<vmem>>, %arg4: memref<32x128xf32, #tpu.memory_space<vmem>>) attributes {dimension_semantics = [#tpu.dimension_semantics<parallel>], iteration_bounds = array<i64: 1>, scalar_prefetch = 0 : i64, scratch_operands = 0 : i64, tpu.core_type = #tpu.core_type<tc>, window_params = [{transform_indices = @transform_0, window_bounds = array<i64: 256, 80>}, {pipeline_mode = #tpu.pipeline_mode<synchronous>, transform_indices = @transform_1, window_bounds = array<i64: 80, 128>}, {pipeline_mode = #tpu.pipeline_mode<synchronous>, transform_indices = @transform_2, window_bounds = array<i64: 1, 128>}, {transform_indices = @transform_3, window_bounds = array<i64: 32, 128>}]} {
    %c0 = arith.constant 0 : index
    %c0_0 = arith.constant 0 : index
    %0 = vector.load %arg1[%c0, %c0_0] : memref<256x80xbf16, #tpu.memory_space<vmem>>, vector<256x80xbf16>
    %c0_1 = arith.constant 0 : index
    %c0_2 = arith.constant 0 : index
    %1 = vector.load %arg2[%c0_1, %c0_2] : memref<80x128xbf16, #tpu.memory_space<vmem>>, vector<80x128xbf16>
    %cst = arith.constant dense<0.000000e+00> : vector<256x128xf32>
    %2 = tpu.matmul %0, %1, %cst {dimension_numbers = #tpu.dot_dimension_numbers<[1], [0], [0], [1], [0, 0, 1, 1], [], []>} : vector<256x80xbf16>, vector<80x128xbf16>, vector<256x128xf32> -> vector<256x128xf32>
    %c0_3 = arith.constant 0 : index
    %c0_4 = arith.constant 0 : index
    %3 = vector.load %arg3[%c0_3, %c0_4] : memref<1x128xf32, #tpu.memory_space<vmem>>, vector<1x128xf32>
    %4 = vector.broadcast %3 : vector<1x128xf32> to vector<256x128xf32>
    %5 = arith.addf %2, %4 : vector<256x128xf32>
    %cst_5 = arith.constant 0.000000e+00 : f32
    %6 = vector.broadcast %cst_5 : f32 to vector<256x128xf32>
    %7 = arith.maximumf %5, %6 : vector<256x128xf32>
    %8 = vector.shape_cast %7 : vector<256x128xf32> to vector<32x8x128xf32>
    %cst_6 = arith.constant dense<0xFF800000> : vector<32x128xf32>
    %9 = vector.multi_reduction <maximumf>, %8, %cst_6 [1] : vector<32x8x128xf32> to vector<32x128xf32>
    %c0_7 = arith.constant 0 : index
    %c0_8 = arith.constant 0 : index
    %10 = vector.load %arg4[%c0_7, %c0_8] : memref<32x128xf32, #tpu.memory_space<vmem>>, vector<32x128xf32>
    tpu.vector_store %arg4[%c0_7, %c0_8], %9 {strides = array<i32>} : memref<32x128xf32, #tpu.memory_space<vmem>>, vector<32x128xf32>,
    return
  }
  func.func @transform_0(%arg0: i32) -> (i32, i32) {
    %c0_i32 = arith.constant 0 : i32
    %c0_i32_0 = arith.constant 0 : i32
    return %arg0, %c0_i32 : i32, i32
  }
  func.func @transform_1(%arg0: i32) -> (i32, i32) {
    %c0_i32 = arith.constant 0 : i32
    %c0_i32_0 = arith.constant 0 : i32
    %c0_i32_1 = arith.constant 0 : i32
    return %c0_i32, %c0_i32_0 : i32, i32
  }
  func.func @transform_2(%arg0: i32) -> (i32, i32) {
    %c0_i32 = arith.constant 0 : i32
    %c0_i32_0 = arith.constant 0 : i32
    %c0_i32_1 = arith.constant 0 : i32
    return %c0_i32, %c0_i32_0 : i32, i32
  }
  func.func @transform_3(%arg0: i32) -> (i32, i32) {
    %c0_i32 = arith.constant 0 : i32
    %c0_i32_0 = arith.constant 0 : i32
    return %arg0, %c0_i32 : i32, i32
  }
}

module attributes {stable_mosaic.version = 11 : i64} {
  func.func @_concat_linear_kernel(%arg0: i32, %arg1: memref<32x32xbf16, #tpu.memory_space<vmem>>, %arg2: memref<32x128xbf16, #tpu.memory_space<vmem>>, %arg3: memref<32x128xbf16, #tpu.memory_space<vmem>>, %arg4: memref<128x128xbf16, #tpu.memory_space<vmem>>, %arg5: memref<1x128xf32, #tpu.memory_space<vmem>>, %arg6: memref<32x128xf32, #tpu.memory_space<vmem>>) attributes {dimension_semantics = [#tpu.dimension_semantics<parallel>], iteration_bounds = array<i64: 1>, scalar_prefetch = 0 : i64, scratch_operands = 0 : i64, tpu.core_type = #tpu.core_type<tc>, window_params = [{transform_indices = @transform_0, window_bounds = array<i64: 32, 32>}, {transform_indices = @transform_1, window_bounds = array<i64: 32, 128>}, {pipeline_mode = #tpu.pipeline_mode<synchronous>, transform_indices = @transform_2, window_bounds = array<i64: 32, 128>}, {pipeline_mode = #tpu.pipeline_mode<synchronous>, transform_indices = @transform_3, window_bounds = array<i64: 128, 128>}, {pipeline_mode = #tpu.pipeline_mode<synchronous>, transform_indices = @transform_4, window_bounds = array<i64: 1, 128>}, {transform_indices = @transform_5, window_bounds = array<i64: 32, 128>}]} {
    %c0 = arith.constant 0 : index
    %c0_0 = arith.constant 0 : index
    %0 = vector.load %arg1[%c0, %c0_0] : memref<32x32xbf16, #tpu.memory_space<vmem>>, vector<32x32xbf16>
    %c0_1 = arith.constant 0 : index
    %c0_2 = arith.constant 0 : index
    %1 = vector.load %arg3[%c0_1, %c0_2] : memref<32x128xbf16, #tpu.memory_space<vmem>>, vector<32x128xbf16>
    %cst = arith.constant dense<0.000000e+00> : vector<32x128xf32>
    %2 = tpu.matmul %0, %1, %cst {dimension_numbers = #tpu.dot_dimension_numbers<[1], [0], [0], [1], [0, 0, 1, 1], [], []>} : vector<32x32xbf16>, vector<32x128xbf16>, vector<32x128xf32> -> vector<32x128xf32>
    %c0_3 = arith.constant 0 : index
    %c0_4 = arith.constant 0 : index
    %3 = vector.load %arg2[%c0_3, %c0_4] : memref<32x128xbf16, #tpu.memory_space<vmem>>, vector<32x128xbf16>
    %c0_5 = arith.constant 0 : index
    %c0_6 = arith.constant 0 : index
    %4 = vector.load %arg4[%c0_5, %c0_6] : memref<128x128xbf16, #tpu.memory_space<vmem>>, vector<128x128xbf16>
    %cst_7 = arith.constant dense<0.000000e+00> : vector<32x128xf32>
    %5 = tpu.matmul %3, %4, %cst_7 {dimension_numbers = #tpu.dot_dimension_numbers<[1], [0], [0], [1], [0, 0, 1, 1], [], []>} : vector<32x128xbf16>, vector<128x128xbf16>, vector<32x128xf32> -> vector<32x128xf32>
    %6 = arith.addf %2, %5 : vector<32x128xf32>
    %c0_8 = arith.constant 0 : index
    %c0_9 = arith.constant 0 : index
    %7 = vector.load %arg5[%c0_8, %c0_9] : memref<1x128xf32, #tpu.memory_space<vmem>>, vector<1x128xf32>
    %8 = vector.broadcast %7 : vector<1x128xf32> to vector<32x128xf32>
    %9 = arith.addf %6, %8 : vector<32x128xf32>
    %c0_10 = arith.constant 0 : index
    %c0_11 = arith.constant 0 : index
    %10 = vector.load %arg6[%c0_10, %c0_11] : memref<32x128xf32, #tpu.memory_space<vmem>>, vector<32x128xf32>
    tpu.vector_store %arg6[%c0_10, %c0_11], %9 {strides = array<i32>} : memref<32x128xf32, #tpu.memory_space<vmem>>, vector<32x128xf32>,
    return
  }
  func.func @transform_0(%arg0: i32) -> (i32, i32) {
    %c0_i32 = arith.constant 0 : i32
    %c0_i32_0 = arith.constant 0 : i32
    return %arg0, %c0_i32 : i32, i32
  }
  func.func @transform_1(%arg0: i32) -> (i32, i32) {
    %c0_i32 = arith.constant 0 : i32
    %c0_i32_0 = arith.constant 0 : i32
    return %arg0, %c0_i32 : i32, i32
  }
  func.func @transform_2(%arg0: i32) -> (i32, i32) {
    %c0_i32 = arith.constant 0 : i32
    %c0_i32_0 = arith.constant 0 : i32
    %c0_i32_1 = arith.constant 0 : i32
    return %c0_i32, %c0_i32_0 : i32, i32
  }
  func.func @transform_3(%arg0: i32) -> (i32, i32) {
    %c0_i32 = arith.constant 0 : i32
    %c0_i32_0 = arith.constant 0 : i32
    %c0_i32_1 = arith.constant 0 : i32
    return %c0_i32, %c0_i32_0 : i32, i32
  }
  func.func @transform_4(%arg0: i32) -> (i32, i32) {
    %c0_i32 = arith.constant 0 : i32
    %c0_i32_0 = arith.constant 0 : i32
    %c0_i32_1 = arith.constant 0 : i32
    return %c0_i32, %c0_i32_0 : i32, i32
  }
  func.func @transform_5(%arg0: i32) -> (i32, i32) {
    %c0_i32 = arith.constant 0 : i32
    %c0_i32_0 = arith.constant 0 : i32
    return %arg0, %c0_i32 : i32, i32
  }
}

module attributes {stable_mosaic.version = 11 : i64} {
  func.func @_pool_output_kernel(%arg0: i32, %arg1: memref<2x16x128xf32, #tpu.memory_space<vmem>>, %arg2: memref<128x1xbf16, #tpu.memory_space<vmem>>, %arg3: memref<1x1xf32, #tpu.memory_space<vmem>>, %arg4: memref<2x1xf32, #tpu.memory_space<vmem>>) attributes {dimension_semantics = [#tpu.dimension_semantics<parallel>], iteration_bounds = array<i64: 1>, scalar_prefetch = 0 : i64, scratch_operands = 0 : i64, tpu.core_type = #tpu.core_type<tc>, window_params = [{transform_indices = @transform_0, window_bounds = array<i64: 2, 16, 128>}, {pipeline_mode = #tpu.pipeline_mode<synchronous>, transform_indices = @transform_1, window_bounds = array<i64: 128, 1>}, {pipeline_mode = #tpu.pipeline_mode<synchronous>, transform_indices = @transform_2, window_bounds = array<i64: 1, 1>}, {transform_indices = @transform_3, window_bounds = array<i64: 2, 1>}]} {
    %c0 = arith.constant 0 : index
    %c0_0 = arith.constant 0 : index
    %c0_1 = arith.constant 0 : index
    %0 = vector.load %arg1[%c0, %c0_0, %c0_1] : memref<2x16x128xf32, #tpu.memory_space<vmem>>, vector<2x16x128xf32>
    %cst = arith.constant dense<0xFF800000> : vector<2x128xf32>
    %1 = vector.multi_reduction <maximumf>, %0, %cst [1] : vector<2x16x128xf32> to vector<2x128xf32>
    %2 = arith.truncf %1 : vector<2x128xf32> to vector<2x128xbf16>
    %c0_2 = arith.constant 0 : index
    %c0_3 = arith.constant 0 : index
    %3 = vector.load %arg2[%c0_2, %c0_3] : memref<128x1xbf16, #tpu.memory_space<vmem>>, vector<128x1xbf16>
    %cst_4 = arith.constant dense<0.000000e+00> : vector<2x1xf32>
    %4 = tpu.matmul %2, %3, %cst_4 {dimension_numbers = #tpu.dot_dimension_numbers<[1], [0], [0], [1], [0, 0, 1, 1], [], []>} : vector<2x128xbf16>, vector<128x1xbf16>, vector<2x1xf32> -> vector<2x1xf32>
    %c0_5 = arith.constant 0 : index
    %c0_6 = arith.constant 0 : index
    %5 = vector.load %arg3[%c0_5, %c0_6] : memref<1x1xf32, #tpu.memory_space<vmem>>, vector<1x1xf32>
    %6 = vector.broadcast %5 : vector<1x1xf32> to vector<2x1xf32>
    %7 = arith.addf %4, %6 : vector<2x1xf32>
    %c0_7 = arith.constant 0 : index
    %c0_8 = arith.constant 0 : index
    %8 = vector.load %arg4[%c0_7, %c0_8] : memref<2x1xf32, #tpu.memory_space<vmem>>, vector<2x1xf32>
    tpu.vector_store %arg4[%c0_7, %c0_8], %7 {strides = array<i32>} : memref<2x1xf32, #tpu.memory_space<vmem>>, vector<2x1xf32>,
    return
  }
  func.func @transform_0(%arg0: i32) -> (i32, i32, i32) {
    %c0_i32 = arith.constant 0 : i32
    %c0_i32_0 = arith.constant 0 : i32
    %c0_i32_1 = arith.constant 0 : i32
    return %arg0, %c0_i32, %c0_i32_0 : i32, i32, i32
  }
  func.func @transform_1(%arg0: i32) -> (i32, i32) {
    %c0_i32 = arith.constant 0 : i32
    %c0_i32_0 = arith.constant 0 : i32
    %c0_i32_1 = arith.constant 0 : i32
    return %c0_i32, %c0_i32_0 : i32, i32
  }
  func.func @transform_2(%arg0: i32) -> (i32, i32) {
    %c0_i32 = arith.constant 0 : i32
    %c0_i32_0 = arith.constant 0 : i32
    %c0_i32_1 = arith.constant 0 : i32
    return %c0_i32, %c0_i32_0 : i32, i32
  }
  func.func @transform_3(%arg0: i32) -> (i32, i32) {
    %c0_i32 = arith.constant 0 : i32
    %c0_i32_0 = arith.constant 0 : i32
    return %arg0, %c0_i32 : i32, i32
  }
}

module attributes {stable_mosaic.version = 11 : i64} {
  func.func @kernel(%arg0: i32, %arg1: memref<2x16x128xf32, #tpu.memory_space<vmem>>, %arg2: memref<2x16x16xf32, #tpu.memory_space<vmem>>, %arg3: memref<2x128x128xbf16, #tpu.memory_space<vmem>>, %arg4: memref<2x128xf32, #tpu.memory_space<vmem>>, %arg5: memref<128x128xbf16, #tpu.memory_space<vmem>>, %arg6: memref<4x32xf32, #tpu.memory_space<vmem>>, %arg7: memref<4x32xf32, #tpu.memory_space<vmem>>, %arg8: memref<2x16x128xf32, #tpu.memory_space<vmem>>, %arg9: memref<32x128xf32, #tpu.memory_space<vmem>>) attributes {dimension_semantics = [#tpu.dimension_semantics<parallel>], iteration_bounds = array<i64: 1>, scalar_prefetch = 0 : i64, scratch_operands = 1 : i64, tpu.core_type = #tpu.core_type<tc>, window_params = [{transform_indices = @transform_0, window_bounds = array<i64: 2, 16, 128>}, {transform_indices = @transform_1, window_bounds = array<i64: 2, 16, 16>}, {pipeline_mode = #tpu.pipeline_mode<synchronous>, transform_indices = @transform_2, window_bounds = array<i64: 2, 128, 128>}, {pipeline_mode = #tpu.pipeline_mode<synchronous>, transform_indices = @transform_3, window_bounds = array<i64: 2, 128>}, {pipeline_mode = #tpu.pipeline_mode<synchronous>, transform_indices = @transform_4, window_bounds = array<i64: 128, 128>}, {pipeline_mode = #tpu.pipeline_mode<synchronous>, transform_indices = @transform_5, window_bounds = array<i64: 4, 32>}, {pipeline_mode = #tpu.pipeline_mode<synchronous>, transform_indices = @transform_6, window_bounds = array<i64: 4, 32>}, {transform_indices = @transform_7, window_bounds = array<i64: 2, 16, 128>}]} {
    %c0 = arith.constant 0 : index
    %c0_0 = arith.constant 0 : index
    %c0_1 = arith.constant 0 : index
    %0 = vector.load %arg2[%c0, %c0_0, %c0_1] : memref<2x16x16xf32, #tpu.memory_space<vmem>>, vector<2x16x16xf32>
    %c0_2 = arith.constant 0 : index
    %c0_3 = arith.constant 0 : index
    %c0_4 = arith.constant 0 : index
    %1 = vector.load %arg3[%c0_2, %c0_3, %c0_4] : memref<2x128x128xbf16, #tpu.memory_space<vmem>>, vector<2x128x128xbf16>
    %c0_5 = arith.constant 0 : index
    %c0_6 = arith.constant 0 : index
    %2 = vector.load %arg4[%c0_5, %c0_6] : memref<2x128xf32, #tpu.memory_space<vmem>>, vector<2x128xf32>
    %c0_7 = arith.constant 0 : index
    %c0_8 = arith.constant 0 : index
    %3 = vector.load %arg5[%c0_7, %c0_8] : memref<128x128xbf16, #tpu.memory_space<vmem>>, vector<128x128xbf16>
    %c0_9 = arith.constant 0 : index
    %c0_10 = arith.constant 0 : index
    %4 = vector.load %arg6[%c0_9, %c0_10] : memref<4x32xf32, #tpu.memory_space<vmem>>, vector<4x32xf32>
    %c0_11 = arith.constant 0 : index
    %c0_12 = arith.constant 0 : index
    %5 = vector.load %arg7[%c0_11, %c0_12] : memref<4x32xf32, #tpu.memory_space<vmem>>, vector<4x32xf32>
    %c0_13 = arith.constant 0 : index
    %c0_14 = arith.constant 0 : index
    %c0_15 = arith.constant 0 : index
    %6 = vector.load %arg1[%c0_13, %c0_14, %c0_15] : memref<2x16x128xf32, #tpu.memory_space<vmem>>, vector<2x16x128xf32>
    %7 = vector.shape_cast %6 : vector<2x16x128xf32> to vector<32x128xf32>
    %8 = arith.truncf %7 : vector<32x128xf32> to vector<32x128xbf16>
    %9 = vector.extract_strided_slice %1 {offsets = [0, 0, 0], sizes = [1, 128, 128], strides = [1, 1, 1]} : vector<2x128x128xbf16> to vector<1x128x128xbf16>
    %10 = vector.shape_cast %9 : vector<1x128x128xbf16> to vector<128x128xbf16>
    %cst = arith.constant dense<0.000000e+00> : vector<32x128xf32>
    %11 = tpu.matmul %8, %10, %cst {dimension_numbers = #tpu.dot_dimension_numbers<[1], [0], [0], [1], [0, 0, 1, 1], [], []>} : vector<32x128xbf16>, vector<128x128xbf16>, vector<32x128xf32> -> vector<32x128xf32>
    %12 = vector.extract_strided_slice %2 {offsets = [0, 0], sizes = [1, 128], strides = [1, 1]} : vector<2x128xf32> to vector<1x128xf32>
    %13 = vector.broadcast %12 : vector<1x128xf32> to vector<32x128xf32>
    %14 = arith.addf %11, %13 : vector<32x128xf32>
    %cst_16 = arith.constant 0.000000e+00 : f32
    %15 = vector.broadcast %cst_16 : f32 to vector<32x128xf32>
    %16 = arith.maximumf %14, %15 : vector<32x128xf32>
    %17 = arith.truncf %16 : vector<32x128xf32> to vector<32x128xbf16>
    %18 = vector.extract_strided_slice %1 {offsets = [1, 0, 0], sizes = [1, 128, 128], strides = [1, 1, 1]} : vector<2x128x128xbf16> to vector<1x128x128xbf16>
    %19 = vector.shape_cast %18 : vector<1x128x128xbf16> to vector<128x128xbf16>
    %cst_17 = arith.constant dense<0.000000e+00> : vector<32x128xf32>
    %20 = tpu.matmul %17, %19, %cst_17 {dimension_numbers = #tpu.dot_dimension_numbers<[1], [0], [0], [1], [0, 0, 1, 1], [], []>} : vector<32x128xbf16>, vector<128x128xbf16>, vector<32x128xf32> -> vector<32x128xf32>
    %21 = vector.extract_strided_slice %2 {offsets = [1, 0], sizes = [1, 128], strides = [1, 1]} : vector<2x128xf32> to vector<1x128xf32>
    %22 = vector.broadcast %21 : vector<1x128xf32> to vector<32x128xf32>
    %23 = arith.addf %20, %22 : vector<32x128xf32>
    %cst_18 = arith.constant 0.000000e+00 : f32
    %24 = vector.broadcast %cst_18 : f32 to vector<32x128xf32>
    %25 = arith.maximumf %23, %24 : vector<32x128xf32>
    %26 = arith.truncf %7 : vector<32x128xf32> to vector<32x128xbf16>
    %cst_19 = arith.constant dense<0.000000e+00> : vector<32x128xf32>
    %27 = tpu.matmul %26, %3, %cst_19 {dimension_numbers = #tpu.dot_dimension_numbers<[1], [0], [0], [1], [0, 0, 1, 1], [], []>} : vector<32x128xbf16>, vector<128x128xbf16>, vector<32x128xf32> -> vector<32x128xf32>
    %28 = vector.extract_strided_slice %25 {offsets = [0, 0], sizes = [16, 128], strides = [1, 1]} : vector<32x128xf32> to vector<16x128xf32>
    %29 = arith.truncf %28 : vector<16x128xf32> to vector<16x128xbf16>
    %cst_20 = arith.constant dense<0.000000e+00> : vector<16x16xf32>
    %30 = tpu.matmul %29, %29, %cst_20 {dimension_numbers = #tpu.dot_dimension_numbers<[1], [1], [0], [0], [0, 0, 1, 0], [], []>} : vector<16x128xbf16>, vector<16x128xbf16>, vector<16x16xf32> -> vector<16x16xf32>
    %cst_21 = arith.constant 0.0883883461 : f32
    %31 = vector.broadcast %cst_21 : f32 to vector<16x16xf32>
    %32 = arith.mulf %30, %31 : vector<16x16xf32>
    %33 = vector.extract_strided_slice %0 {offsets = [0, 0, 0], sizes = [1, 16, 16], strides = [1, 1, 1]} : vector<2x16x16xf32> to vector<1x16x16xf32>
    %34 = vector.shape_cast %33 : vector<1x16x16xf32> to vector<16x16xf32>
    %35 = arith.addf %34, %32 : vector<16x16xf32>
    %cst_22 = arith.constant 0.000000e+00 : f32
    %36 = vector.broadcast %cst_22 : f32 to vector<16x16xf32>
    %37 = arith.cmpf ogt, %35, %36 : vector<16x16xf32>
    %38 = vector.extract_strided_slice %27 {offsets = [0, 0], sizes = [16, 128], strides = [1, 1]} : vector<32x128xf32> to vector<16x128xf32>
    %39 = vector.extract_strided_slice %7 {offsets = [0, 0], sizes = [16, 128], strides = [1, 1]} : vector<32x128xf32> to vector<16x128xf32>
    %40 = vector.extract_strided_slice %38 {offsets = [0, 0], sizes = [16, 32], strides = [1, 1]} : vector<16x128xf32> to vector<16x32xf32>
    %41 = vector.extract_strided_slice %4 {offsets = [0, 0], sizes = [1, 32], strides = [1, 1]} : vector<4x32xf32> to vector<1x32xf32>
    %42 = vector.broadcast %41 : vector<1x32xf32> to vector<16x32xf32>
    %43 = arith.mulf %40, %42 : vector<16x32xf32>
    %cst_23 = arith.constant dense<0.000000e+00> : vector<16xf32>
    %44 = vector.multi_reduction <add>, %43, %cst_23 [1] : vector<16x32xf32> to vector<16xf32>
    %45 = vector.shape_cast %44 : vector<16xf32> to vector<16x1xf32>
    %46 = vector.extract_strided_slice %5 {offsets = [0, 0], sizes = [1, 32], strides = [1, 1]} : vector<4x32xf32> to vector<1x32xf32>
    %cst_24 = arith.constant dense<0.000000e+00> : vector<1x16xf32>
    %47 = tpu.matmul %46, %40, %cst_24 {dimension_numbers = #tpu.dot_dimension_numbers<[1], [1], [0], [0], [0, 0, 1, 0], [], []>} : vector<1x32xf32>, vector<16x32xf32>, vector<1x16xf32> -> vector<1x16xf32>
    %48 = vector.broadcast %45 : vector<16x1xf32> to vector<16x16xf32>
    %49 = vector.broadcast %47 : vector<1x16xf32> to vector<16x16xf32>
    %50 = arith.addf %48, %49 : vector<16x16xf32>
    %cst_25 = arith.constant 0.000000e+00 : f32
    %51 = vector.broadcast %cst_25 : f32 to vector<16x16xf32>
    %52 = arith.cmpf ogt, %50, %51 : vector<16x16xf32>
    %cst_26 = arith.constant 2.000000e-01 : f32
    %53 = vector.broadcast %cst_26 : f32 to vector<16x16xf32>
    %54 = arith.mulf %53, %50 : vector<16x16xf32>
    %55 = arith.select %52, %50, %54 : vector<16x16xi1>, vector<16x16xf32>
    %cst_27 = arith.constant -1.000000e+09 : f32
    %56 = vector.broadcast %cst_27 : f32 to vector<16x16xf32>
    %57 = arith.select %37, %55, %56 : vector<16x16xi1>, vector<16x16xf32>
    %cst_28 = arith.constant dense<0xFF800000> : vector<16xf32>
    %58 = vector.multi_reduction <maximumf>, %57, %cst_28 [1] : vector<16x16xf32> to vector<16xf32>
    %59 = vector.shape_cast %58 : vector<16xf32> to vector<16x1xf32>
    %60 = vector.broadcast %59 : vector<16x1xf32> to vector<16x16xf32>
    %61 = arith.subf %57, %60 : vector<16x16xf32>
    %62 = math.exp %61 : vector<16x16xf32>
    %cst_29 = arith.constant dense<0.000000e+00> : vector<16xf32>
    %63 = vector.multi_reduction <add>, %62, %cst_29 [1] : vector<16x16xf32> to vector<16xf32>
    %64 = vector.shape_cast %63 : vector<16xf32> to vector<16x1xf32>
    %65 = tpu.reciprocal %64 {approx = true} : vector<16x1xf32> -> vector<16x1xf32>
    %66 = vector.broadcast %65 : vector<16x1xf32> to vector<16x16xf32>
    %67 = arith.mulf %62, %66 : vector<16x16xf32>
    %68 = arith.truncf %67 : vector<16x16xf32> to vector<16x16xbf16>
    %69 = arith.truncf %40 : vector<16x32xf32> to vector<16x32xbf16>
    %cst_30 = arith.constant dense<0.000000e+00> : vector<16x32xf32>
    %70 = tpu.matmul %68, %69, %cst_30 {dimension_numbers = #tpu.dot_dimension_numbers<[1], [0], [0], [1], [0, 0, 1, 1], [], []>} : vector<16x16xbf16>, vector<16x32xbf16>, vector<16x32xf32> -> vector<16x32xf32>
    %cst_31 = arith.constant 0.000000e+00 : f32
    %71 = vector.broadcast %cst_31 : f32 to vector<16x32xf32>
    %72 = arith.cmpf ogt, %70, %71 : vector<16x32xf32>
    %cst_32 = arith.constant 0.000000e+00 : f32
    %73 = vector.broadcast %cst_32 : f32 to vector<16x32xf32>
    %74 = arith.minimumf %70, %73 : vector<16x32xf32>
    %75 = math.exp %74 : vector<16x32xf32>
    %cst_33 = arith.constant 1.000000e+00 : f32
    %76 = vector.broadcast %cst_33 : f32 to vector<16x32xf32>
    %77 = arith.subf %75, %76 : vector<16x32xf32>
    %78 = arith.select %72, %70, %77 : vector<16x32xi1>, vector<16x32xf32>
    %79 = vector.extract_strided_slice %39 {offsets = [0, 0], sizes = [16, 32], strides = [1, 1]} : vector<16x128xf32> to vector<16x32xf32>
    %80 = arith.addf %79, %78 : vector<16x32xf32>
    %c0_34 = arith.constant 0 : index
    %c0_35 = arith.constant 0 : index
    %81 = vector.load %arg9[%c0_34, %c0_35] : memref<32x128xf32, #tpu.memory_space<vmem>>, vector<16x32xf32>
    tpu.vector_store %arg9[%c0_34, %c0_35], %80 {strides = array<i32>} : memref<32x128xf32, #tpu.memory_space<vmem>>, vector<16x32xf32>,
    %82 = vector.extract_strided_slice %38 {offsets = [0, 32], sizes = [16, 32], strides = [1, 1]} : vector<16x128xf32> to vector<16x32xf32>
    %83 = vector.extract_strided_slice %4 {offsets = [1, 0], sizes = [1, 32], strides = [1, 1]} : vector<4x32xf32> to vector<1x32xf32>
    %84 = vector.broadcast %83 : vector<1x32xf32> to vector<16x32xf32>
    %85 = arith.mulf %82, %84 : vector<16x32xf32>
    %cst_36 = arith.constant dense<0.000000e+00> : vector<16xf32>
    %86 = vector.multi_reduction <add>, %85, %cst_36 [1] : vector<16x32xf32> to vector<16xf32>
    %87 = vector.shape_cast %86 : vector<16xf32> to vector<16x1xf32>
    %88 = vector.extract_strided_slice %5 {offsets = [1, 0], sizes = [1, 32], strides = [1, 1]} : vector<4x32xf32> to vector<1x32xf32>
    %cst_37 = arith.constant dense<0.000000e+00> : vector<1x16xf32>
    %89 = tpu.matmul %88, %82, %cst_37 {dimension_numbers = #tpu.dot_dimension_numbers<[1], [1], [0], [0], [0, 0, 1, 0], [], []>} : vector<1x32xf32>, vector<16x32xf32>, vector<1x16xf32> -> vector<1x16xf32>
    %90 = vector.broadcast %87 : vector<16x1xf32> to vector<16x16xf32>
    %91 = vector.broadcast %89 : vector<1x16xf32> to vector<16x16xf32>
    %92 = arith.addf %90, %91 : vector<16x16xf32>
    %cst_38 = arith.constant 0.000000e+00 : f32
    %93 = vector.broadcast %cst_38 : f32 to vector<16x16xf32>
    %94 = arith.cmpf ogt, %92, %93 : vector<16x16xf32>
    %cst_39 = arith.constant 2.000000e-01 : f32
    %95 = vector.broadcast %cst_39 : f32 to vector<16x16xf32>
    %96 = arith.mulf %95, %92 : vector<16x16xf32>
    %97 = arith.select %94, %92, %96 : vector<16x16xi1>, vector<16x16xf32>
    %cst_40 = arith.constant -1.000000e+09 : f32
    %98 = vector.broadcast %cst_40 : f32 to vector<16x16xf32>
    %99 = arith.select %37, %97, %98 : vector<16x16xi1>, vector<16x16xf32>
    %cst_41 = arith.constant dense<0xFF800000> : vector<16xf32>
    %100 = vector.multi_reduction <maximumf>, %99, %cst_41 [1] : vector<16x16xf32> to vector<16xf32>
    %101 = vector.shape_cast %100 : vector<16xf32> to vector<16x1xf32>
    %102 = vector.broadcast %101 : vector<16x1xf32> to vector<16x16xf32>
    %103 = arith.subf %99, %102 : vector<16x16xf32>
    %104 = math.exp %103 : vector<16x16xf32>
    %cst_42 = arith.constant dense<0.000000e+00> : vector<16xf32>
    %105 = vector.multi_reduction <add>, %104, %cst_42 [1] : vector<16x16xf32> to vector<16xf32>
    %106 = vector.shape_cast %105 : vector<16xf32> to vector<16x1xf32>
    %107 = tpu.reciprocal %106 {approx = true} : vector<16x1xf32> -> vector<16x1xf32>
    %108 = vector.broadcast %107 : vector<16x1xf32> to vector<16x16xf32>
    %109 = arith.mulf %104, %108 : vector<16x16xf32>
    %110 = arith.truncf %109 : vector<16x16xf32> to vector<16x16xbf16>
    %111 = arith.truncf %82 : vector<16x32xf32> to vector<16x32xbf16>
    %cst_43 = arith.constant dense<0.000000e+00> : vector<16x32xf32>
    %112 = tpu.matmul %110, %111, %cst_43 {dimension_numbers = #tpu.dot_dimension_numbers<[1], [0], [0], [1], [0, 0, 1, 1], [], []>} : vector<16x16xbf16>, vector<16x32xbf16>, vector<16x32xf32> -> vector<16x32xf32>
    %cst_44 = arith.constant 0.000000e+00 : f32
    %113 = vector.broadcast %cst_44 : f32 to vector<16x32xf32>
    %114 = arith.cmpf ogt, %112, %113 : vector<16x32xf32>
    %cst_45 = arith.constant 0.000000e+00 : f32
    %115 = vector.broadcast %cst_45 : f32 to vector<16x32xf32>
    %116 = arith.minimumf %112, %115 : vector<16x32xf32>
    %117 = math.exp %116 : vector<16x32xf32>
    %cst_46 = arith.constant 1.000000e+00 : f32
    %118 = vector.broadcast %cst_46 : f32 to vector<16x32xf32>
    %119 = arith.subf %117, %118 : vector<16x32xf32>
    %120 = arith.select %114, %112, %119 : vector<16x32xi1>, vector<16x32xf32>
    %121 = vector.extract_strided_slice %39 {offsets = [0, 32], sizes = [16, 32], strides = [1, 1]} : vector<16x128xf32> to vector<16x32xf32>
    %122 = arith.addf %121, %120 : vector<16x32xf32>
    %c0_47 = arith.constant 0 : index
    %c32 = arith.constant 32 : index
    %123 = vector.load %arg9[%c0_47, %c32] : memref<32x128xf32, #tpu.memory_space<vmem>>, vector<16x32xf32>
    tpu.vector_store %arg9[%c0_47, %c32], %122 {strides = array<i32>} : memref<32x128xf32, #tpu.memory_space<vmem>>, vector<16x32xf32>,
    %124 = vector.extract_strided_slice %38 {offsets = [0, 64], sizes = [16, 32], strides = [1, 1]} : vector<16x128xf32> to vector<16x32xf32>
    %125 = vector.extract_strided_slice %4 {offsets = [2, 0], sizes = [1, 32], strides = [1, 1]} : vector<4x32xf32> to vector<1x32xf32>
    %126 = vector.broadcast %125 : vector<1x32xf32> to vector<16x32xf32>
    %127 = arith.mulf %124, %126 : vector<16x32xf32>
    %cst_48 = arith.constant dense<0.000000e+00> : vector<16xf32>
    %128 = vector.multi_reduction <add>, %127, %cst_48 [1] : vector<16x32xf32> to vector<16xf32>
    %129 = vector.shape_cast %128 : vector<16xf32> to vector<16x1xf32>
    %130 = vector.extract_strided_slice %5 {offsets = [2, 0], sizes = [1, 32], strides = [1, 1]} : vector<4x32xf32> to vector<1x32xf32>
    %cst_49 = arith.constant dense<0.000000e+00> : vector<1x16xf32>
    %131 = tpu.matmul %130, %124, %cst_49 {dimension_numbers = #tpu.dot_dimension_numbers<[1], [1], [0], [0], [0, 0, 1, 0], [], []>} : vector<1x32xf32>, vector<16x32xf32>, vector<1x16xf32> -> vector<1x16xf32>
    %132 = vector.broadcast %129 : vector<16x1xf32> to vector<16x16xf32>
    %133 = vector.broadcast %131 : vector<1x16xf32> to vector<16x16xf32>
    %134 = arith.addf %132, %133 : vector<16x16xf32>
    %cst_50 = arith.constant 0.000000e+00 : f32
    %135 = vector.broadcast %cst_50 : f32 to vector<16x16xf32>
    %136 = arith.cmpf ogt, %134, %135 : vector<16x16xf32>
    %cst_51 = arith.constant 2.000000e-01 : f32
    %137 = vector.broadcast %cst_51 : f32 to vector<16x16xf32>
    %138 = arith.mulf %137, %134 : vector<16x16xf32>
    %139 = arith.select %136, %134, %138 : vector<16x16xi1>, vector<16x16xf32>
    %cst_52 = arith.constant -1.000000e+09 : f32
    %140 = vector.broadcast %cst_52 : f32 to vector<16x16xf32>
    %141 = arith.select %37, %139, %140 : vector<16x16xi1>, vector<16x16xf32>
    %cst_53 = arith.constant dense<0xFF800000> : vector<16xf32>
    %142 = vector.multi_reduction <maximumf>, %141, %cst_53 [1] : vector<16x16xf32> to vector<16xf32>
    %143 = vector.shape_cast %142 : vector<16xf32> to vector<16x1xf32>
    %144 = vector.broadcast %143 : vector<16x1xf32> to vector<16x16xf32>
    %145 = arith.subf %141, %144 : vector<16x16xf32>
    %146 = math.exp %145 : vector<16x16xf32>
    %cst_54 = arith.constant dense<0.000000e+00> : vector<16xf32>
    %147 = vector.multi_reduction <add>, %146, %cst_54 [1] : vector<16x16xf32> to vector<16xf32>
    %148 = vector.shape_cast %147 : vector<16xf32> to vector<16x1xf32>
    %149 = tpu.reciprocal %148 {approx = true} : vector<16x1xf32> -> vector<16x1xf32>
    %150 = vector.broadcast %149 : vector<16x1xf32> to vector<16x16xf32>
    %151 = arith.mulf %146, %150 : vector<16x16xf32>
    %152 = arith.truncf %151 : vector<16x16xf32> to vector<16x16xbf16>
    %153 = arith.truncf %124 : vector<16x32xf32> to vector<16x32xbf16>
    %cst_55 = arith.constant dense<0.000000e+00> : vector<16x32xf32>
    %154 = tpu.matmul %152, %153, %cst_55 {dimension_numbers = #tpu.dot_dimension_numbers<[1], [0], [0], [1], [0, 0, 1, 1], [], []>} : vector<16x16xbf16>, vector<16x32xbf16>, vector<16x32xf32> -> vector<16x32xf32>
    %cst_56 = arith.constant 0.000000e+00 : f32
    %155 = vector.broadcast %cst_56 : f32 to vector<16x32xf32>
    %156 = arith.cmpf ogt, %154, %155 : vector<16x32xf32>
    %cst_57 = arith.constant 0.000000e+00 : f32
    %157 = vector.broadcast %cst_57 : f32 to vector<16x32xf32>
    %158 = arith.minimumf %154, %157 : vector<16x32xf32>
    %159 = math.exp %158 : vector<16x32xf32>
    %cst_58 = arith.constant 1.000000e+00 : f32
    %160 = vector.broadcast %cst_58 : f32 to vector<16x32xf32>
    %161 = arith.subf %159, %160 : vector<16x32xf32>
    %162 = arith.select %156, %154, %161 : vector<16x32xi1>, vector<16x32xf32>
    %163 = vector.extract_strided_slice %39 {offsets = [0, 64], sizes = [16, 32], strides = [1, 1]} : vector<16x128xf32> to vector<16x32xf32>
    %164 = arith.addf %163, %162 : vector<16x32xf32>
    %c0_59 = arith.constant 0 : index
    %c64 = arith.constant 64 : index
    %165 = vector.load %arg9[%c0_59, %c64] : memref<32x128xf32, #tpu.memory_space<vmem>>, vector<16x32xf32>
    tpu.vector_store %arg9[%c0_59, %c64], %164 {strides = array<i32>} : memref<32x128xf32, #tpu.memory_space<vmem>>, vector<16x32xf32>,
    %166 = vector.extract_strided_slice %38 {offsets = [0, 96], sizes = [16, 32], strides = [1, 1]} : vector<16x128xf32> to vector<16x32xf32>
    %167 = vector.extract_strided_slice %4 {offsets = [3, 0], sizes = [1, 32], strides = [1, 1]} : vector<4x32xf32> to vector<1x32xf32>
    %168 = vector.broadcast %167 : vector<1x32xf32> to vector<16x32xf32>
    %169 = arith.mulf %166, %168 : vector<16x32xf32>
    %cst_60 = arith.constant dense<0.000000e+00> : vector<16xf32>
    %170 = vector.multi_reduction <add>, %169, %cst_60 [1] : vector<16x32xf32> to vector<16xf32>
    %171 = vector.shape_cast %170 : vector<16xf32> to vector<16x1xf32>
    %172 = vector.extract_strided_slice %5 {offsets = [3, 0], sizes = [1, 32], strides = [1, 1]} : vector<4x32xf32> to vector<1x32xf32>
    %cst_61 = arith.constant dense<0.000000e+00> : vector<1x16xf32>
    %173 = tpu.matmul %172, %166, %cst_61 {dimension_numbers = #tpu.dot_dimension_numbers<[1], [1], [0], [0], [0, 0, 1, 0], [], []>} : vector<1x32xf32>, vector<16x32xf32>, vector<1x16xf32> -> vector<1x16xf32>
    %174 = vector.broadcast %171 : vector<16x1xf32> to vector<16x16xf32>
    %175 = vector.broadcast %173 : vector<1x16xf32> to vector<16x16xf32>
    %176 = arith.addf %174, %175 : vector<16x16xf32>
    %cst_62 = arith.constant 0.000000e+00 : f32
    %177 = vector.broadcast %cst_62 : f32 to vector<16x16xf32>
    %178 = arith.cmpf ogt, %176, %177 : vector<16x16xf32>
    %cst_63 = arith.constant 2.000000e-01 : f32
    %179 = vector.broadcast %cst_63 : f32 to vector<16x16xf32>
    %180 = arith.mulf %179, %176 : vector<16x16xf32>
    %181 = arith.select %178, %176, %180 : vector<16x16xi1>, vector<16x16xf32>
    %cst_64 = arith.constant -1.000000e+09 : f32
    %182 = vector.broadcast %cst_64 : f32 to vector<16x16xf32>
    %183 = arith.select %37, %181, %182 : vector<16x16xi1>, vector<16x16xf32>
    %cst_65 = arith.constant dense<0xFF800000> : vector<16xf32>
    %184 = vector.multi_reduction <maximumf>, %183, %cst_65 [1] : vector<16x16xf32> to vector<16xf32>
    %185 = vector.shape_cast %184 : vector<16xf32> to vector<16x1xf32>
    %186 = vector.broadcast %185 : vector<16x1xf32> to vector<16x16xf32>
    %187 = arith.subf %183, %186 : vector<16x16xf32>
    %188 = math.exp %187 : vector<16x16xf32>
    %cst_66 = arith.constant dense<0.000000e+00> : vector<16xf32>
    %189 = vector.multi_reduction <add>, %188, %cst_66 [1] : vector<16x16xf32> to vector<16xf32>
    %190 = vector.shape_cast %189 : vector<16xf32> to vector<16x1xf32>
    %191 = tpu.reciprocal %190 {approx = true} : vector<16x1xf32> -> vector<16x1xf32>
    %192 = vector.broadcast %191 : vector<16x1xf32> to vector<16x16xf32>
    %193 = arith.mulf %188, %192 : vector<16x16xf32>
    %194 = arith.truncf %193 : vector<16x16xf32> to vector<16x16xbf16>
    %195 = arith.truncf %166 : vector<16x32xf32> to vector<16x32xbf16>
    %cst_67 = arith.constant dense<0.000000e+00> : vector<16x32xf32>
    %196 = tpu.matmul %194, %195, %cst_67 {dimension_numbers = #tpu.dot_dimension_numbers<[1], [0], [0], [1], [0, 0, 1, 1], [], []>} : vector<16x16xbf16>, vector<16x32xbf16>, vector<16x32xf32> -> vector<16x32xf32>
    %cst_68 = arith.constant 0.000000e+00 : f32
    %197 = vector.broadcast %cst_68 : f32 to vector<16x32xf32>
    %198 = arith.cmpf ogt, %196, %197 : vector<16x32xf32>
    %cst_69 = arith.constant 0.000000e+00 : f32
    %199 = vector.broadcast %cst_69 : f32 to vector<16x32xf32>
    %200 = arith.minimumf %196, %199 : vector<16x32xf32>
    %201 = math.exp %200 : vector<16x32xf32>
    %cst_70 = arith.constant 1.000000e+00 : f32
    %202 = vector.broadcast %cst_70 : f32 to vector<16x32xf32>
    %203 = arith.subf %201, %202 : vector<16x32xf32>
    %204 = arith.select %198, %196, %203 : vector<16x32xi1>, vector<16x32xf32>
    %205 = vector.extract_strided_slice %39 {offsets = [0, 96], sizes = [16, 32], strides = [1, 1]} : vector<16x128xf32> to vector<16x32xf32>
    %206 = arith.addf %205, %204 : vector<16x32xf32>
    %c0_71 = arith.constant 0 : index
    %c96 = arith.constant 96 : index
    %207 = vector.load %arg9[%c0_71, %c96] : memref<32x128xf32, #tpu.memory_space<vmem>>, vector<16x32xf32>
    tpu.vector_store %arg9[%c0_71, %c96], %206 {strides = array<i32>} : memref<32x128xf32, #tpu.memory_space<vmem>>, vector<16x32xf32>,
    %208 = vector.extract_strided_slice %25 {offsets = [16, 0], sizes = [16, 128], strides = [1, 1]} : vector<32x128xf32> to vector<16x128xf32>
    %209 = arith.truncf %208 : vector<16x128xf32> to vector<16x128xbf16>
    %cst_72 = arith.constant dense<0.000000e+00> : vector<16x16xf32>
    %210 = tpu.matmul %209, %209, %cst_72 {dimension_numbers = #tpu.dot_dimension_numbers<[1], [1], [0], [0], [0, 0, 1, 0], [], []>} : vector<16x128xbf16>, vector<16x128xbf16>, vector<16x16xf32> -> vector<16x16xf32>
    %cst_73 = arith.constant 0.0883883461 : f32
    %211 = vector.broadcast %cst_73 : f32 to vector<16x16xf32>
    %212 = arith.mulf %210, %211 : vector<16x16xf32>
    %213 = vector.extract_strided_slice %0 {offsets = [1, 0, 0], sizes = [1, 16, 16], strides = [1, 1, 1]} : vector<2x16x16xf32> to vector<1x16x16xf32>
    %214 = vector.shape_cast %213 : vector<1x16x16xf32> to vector<16x16xf32>
    %215 = arith.addf %214, %212 : vector<16x16xf32>
    %cst_74 = arith.constant 0.000000e+00 : f32
    %216 = vector.broadcast %cst_74 : f32 to vector<16x16xf32>
    %217 = arith.cmpf ogt, %215, %216 : vector<16x16xf32>
    %218 = vector.extract_strided_slice %27 {offsets = [16, 0], sizes = [16, 128], strides = [1, 1]} : vector<32x128xf32> to vector<16x128xf32>
    %219 = vector.extract_strided_slice %7 {offsets = [16, 0], sizes = [16, 128], strides = [1, 1]} : vector<32x128xf32> to vector<16x128xf32>
    %220 = vector.extract_strided_slice %218 {offsets = [0, 0], sizes = [16, 32], strides = [1, 1]} : vector<16x128xf32> to vector<16x32xf32>
    %221 = vector.extract_strided_slice %4 {offsets = [0, 0], sizes = [1, 32], strides = [1, 1]} : vector<4x32xf32> to vector<1x32xf32>
    %222 = vector.broadcast %221 : vector<1x32xf32> to vector<16x32xf32>
    %223 = arith.mulf %220, %222 : vector<16x32xf32>
    %cst_75 = arith.constant dense<0.000000e+00> : vector<16xf32>
    %224 = vector.multi_reduction <add>, %223, %cst_75 [1] : vector<16x32xf32> to vector<16xf32>
    %225 = vector.shape_cast %224 : vector<16xf32> to vector<16x1xf32>
    %226 = vector.extract_strided_slice %5 {offsets = [0, 0], sizes = [1, 32], strides = [1, 1]} : vector<4x32xf32> to vector<1x32xf32>
    %cst_76 = arith.constant dense<0.000000e+00> : vector<1x16xf32>
    %227 = tpu.matmul %226, %220, %cst_76 {dimension_numbers = #tpu.dot_dimension_numbers<[1], [1], [0], [0], [0, 0, 1, 0], [], []>} : vector<1x32xf32>, vector<16x32xf32>, vector<1x16xf32> -> vector<1x16xf32>
    %228 = vector.broadcast %225 : vector<16x1xf32> to vector<16x16xf32>
    %229 = vector.broadcast %227 : vector<1x16xf32> to vector<16x16xf32>
    %230 = arith.addf %228, %229 : vector<16x16xf32>
    %cst_77 = arith.constant 0.000000e+00 : f32
    %231 = vector.broadcast %cst_77 : f32 to vector<16x16xf32>
    %232 = arith.cmpf ogt, %230, %231 : vector<16x16xf32>
    %cst_78 = arith.constant 2.000000e-01 : f32
    %233 = vector.broadcast %cst_78 : f32 to vector<16x16xf32>
    %234 = arith.mulf %233, %230 : vector<16x16xf32>
    %235 = arith.select %232, %230, %234 : vector<16x16xi1>, vector<16x16xf32>
    %cst_79 = arith.constant -1.000000e+09 : f32
    %236 = vector.broadcast %cst_79 : f32 to vector<16x16xf32>
    %237 = arith.select %217, %235, %236 : vector<16x16xi1>, vector<16x16xf32>
    %cst_80 = arith.constant dense<0xFF800000> : vector<16xf32>
    %238 = vector.multi_reduction <maximumf>, %237, %cst_80 [1] : vector<16x16xf32> to vector<16xf32>
    %239 = vector.shape_cast %238 : vector<16xf32> to vector<16x1xf32>
    %240 = vector.broadcast %239 : vector<16x1xf32> to vector<16x16xf32>
    %241 = arith.subf %237, %240 : vector<16x16xf32>
    %242 = math.exp %241 : vector<16x16xf32>
    %cst_81 = arith.constant dense<0.000000e+00> : vector<16xf32>
    %243 = vector.multi_reduction <add>, %242, %cst_81 [1] : vector<16x16xf32> to vector<16xf32>
    %244 = vector.shape_cast %243 : vector<16xf32> to vector<16x1xf32>
    %245 = tpu.reciprocal %244 {approx = true} : vector<16x1xf32> -> vector<16x1xf32>
    %246 = vector.broadcast %245 : vector<16x1xf32> to vector<16x16xf32>
    %247 = arith.mulf %242, %246 : vector<16x16xf32>
    %248 = arith.truncf %247 : vector<16x16xf32> to vector<16x16xbf16>
    %249 = arith.truncf %220 : vector<16x32xf32> to vector<16x32xbf16>
    %cst_82 = arith.constant dense<0.000000e+00> : vector<16x32xf32>
    %250 = tpu.matmul %248, %249, %cst_82 {dimension_numbers = #tpu.dot_dimension_numbers<[1], [0], [0], [1], [0, 0, 1, 1], [], []>} : vector<16x16xbf16>, vector<16x32xbf16>, vector<16x32xf32> -> vector<16x32xf32>
    %cst_83 = arith.constant 0.000000e+00 : f32
    %251 = vector.broadcast %cst_83 : f32 to vector<16x32xf32>
    %252 = arith.cmpf ogt, %250, %251 : vector<16x32xf32>
    %cst_84 = arith.constant 0.000000e+00 : f32
    %253 = vector.broadcast %cst_84 : f32 to vector<16x32xf32>
    %254 = arith.minimumf %250, %253 : vector<16x32xf32>
    %255 = math.exp %254 : vector<16x32xf32>
    %cst_85 = arith.constant 1.000000e+00 : f32
    %256 = vector.broadcast %cst_85 : f32 to vector<16x32xf32>
    %257 = arith.subf %255, %256 : vector<16x32xf32>
    %258 = arith.select %252, %250, %257 : vector<16x32xi1>, vector<16x32xf32>
    %259 = vector.extract_strided_slice %219 {offsets = [0, 0], sizes = [16, 32], strides = [1, 1]} : vector<16x128xf32> to vector<16x32xf32>
    %260 = arith.addf %259, %258 : vector<16x32xf32>
    %c16 = arith.constant 16 : index
    %c0_86 = arith.constant 0 : index
    %261 = vector.load %arg9[%c16, %c0_86] : memref<32x128xf32, #tpu.memory_space<vmem>>, vector<16x32xf32>
    tpu.vector_store %arg9[%c16, %c0_86], %260 {strides = array<i32>} : memref<32x128xf32, #tpu.memory_space<vmem>>, vector<16x32xf32>,
    %262 = vector.extract_strided_slice %218 {offsets = [0, 32], sizes = [16, 32], strides = [1, 1]} : vector<16x128xf32> to vector<16x32xf32>
    %263 = vector.extract_strided_slice %4 {offsets = [1, 0], sizes = [1, 32], strides = [1, 1]} : vector<4x32xf32> to vector<1x32xf32>
    %264 = vector.broadcast %263 : vector<1x32xf32> to vector<16x32xf32>
    %265 = arith.mulf %262, %264 : vector<16x32xf32>
    %cst_87 = arith.constant dense<0.000000e+00> : vector<16xf32>
    %266 = vector.multi_reduction <add>, %265, %cst_87 [1] : vector<16x32xf32> to vector<16xf32>
    %267 = vector.shape_cast %266 : vector<16xf32> to vector<16x1xf32>
    %268 = vector.extract_strided_slice %5 {offsets = [1, 0], sizes = [1, 32], strides = [1, 1]} : vector<4x32xf32> to vector<1x32xf32>
    %cst_88 = arith.constant dense<0.000000e+00> : vector<1x16xf32>
    %269 = tpu.matmul %268, %262, %cst_88 {dimension_numbers = #tpu.dot_dimension_numbers<[1], [1], [0], [0], [0, 0, 1, 0], [], []>} : vector<1x32xf32>, vector<16x32xf32>, vector<1x16xf32> -> vector<1x16xf32>
    %270 = vector.broadcast %267 : vector<16x1xf32> to vector<16x16xf32>
    %271 = vector.broadcast %269 : vector<1x16xf32> to vector<16x16xf32>
    %272 = arith.addf %270, %271 : vector<16x16xf32>
    %cst_89 = arith.constant 0.000000e+00 : f32
    %273 = vector.broadcast %cst_89 : f32 to vector<16x16xf32>
    %274 = arith.cmpf ogt, %272, %273 : vector<16x16xf32>
    %cst_90 = arith.constant 2.000000e-01 : f32
    %275 = vector.broadcast %cst_90 : f32 to vector<16x16xf32>
    %276 = arith.mulf %275, %272 : vector<16x16xf32>
    %277 = arith.select %274, %272, %276 : vector<16x16xi1>, vector<16x16xf32>
    %cst_91 = arith.constant -1.000000e+09 : f32
    %278 = vector.broadcast %cst_91 : f32 to vector<16x16xf32>
    %279 = arith.select %217, %277, %278 : vector<16x16xi1>, vector<16x16xf32>
    %cst_92 = arith.constant dense<0xFF800000> : vector<16xf32>
    %280 = vector.multi_reduction <maximumf>, %279, %cst_92 [1] : vector<16x16xf32> to vector<16xf32>
    %281 = vector.shape_cast %280 : vector<16xf32> to vector<16x1xf32>
    %282 = vector.broadcast %281 : vector<16x1xf32> to vector<16x16xf32>
    %283 = arith.subf %279, %282 : vector<16x16xf32>
    %284 = math.exp %283 : vector<16x16xf32>
    %cst_93 = arith.constant dense<0.000000e+00> : vector<16xf32>
    %285 = vector.multi_reduction <add>, %284, %cst_93 [1] : vector<16x16xf32> to vector<16xf32>
    %286 = vector.shape_cast %285 : vector<16xf32> to vector<16x1xf32>
    %287 = tpu.reciprocal %286 {approx = true} : vector<16x1xf32> -> vector<16x1xf32>
    %288 = vector.broadcast %287 : vector<16x1xf32> to vector<16x16xf32>
    %289 = arith.mulf %284, %288 : vector<16x16xf32>
    %290 = arith.truncf %289 : vector<16x16xf32> to vector<16x16xbf16>
    %291 = arith.truncf %262 : vector<16x32xf32> to vector<16x32xbf16>
    %cst_94 = arith.constant dense<0.000000e+00> : vector<16x32xf32>
    %292 = tpu.matmul %290, %291, %cst_94 {dimension_numbers = #tpu.dot_dimension_numbers<[1], [0], [0], [1], [0, 0, 1, 1], [], []>} : vector<16x16xbf16>, vector<16x32xbf16>, vector<16x32xf32> -> vector<16x32xf32>
    %cst_95 = arith.constant 0.000000e+00 : f32
    %293 = vector.broadcast %cst_95 : f32 to vector<16x32xf32>
    %294 = arith.cmpf ogt, %292, %293 : vector<16x32xf32>
    %cst_96 = arith.constant 0.000000e+00 : f32
    %295 = vector.broadcast %cst_96 : f32 to vector<16x32xf32>
    %296 = arith.minimumf %292, %295 : vector<16x32xf32>
    %297 = math.exp %296 : vector<16x32xf32>
    %cst_97 = arith.constant 1.000000e+00 : f32
    %298 = vector.broadcast %cst_97 : f32 to vector<16x32xf32>
    %299 = arith.subf %297, %298 : vector<16x32xf32>
    %300 = arith.select %294, %292, %299 : vector<16x32xi1>, vector<16x32xf32>
    %301 = vector.extract_strided_slice %219 {offsets = [0, 32], sizes = [16, 32], strides = [1, 1]} : vector<16x128xf32> to vector<16x32xf32>
    %302 = arith.addf %301, %300 : vector<16x32xf32>
    %c16_98 = arith.constant 16 : index
    %c32_99 = arith.constant 32 : index
    %303 = vector.load %arg9[%c16_98, %c32_99] : memref<32x128xf32, #tpu.memory_space<vmem>>, vector<16x32xf32>
    tpu.vector_store %arg9[%c16_98, %c32_99], %302 {strides = array<i32>} : memref<32x128xf32, #tpu.memory_space<vmem>>, vector<16x32xf32>,
    %304 = vector.extract_strided_slice %218 {offsets = [0, 64], sizes = [16, 32], strides = [1, 1]} : vector<16x128xf32> to vector<16x32xf32>
    %305 = vector.extract_strided_slice %4 {offsets = [2, 0], sizes = [1, 32], strides = [1, 1]} : vector<4x32xf32> to vector<1x32xf32>
    %306 = vector.broadcast %305 : vector<1x32xf32> to vector<16x32xf32>
    %307 = arith.mulf %304, %306 : vector<16x32xf32>
    %cst_100 = arith.constant dense<0.000000e+00> : vector<16xf32>
    %308 = vector.multi_reduction <add>, %307, %cst_100 [1] : vector<16x32xf32> to vector<16xf32>
    %309 = vector.shape_cast %308 : vector<16xf32> to vector<16x1xf32>
    %310 = vector.extract_strided_slice %5 {offsets = [2, 0], sizes = [1, 32], strides = [1, 1]} : vector<4x32xf32> to vector<1x32xf32>
    %cst_101 = arith.constant dense<0.000000e+00> : vector<1x16xf32>
    %311 = tpu.matmul %310, %304, %cst_101 {dimension_numbers = #tpu.dot_dimension_numbers<[1], [1], [0], [0], [0, 0, 1, 0], [], []>} : vector<1x32xf32>, vector<16x32xf32>, vector<1x16xf32> -> vector<1x16xf32>
    %312 = vector.broadcast %309 : vector<16x1xf32> to vector<16x16xf32>
    %313 = vector.broadcast %311 : vector<1x16xf32> to vector<16x16xf32>
    %314 = arith.addf %312, %313 : vector<16x16xf32>
    %cst_102 = arith.constant 0.000000e+00 : f32
    %315 = vector.broadcast %cst_102 : f32 to vector<16x16xf32>
    %316 = arith.cmpf ogt, %314, %315 : vector<16x16xf32>
    %cst_103 = arith.constant 2.000000e-01 : f32
    %317 = vector.broadcast %cst_103 : f32 to vector<16x16xf32>
    %318 = arith.mulf %317, %314 : vector<16x16xf32>
    %319 = arith.select %316, %314, %318 : vector<16x16xi1>, vector<16x16xf32>
    %cst_104 = arith.constant -1.000000e+09 : f32
    %320 = vector.broadcast %cst_104 : f32 to vector<16x16xf32>
    %321 = arith.select %217, %319, %320 : vector<16x16xi1>, vector<16x16xf32>
    %cst_105 = arith.constant dense<0xFF800000> : vector<16xf32>
    %322 = vector.multi_reduction <maximumf>, %321, %cst_105 [1] : vector<16x16xf32> to vector<16xf32>
    %323 = vector.shape_cast %322 : vector<16xf32> to vector<16x1xf32>
    %324 = vector.broadcast %323 : vector<16x1xf32> to vector<16x16xf32>
    %325 = arith.subf %321, %324 : vector<16x16xf32>
    %326 = math.exp %325 : vector<16x16xf32>
    %cst_106 = arith.constant dense<0.000000e+00> : vector<16xf32>
    %327 = vector.multi_reduction <add>, %326, %cst_106 [1] : vector<16x16xf32> to vector<16xf32>
    %328 = vector.shape_cast %327 : vector<16xf32> to vector<16x1xf32>
    %329 = tpu.reciprocal %328 {approx = true} : vector<16x1xf32> -> vector<16x1xf32>
    %330 = vector.broadcast %329 : vector<16x1xf32> to vector<16x16xf32>
    %331 = arith.mulf %326, %330 : vector<16x16xf32>
    %332 = arith.truncf %331 : vector<16x16xf32> to vector<16x16xbf16>
    %333 = arith.truncf %304 : vector<16x32xf32> to vector<16x32xbf16>
    %cst_107 = arith.constant dense<0.000000e+00> : vector<16x32xf32>
    %334 = tpu.matmul %332, %333, %cst_107 {dimension_numbers = #tpu.dot_dimension_numbers<[1], [0], [0], [1], [0, 0, 1, 1], [], []>} : vector<16x16xbf16>, vector<16x32xbf16>, vector<16x32xf32> -> vector<16x32xf32>
    %cst_108 = arith.constant 0.000000e+00 : f32
    %335 = vector.broadcast %cst_108 : f32 to vector<16x32xf32>
    %336 = arith.cmpf ogt, %334, %335 : vector<16x32xf32>
    %cst_109 = arith.constant 0.000000e+00 : f32
    %337 = vector.broadcast %cst_109 : f32 to vector<16x32xf32>
    %338 = arith.minimumf %334, %337 : vector<16x32xf32>
    %339 = math.exp %338 : vector<16x32xf32>
    %cst_110 = arith.constant 1.000000e+00 : f32
    %340 = vector.broadcast %cst_110 : f32 to vector<16x32xf32>
    %341 = arith.subf %339, %340 : vector<16x32xf32>
    %342 = arith.select %336, %334, %341 : vector<16x32xi1>, vector<16x32xf32>
    %343 = vector.extract_strided_slice %219 {offsets = [0, 64], sizes = [16, 32], strides = [1, 1]} : vector<16x128xf32> to vector<16x32xf32>
    %344 = arith.addf %343, %342 : vector<16x32xf32>
    %c16_111 = arith.constant 16 : index
    %c64_112 = arith.constant 64 : index
    %345 = vector.load %arg9[%c16_111, %c64_112] : memref<32x128xf32, #tpu.memory_space<vmem>>, vector<16x32xf32>
    tpu.vector_store %arg9[%c16_111, %c64_112], %344 {strides = array<i32>} : memref<32x128xf32, #tpu.memory_space<vmem>>, vector<16x32xf32>,
    %346 = vector.extract_strided_slice %218 {offsets = [0, 96], sizes = [16, 32], strides = [1, 1]} : vector<16x128xf32> to vector<16x32xf32>
    %347 = vector.extract_strided_slice %4 {offsets = [3, 0], sizes = [1, 32], strides = [1, 1]} : vector<4x32xf32> to vector<1x32xf32>
    %348 = vector.broadcast %347 : vector<1x32xf32> to vector<16x32xf32>
    %349 = arith.mulf %346, %348 : vector<16x32xf32>
    %cst_113 = arith.constant dense<0.000000e+00> : vector<16xf32>
    %350 = vector.multi_reduction <add>, %349, %cst_113 [1] : vector<16x32xf32> to vector<16xf32>
    %351 = vector.shape_cast %350 : vector<16xf32> to vector<16x1xf32>
    %352 = vector.extract_strided_slice %5 {offsets = [3, 0], sizes = [1, 32], strides = [1, 1]} : vector<4x32xf32> to vector<1x32xf32>
    %cst_114 = arith.constant dense<0.000000e+00> : vector<1x16xf32>
    %353 = tpu.matmul %352, %346, %cst_114 {dimension_numbers = #tpu.dot_dimension_numbers<[1], [1], [0], [0], [0, 0, 1, 0], [], []>} : vector<1x32xf32>, vector<16x32xf32>, vector<1x16xf32> -> vector<1x16xf32>
    %354 = vector.broadcast %351 : vector<16x1xf32> to vector<16x16xf32>
    %355 = vector.broadcast %353 : vector<1x16xf32> to vector<16x16xf32>
    %356 = arith.addf %354, %355 : vector<16x16xf32>
    %cst_115 = arith.constant 0.000000e+00 : f32
    %357 = vector.broadcast %cst_115 : f32 to vector<16x16xf32>
    %358 = arith.cmpf ogt, %356, %357 : vector<16x16xf32>
    %cst_116 = arith.constant 2.000000e-01 : f32
    %359 = vector.broadcast %cst_116 : f32 to vector<16x16xf32>
    %360 = arith.mulf %359, %356 : vector<16x16xf32>
    %361 = arith.select %358, %356, %360 : vector<16x16xi1>, vector<16x16xf32>
    %cst_117 = arith.constant -1.000000e+09 : f32
    %362 = vector.broadcast %cst_117 : f32 to vector<16x16xf32>
    %363 = arith.select %217, %361, %362 : vector<16x16xi1>, vector<16x16xf32>
    %cst_118 = arith.constant dense<0xFF800000> : vector<16xf32>
    %364 = vector.multi_reduction <maximumf>, %363, %cst_118 [1] : vector<16x16xf32> to vector<16xf32>
    %365 = vector.shape_cast %364 : vector<16xf32> to vector<16x1xf32>
    %366 = vector.broadcast %365 : vector<16x1xf32> to vector<16x16xf32>
    %367 = arith.subf %363, %366 : vector<16x16xf32>
    %368 = math.exp %367 : vector<16x16xf32>
    %cst_119 = arith.constant dense<0.000000e+00> : vector<16xf32>
    %369 = vector.multi_reduction <add>, %368, %cst_119 [1] : vector<16x16xf32> to vector<16xf32>
    %370 = vector.shape_cast %369 : vector<16xf32> to vector<16x1xf32>
    %371 = tpu.reciprocal %370 {approx = true} : vector<16x1xf32> -> vector<16x1xf32>
    %372 = vector.broadcast %371 : vector<16x1xf32> to vector<16x16xf32>
    %373 = arith.mulf %368, %372 : vector<16x16xf32>
    %374 = arith.truncf %373 : vector<16x16xf32> to vector<16x16xbf16>
    %375 = arith.truncf %346 : vector<16x32xf32> to vector<16x32xbf16>
    %cst_120 = arith.constant dense<0.000000e+00> : vector<16x32xf32>
    %376 = tpu.matmul %374, %375, %cst_120 {dimension_numbers = #tpu.dot_dimension_numbers<[1], [0], [0], [1], [0, 0, 1, 1], [], []>} : vector<16x16xbf16>, vector<16x32xbf16>, vector<16x32xf32> -> vector<16x32xf32>
    %cst_121 = arith.constant 0.000000e+00 : f32
    %377 = vector.broadcast %cst_121 : f32 to vector<16x32xf32>
    %378 = arith.cmpf ogt, %376, %377 : vector<16x32xf32>
    %cst_122 = arith.constant 0.000000e+00 : f32
    %379 = vector.broadcast %cst_122 : f32 to vector<16x32xf32>
    %380 = arith.minimumf %376, %379 : vector<16x32xf32>
    %381 = math.exp %380 : vector<16x32xf32>
    %cst_123 = arith.constant 1.000000e+00 : f32
    %382 = vector.broadcast %cst_123 : f32 to vector<16x32xf32>
    %383 = arith.subf %381, %382 : vector<16x32xf32>
    %384 = arith.select %378, %376, %383 : vector<16x32xi1>, vector<16x32xf32>
    %385 = vector.extract_strided_slice %219 {offsets = [0, 96], sizes = [16, 32], strides = [1, 1]} : vector<16x128xf32> to vector<16x32xf32>
    %386 = arith.addf %385, %384 : vector<16x32xf32>
    %c16_124 = arith.constant 16 : index
    %c96_125 = arith.constant 96 : index
    %387 = vector.load %arg9[%c16_124, %c96_125] : memref<32x128xf32, #tpu.memory_space<vmem>>, vector<16x32xf32>
    tpu.vector_store %arg9[%c16_124, %c96_125], %386 {strides = array<i32>} : memref<32x128xf32, #tpu.memory_space<vmem>>, vector<16x32xf32>,
    %c0_126 = arith.constant 0 : index
    %c0_127 = arith.constant 0 : index
    %388 = vector.load %arg9[%c0_126, %c0_127] : memref<32x128xf32, #tpu.memory_space<vmem>>, vector<32x128xf32>
    %389 = arith.truncf %388 : vector<32x128xf32> to vector<32x128xbf16>
    %390 = vector.extract_strided_slice %1 {offsets = [0, 0, 0], sizes = [1, 128, 128], strides = [1, 1, 1]} : vector<2x128x128xbf16> to vector<1x128x128xbf16>
    %391 = vector.shape_cast %390 : vector<1x128x128xbf16> to vector<128x128xbf16>
    %cst_128 = arith.constant dense<0.000000e+00> : vector<32x128xf32>
    %392 = tpu.matmul %389, %391, %cst_128 {dimension_numbers = #tpu.dot_dimension_numbers<[1], [0], [0], [1], [0, 0, 1, 1], [], []>} : vector<32x128xbf16>, vector<128x128xbf16>, vector<32x128xf32> -> vector<32x128xf32>
    %393 = vector.extract_strided_slice %2 {offsets = [0, 0], sizes = [1, 128], strides = [1, 1]} : vector<2x128xf32> to vector<1x128xf32>
    %394 = vector.broadcast %393 : vector<1x128xf32> to vector<32x128xf32>
    %395 = arith.addf %392, %394 : vector<32x128xf32>
    %cst_129 = arith.constant 0.000000e+00 : f32
    %396 = vector.broadcast %cst_129 : f32 to vector<32x128xf32>
    %397 = arith.maximumf %395, %396 : vector<32x128xf32>
    %398 = arith.truncf %397 : vector<32x128xf32> to vector<32x128xbf16>
    %399 = vector.extract_strided_slice %1 {offsets = [1, 0, 0], sizes = [1, 128, 128], strides = [1, 1, 1]} : vector<2x128x128xbf16> to vector<1x128x128xbf16>
    %400 = vector.shape_cast %399 : vector<1x128x128xbf16> to vector<128x128xbf16>
    %cst_130 = arith.constant dense<0.000000e+00> : vector<32x128xf32>
    %401 = tpu.matmul %398, %400, %cst_130 {dimension_numbers = #tpu.dot_dimension_numbers<[1], [0], [0], [1], [0, 0, 1, 1], [], []>} : vector<32x128xbf16>, vector<128x128xbf16>, vector<32x128xf32> -> vector<32x128xf32>
    %402 = vector.extract_strided_slice %2 {offsets = [1, 0], sizes = [1, 128], strides = [1, 1]} : vector<2x128xf32> to vector<1x128xf32>
    %403 = vector.broadcast %402 : vector<1x128xf32> to vector<32x128xf32>
    %404 = arith.addf %401, %403 : vector<32x128xf32>
    %cst_131 = arith.constant 0.000000e+00 : f32
    %405 = vector.broadcast %cst_131 : f32 to vector<32x128xf32>
    %406 = arith.maximumf %404, %405 : vector<32x128xf32>
    %407 = arith.truncf %388 : vector<32x128xf32> to vector<32x128xbf16>
    %cst_132 = arith.constant dense<0.000000e+00> : vector<32x128xf32>
    %408 = tpu.matmul %407, %3, %cst_132 {dimension_numbers = #tpu.dot_dimension_numbers<[1], [0], [0], [1], [0, 0, 1, 1], [], []>} : vector<32x128xbf16>, vector<128x128xbf16>, vector<32x128xf32> -> vector<32x128xf32>
    %409 = vector.extract_strided_slice %406 {offsets = [0, 0], sizes = [16, 128], strides = [1, 1]} : vector<32x128xf32> to vector<16x128xf32>
    %410 = arith.truncf %409 : vector<16x128xf32> to vector<16x128xbf16>
    %cst_133 = arith.constant dense<0.000000e+00> : vector<16x16xf32>
    %411 = tpu.matmul %410, %410, %cst_133 {dimension_numbers = #tpu.dot_dimension_numbers<[1], [1], [0], [0], [0, 0, 1, 0], [], []>} : vector<16x128xbf16>, vector<16x128xbf16>, vector<16x16xf32> -> vector<16x16xf32>
    %cst_134 = arith.constant 0.0883883461 : f32
    %412 = vector.broadcast %cst_134 : f32 to vector<16x16xf32>
    %413 = arith.mulf %411, %412 : vector<16x16xf32>
    %414 = vector.extract_strided_slice %0 {offsets = [0, 0, 0], sizes = [1, 16, 16], strides = [1, 1, 1]} : vector<2x16x16xf32> to vector<1x16x16xf32>
    %415 = vector.shape_cast %414 : vector<1x16x16xf32> to vector<16x16xf32>
    %416 = arith.addf %415, %413 : vector<16x16xf32>
    %cst_135 = arith.constant 0.000000e+00 : f32
    %417 = vector.broadcast %cst_135 : f32 to vector<16x16xf32>
    %418 = arith.cmpf ogt, %416, %417 : vector<16x16xf32>
    %419 = vector.extract_strided_slice %408 {offsets = [0, 0], sizes = [16, 128], strides = [1, 1]} : vector<32x128xf32> to vector<16x128xf32>
    %420 = vector.extract_strided_slice %388 {offsets = [0, 0], sizes = [16, 128], strides = [1, 1]} : vector<32x128xf32> to vector<16x128xf32>
    %421 = vector.extract_strided_slice %419 {offsets = [0, 0], sizes = [16, 32], strides = [1, 1]} : vector<16x128xf32> to vector<16x32xf32>
    %422 = vector.extract_strided_slice %4 {offsets = [0, 0], sizes = [1, 32], strides = [1, 1]} : vector<4x32xf32> to vector<1x32xf32>
    %423 = vector.broadcast %422 : vector<1x32xf32> to vector<16x32xf32>
    %424 = arith.mulf %421, %423 : vector<16x32xf32>
    %cst_136 = arith.constant dense<0.000000e+00> : vector<16xf32>
    %425 = vector.multi_reduction <add>, %424, %cst_136 [1] : vector<16x32xf32> to vector<16xf32>
    %426 = vector.shape_cast %425 : vector<16xf32> to vector<16x1xf32>
    %427 = vector.extract_strided_slice %5 {offsets = [0, 0], sizes = [1, 32], strides = [1, 1]} : vector<4x32xf32> to vector<1x32xf32>
    %cst_137 = arith.constant dense<0.000000e+00> : vector<1x16xf32>
    %428 = tpu.matmul %427, %421, %cst_137 {dimension_numbers = #tpu.dot_dimension_numbers<[1], [1], [0], [0], [0, 0, 1, 0], [], []>} : vector<1x32xf32>, vector<16x32xf32>, vector<1x16xf32> -> vector<1x16xf32>
    %429 = vector.broadcast %426 : vector<16x1xf32> to vector<16x16xf32>
    %430 = vector.broadcast %428 : vector<1x16xf32> to vector<16x16xf32>
    %431 = arith.addf %429, %430 : vector<16x16xf32>
    %cst_138 = arith.constant 0.000000e+00 : f32
    %432 = vector.broadcast %cst_138 : f32 to vector<16x16xf32>
    %433 = arith.cmpf ogt, %431, %432 : vector<16x16xf32>
    %cst_139 = arith.constant 2.000000e-01 : f32
    %434 = vector.broadcast %cst_139 : f32 to vector<16x16xf32>
    %435 = arith.mulf %434, %431 : vector<16x16xf32>
    %436 = arith.select %433, %431, %435 : vector<16x16xi1>, vector<16x16xf32>
    %cst_140 = arith.constant -1.000000e+09 : f32
    %437 = vector.broadcast %cst_140 : f32 to vector<16x16xf32>
    %438 = arith.select %418, %436, %437 : vector<16x16xi1>, vector<16x16xf32>
    %cst_141 = arith.constant dense<0xFF800000> : vector<16xf32>
    %439 = vector.multi_reduction <maximumf>, %438, %cst_141 [1] : vector<16x16xf32> to vector<16xf32>
    %440 = vector.shape_cast %439 : vector<16xf32> to vector<16x1xf32>
    %441 = vector.broadcast %440 : vector<16x1xf32> to vector<16x16xf32>
    %442 = arith.subf %438, %441 : vector<16x16xf32>
    %443 = math.exp %442 : vector<16x16xf32>
    %cst_142 = arith.constant dense<0.000000e+00> : vector<16xf32>
    %444 = vector.multi_reduction <add>, %443, %cst_142 [1] : vector<16x16xf32> to vector<16xf32>
    %445 = vector.shape_cast %444 : vector<16xf32> to vector<16x1xf32>
    %446 = tpu.reciprocal %445 {approx = true} : vector<16x1xf32> -> vector<16x1xf32>
    %447 = vector.broadcast %446 : vector<16x1xf32> to vector<16x16xf32>
    %448 = arith.mulf %443, %447 : vector<16x16xf32>
    %449 = arith.truncf %448 : vector<16x16xf32> to vector<16x16xbf16>
    %450 = arith.truncf %421 : vector<16x32xf32> to vector<16x32xbf16>
    %cst_143 = arith.constant dense<0.000000e+00> : vector<16x32xf32>
    %451 = tpu.matmul %449, %450, %cst_143 {dimension_numbers = #tpu.dot_dimension_numbers<[1], [0], [0], [1], [0, 0, 1, 1], [], []>} : vector<16x16xbf16>, vector<16x32xbf16>, vector<16x32xf32> -> vector<16x32xf32>
    %cst_144 = arith.constant 0.000000e+00 : f32
    %452 = vector.broadcast %cst_144 : f32 to vector<16x32xf32>
    %453 = arith.cmpf ogt, %451, %452 : vector<16x32xf32>
    %cst_145 = arith.constant 0.000000e+00 : f32
    %454 = vector.broadcast %cst_145 : f32 to vector<16x32xf32>
    %455 = arith.minimumf %451, %454 : vector<16x32xf32>
    %456 = math.exp %455 : vector<16x32xf32>
    %cst_146 = arith.constant 1.000000e+00 : f32
    %457 = vector.broadcast %cst_146 : f32 to vector<16x32xf32>
    %458 = arith.subf %456, %457 : vector<16x32xf32>
    %459 = arith.select %453, %451, %458 : vector<16x32xi1>, vector<16x32xf32>
    %460 = vector.extract_strided_slice %420 {offsets = [0, 0], sizes = [16, 32], strides = [1, 1]} : vector<16x128xf32> to vector<16x32xf32>
    %461 = arith.addf %460, %459 : vector<16x32xf32>
    %c0_147 = arith.constant 0 : index
    %c0_148 = arith.constant 0 : index
    %462 = vector.load %arg9[%c0_147, %c0_148] : memref<32x128xf32, #tpu.memory_space<vmem>>, vector<16x32xf32>
    tpu.vector_store %arg9[%c0_147, %c0_148], %461 {strides = array<i32>} : memref<32x128xf32, #tpu.memory_space<vmem>>, vector<16x32xf32>,
    %463 = vector.extract_strided_slice %419 {offsets = [0, 32], sizes = [16, 32], strides = [1, 1]} : vector<16x128xf32> to vector<16x32xf32>
    %464 = vector.extract_strided_slice %4 {offsets = [1, 0], sizes = [1, 32], strides = [1, 1]} : vector<4x32xf32> to vector<1x32xf32>
    %465 = vector.broadcast %464 : vector<1x32xf32> to vector<16x32xf32>
    %466 = arith.mulf %463, %465 : vector<16x32xf32>
    %cst_149 = arith.constant dense<0.000000e+00> : vector<16xf32>
    %467 = vector.multi_reduction <add>, %466, %cst_149 [1] : vector<16x32xf32> to vector<16xf32>
    %468 = vector.shape_cast %467 : vector<16xf32> to vector<16x1xf32>
    %469 = vector.extract_strided_slice %5 {offsets = [1, 0], sizes = [1, 32], strides = [1, 1]} : vector<4x32xf32> to vector<1x32xf32>
    %cst_150 = arith.constant dense<0.000000e+00> : vector<1x16xf32>
    %470 = tpu.matmul %469, %463, %cst_150 {dimension_numbers = #tpu.dot_dimension_numbers<[1], [1], [0], [0], [0, 0, 1, 0], [], []>} : vector<1x32xf32>, vector<16x32xf32>, vector<1x16xf32> -> vector<1x16xf32>
    %471 = vector.broadcast %468 : vector<16x1xf32> to vector<16x16xf32>
    %472 = vector.broadcast %470 : vector<1x16xf32> to vector<16x16xf32>
    %473 = arith.addf %471, %472 : vector<16x16xf32>
    %cst_151 = arith.constant 0.000000e+00 : f32
    %474 = vector.broadcast %cst_151 : f32 to vector<16x16xf32>
    %475 = arith.cmpf ogt, %473, %474 : vector<16x16xf32>
    %cst_152 = arith.constant 2.000000e-01 : f32
    %476 = vector.broadcast %cst_152 : f32 to vector<16x16xf32>
    %477 = arith.mulf %476, %473 : vector<16x16xf32>
    %478 = arith.select %475, %473, %477 : vector<16x16xi1>, vector<16x16xf32>
    %cst_153 = arith.constant -1.000000e+09 : f32
    %479 = vector.broadcast %cst_153 : f32 to vector<16x16xf32>
    %480 = arith.select %418, %478, %479 : vector<16x16xi1>, vector<16x16xf32>
    %cst_154 = arith.constant dense<0xFF800000> : vector<16xf32>
    %481 = vector.multi_reduction <maximumf>, %480, %cst_154 [1] : vector<16x16xf32> to vector<16xf32>
    %482 = vector.shape_cast %481 : vector<16xf32> to vector<16x1xf32>
    %483 = vector.broadcast %482 : vector<16x1xf32> to vector<16x16xf32>
    %484 = arith.subf %480, %483 : vector<16x16xf32>
    %485 = math.exp %484 : vector<16x16xf32>
    %cst_155 = arith.constant dense<0.000000e+00> : vector<16xf32>
    %486 = vector.multi_reduction <add>, %485, %cst_155 [1] : vector<16x16xf32> to vector<16xf32>
    %487 = vector.shape_cast %486 : vector<16xf32> to vector<16x1xf32>
    %488 = tpu.reciprocal %487 {approx = true} : vector<16x1xf32> -> vector<16x1xf32>
    %489 = vector.broadcast %488 : vector<16x1xf32> to vector<16x16xf32>
    %490 = arith.mulf %485, %489 : vector<16x16xf32>
    %491 = arith.truncf %490 : vector<16x16xf32> to vector<16x16xbf16>
    %492 = arith.truncf %463 : vector<16x32xf32> to vector<16x32xbf16>
    %cst_156 = arith.constant dense<0.000000e+00> : vector<16x32xf32>
    %493 = tpu.matmul %491, %492, %cst_156 {dimension_numbers = #tpu.dot_dimension_numbers<[1], [0], [0], [1], [0, 0, 1, 1], [], []>} : vector<16x16xbf16>, vector<16x32xbf16>, vector<16x32xf32> -> vector<16x32xf32>
    %cst_157 = arith.constant 0.000000e+00 : f32
    %494 = vector.broadcast %cst_157 : f32 to vector<16x32xf32>
    %495 = arith.cmpf ogt, %493, %494 : vector<16x32xf32>
    %cst_158 = arith.constant 0.000000e+00 : f32
    %496 = vector.broadcast %cst_158 : f32 to vector<16x32xf32>
    %497 = arith.minimumf %493, %496 : vector<16x32xf32>
    %498 = math.exp %497 : vector<16x32xf32>
    %cst_159 = arith.constant 1.000000e+00 : f32
    %499 = vector.broadcast %cst_159 : f32 to vector<16x32xf32>
    %500 = arith.subf %498, %499 : vector<16x32xf32>
    %501 = arith.select %495, %493, %500 : vector<16x32xi1>, vector<16x32xf32>
    %502 = vector.extract_strided_slice %420 {offsets = [0, 32], sizes = [16, 32], strides = [1, 1]} : vector<16x128xf32> to vector<16x32xf32>
    %503 = arith.addf %502, %501 : vector<16x32xf32>
    %c0_160 = arith.constant 0 : index
    %c32_161 = arith.constant 32 : index
    %504 = vector.load %arg9[%c0_160, %c32_161] : memref<32x128xf32, #tpu.memory_space<vmem>>, vector<16x32xf32>
    tpu.vector_store %arg9[%c0_160, %c32_161], %503 {strides = array<i32>} : memref<32x128xf32, #tpu.memory_space<vmem>>, vector<16x32xf32>,
    %505 = vector.extract_strided_slice %419 {offsets = [0, 64], sizes = [16, 32], strides = [1, 1]} : vector<16x128xf32> to vector<16x32xf32>
    %506 = vector.extract_strided_slice %4 {offsets = [2, 0], sizes = [1, 32], strides = [1, 1]} : vector<4x32xf32> to vector<1x32xf32>
    %507 = vector.broadcast %506 : vector<1x32xf32> to vector<16x32xf32>
    %508 = arith.mulf %505, %507 : vector<16x32xf32>
    %cst_162 = arith.constant dense<0.000000e+00> : vector<16xf32>
    %509 = vector.multi_reduction <add>, %508, %cst_162 [1] : vector<16x32xf32> to vector<16xf32>
    %510 = vector.shape_cast %509 : vector<16xf32> to vector<16x1xf32>
    %511 = vector.extract_strided_slice %5 {offsets = [2, 0], sizes = [1, 32], strides = [1, 1]} : vector<4x32xf32> to vector<1x32xf32>
    %cst_163 = arith.constant dense<0.000000e+00> : vector<1x16xf32>
    %512 = tpu.matmul %511, %505, %cst_163 {dimension_numbers = #tpu.dot_dimension_numbers<[1], [1], [0], [0], [0, 0, 1, 0], [], []>} : vector<1x32xf32>, vector<16x32xf32>, vector<1x16xf32> -> vector<1x16xf32>
    %513 = vector.broadcast %510 : vector<16x1xf32> to vector<16x16xf32>
    %514 = vector.broadcast %512 : vector<1x16xf32> to vector<16x16xf32>
    %515 = arith.addf %513, %514 : vector<16x16xf32>
    %cst_164 = arith.constant 0.000000e+00 : f32
    %516 = vector.broadcast %cst_164 : f32 to vector<16x16xf32>
    %517 = arith.cmpf ogt, %515, %516 : vector<16x16xf32>
    %cst_165 = arith.constant 2.000000e-01 : f32
    %518 = vector.broadcast %cst_165 : f32 to vector<16x16xf32>
    %519 = arith.mulf %518, %515 : vector<16x16xf32>
    %520 = arith.select %517, %515, %519 : vector<16x16xi1>, vector<16x16xf32>
    %cst_166 = arith.constant -1.000000e+09 : f32
    %521 = vector.broadcast %cst_166 : f32 to vector<16x16xf32>
    %522 = arith.select %418, %520, %521 : vector<16x16xi1>, vector<16x16xf32>
    %cst_167 = arith.constant dense<0xFF800000> : vector<16xf32>
    %523 = vector.multi_reduction <maximumf>, %522, %cst_167 [1] : vector<16x16xf32> to vector<16xf32>
    %524 = vector.shape_cast %523 : vector<16xf32> to vector<16x1xf32>
    %525 = vector.broadcast %524 : vector<16x1xf32> to vector<16x16xf32>
    %526 = arith.subf %522, %525 : vector<16x16xf32>
    %527 = math.exp %526 : vector<16x16xf32>
    %cst_168 = arith.constant dense<0.000000e+00> : vector<16xf32>
    %528 = vector.multi_reduction <add>, %527, %cst_168 [1] : vector<16x16xf32> to vector<16xf32>
    %529 = vector.shape_cast %528 : vector<16xf32> to vector<16x1xf32>
    %530 = tpu.reciprocal %529 {approx = true} : vector<16x1xf32> -> vector<16x1xf32>
    %531 = vector.broadcast %530 : vector<16x1xf32> to vector<16x16xf32>
    %532 = arith.mulf %527, %531 : vector<16x16xf32>
    %533 = arith.truncf %532 : vector<16x16xf32> to vector<16x16xbf16>
    %534 = arith.truncf %505 : vector<16x32xf32> to vector<16x32xbf16>
    %cst_169 = arith.constant dense<0.000000e+00> : vector<16x32xf32>
    %535 = tpu.matmul %533, %534, %cst_169 {dimension_numbers = #tpu.dot_dimension_numbers<[1], [0], [0], [1], [0, 0, 1, 1], [], []>} : vector<16x16xbf16>, vector<16x32xbf16>, vector<16x32xf32> -> vector<16x32xf32>
    %cst_170 = arith.constant 0.000000e+00 : f32
    %536 = vector.broadcast %cst_170 : f32 to vector<16x32xf32>
    %537 = arith.cmpf ogt, %535, %536 : vector<16x32xf32>
    %cst_171 = arith.constant 0.000000e+00 : f32
    %538 = vector.broadcast %cst_171 : f32 to vector<16x32xf32>
    %539 = arith.minimumf %535, %538 : vector<16x32xf32>
    %540 = math.exp %539 : vector<16x32xf32>
    %cst_172 = arith.constant 1.000000e+00 : f32
    %541 = vector.broadcast %cst_172 : f32 to vector<16x32xf32>
    %542 = arith.subf %540, %541 : vector<16x32xf32>
    %543 = arith.select %537, %535, %542 : vector<16x32xi1>, vector<16x32xf32>
    %544 = vector.extract_strided_slice %420 {offsets = [0, 64], sizes = [16, 32], strides = [1, 1]} : vector<16x128xf32> to vector<16x32xf32>
    %545 = arith.addf %544, %543 : vector<16x32xf32>
    %c0_173 = arith.constant 0 : index
    %c64_174 = arith.constant 64 : index
    %546 = vector.load %arg9[%c0_173, %c64_174] : memref<32x128xf32, #tpu.memory_space<vmem>>, vector<16x32xf32>
    tpu.vector_store %arg9[%c0_173, %c64_174], %545 {strides = array<i32>} : memref<32x128xf32, #tpu.memory_space<vmem>>, vector<16x32xf32>,
    %547 = vector.extract_strided_slice %419 {offsets = [0, 96], sizes = [16, 32], strides = [1, 1]} : vector<16x128xf32> to vector<16x32xf32>
    %548 = vector.extract_strided_slice %4 {offsets = [3, 0], sizes = [1, 32], strides = [1, 1]} : vector<4x32xf32> to vector<1x32xf32>
    %549 = vector.broadcast %548 : vector<1x32xf32> to vector<16x32xf32>
    %550 = arith.mulf %547, %549 : vector<16x32xf32>
    %cst_175 = arith.constant dense<0.000000e+00> : vector<16xf32>
    %551 = vector.multi_reduction <add>, %550, %cst_175 [1] : vector<16x32xf32> to vector<16xf32>
    %552 = vector.shape_cast %551 : vector<16xf32> to vector<16x1xf32>
    %553 = vector.extract_strided_slice %5 {offsets = [3, 0], sizes = [1, 32], strides = [1, 1]} : vector<4x32xf32> to vector<1x32xf32>
    %cst_176 = arith.constant dense<0.000000e+00> : vector<1x16xf32>
    %554 = tpu.matmul %553, %547, %cst_176 {dimension_numbers = #tpu.dot_dimension_numbers<[1], [1], [0], [0], [0, 0, 1, 0], [], []>} : vector<1x32xf32>, vector<16x32xf32>, vector<1x16xf32> -> vector<1x16xf32>
    %555 = vector.broadcast %552 : vector<16x1xf32> to vector<16x16xf32>
    %556 = vector.broadcast %554 : vector<1x16xf32> to vector<16x16xf32>
    %557 = arith.addf %555, %556 : vector<16x16xf32>
    %cst_177 = arith.constant 0.000000e+00 : f32
    %558 = vector.broadcast %cst_177 : f32 to vector<16x16xf32>
    %559 = arith.cmpf ogt, %557, %558 : vector<16x16xf32>
    %cst_178 = arith.constant 2.000000e-01 : f32
    %560 = vector.broadcast %cst_178 : f32 to vector<16x16xf32>
    %561 = arith.mulf %560, %557 : vector<16x16xf32>
    %562 = arith.select %559, %557, %561 : vector<16x16xi1>, vector<16x16xf32>
    %cst_179 = arith.constant -1.000000e+09 : f32
    %563 = vector.broadcast %cst_179 : f32 to vector<16x16xf32>
    %564 = arith.select %418, %562, %563 : vector<16x16xi1>, vector<16x16xf32>
    %cst_180 = arith.constant dense<0xFF800000> : vector<16xf32>
    %565 = vector.multi_reduction <maximumf>, %564, %cst_180 [1] : vector<16x16xf32> to vector<16xf32>
    %566 = vector.shape_cast %565 : vector<16xf32> to vector<16x1xf32>
    %567 = vector.broadcast %566 : vector<16x1xf32> to vector<16x16xf32>
    %568 = arith.subf %564, %567 : vector<16x16xf32>
    %569 = math.exp %568 : vector<16x16xf32>
    %cst_181 = arith.constant dense<0.000000e+00> : vector<16xf32>
    %570 = vector.multi_reduction <add>, %569, %cst_181 [1] : vector<16x16xf32> to vector<16xf32>
    %571 = vector.shape_cast %570 : vector<16xf32> to vector<16x1xf32>
    %572 = tpu.reciprocal %571 {approx = true} : vector<16x1xf32> -> vector<16x1xf32>
    %573 = vector.broadcast %572 : vector<16x1xf32> to vector<16x16xf32>
    %574 = arith.mulf %569, %573 : vector<16x16xf32>
    %575 = arith.truncf %574 : vector<16x16xf32> to vector<16x16xbf16>
    %576 = arith.truncf %547 : vector<16x32xf32> to vector<16x32xbf16>
    %cst_182 = arith.constant dense<0.000000e+00> : vector<16x32xf32>
    %577 = tpu.matmul %575, %576, %cst_182 {dimension_numbers = #tpu.dot_dimension_numbers<[1], [0], [0], [1], [0, 0, 1, 1], [], []>} : vector<16x16xbf16>, vector<16x32xbf16>, vector<16x32xf32> -> vector<16x32xf32>
    %cst_183 = arith.constant 0.000000e+00 : f32
    %578 = vector.broadcast %cst_183 : f32 to vector<16x32xf32>
    %579 = arith.cmpf ogt, %577, %578 : vector<16x32xf32>
    %cst_184 = arith.constant 0.000000e+00 : f32
    %580 = vector.broadcast %cst_184 : f32 to vector<16x32xf32>
    %581 = arith.minimumf %577, %580 : vector<16x32xf32>
    %582 = math.exp %581 : vector<16x32xf32>
    %cst_185 = arith.constant 1.000000e+00 : f32
    %583 = vector.broadcast %cst_185 : f32 to vector<16x32xf32>
    %584 = arith.subf %582, %583 : vector<16x32xf32>
    %585 = arith.select %579, %577, %584 : vector<16x32xi1>, vector<16x32xf32>
    %586 = vector.extract_strided_slice %420 {offsets = [0, 96], sizes = [16, 32], strides = [1, 1]} : vector<16x128xf32> to vector<16x32xf32>
    %587 = arith.addf %586, %585 : vector<16x32xf32>
    %c0_186 = arith.constant 0 : index
    %c96_187 = arith.constant 96 : index
    %588 = vector.load %arg9[%c0_186, %c96_187] : memref<32x128xf32, #tpu.memory_space<vmem>>, vector<16x32xf32>
    tpu.vector_store %arg9[%c0_186, %c96_187], %587 {strides = array<i32>} : memref<32x128xf32, #tpu.memory_space<vmem>>, vector<16x32xf32>,
    %589 = vector.extract_strided_slice %406 {offsets = [16, 0], sizes = [16, 128], strides = [1, 1]} : vector<32x128xf32> to vector<16x128xf32>
    %590 = arith.truncf %589 : vector<16x128xf32> to vector<16x128xbf16>
    %cst_188 = arith.constant dense<0.000000e+00> : vector<16x16xf32>
    %591 = tpu.matmul %590, %590, %cst_188 {dimension_numbers = #tpu.dot_dimension_numbers<[1], [1], [0], [0], [0, 0, 1, 0], [], []>} : vector<16x128xbf16>, vector<16x128xbf16>, vector<16x16xf32> -> vector<16x16xf32>
    %cst_189 = arith.constant 0.0883883461 : f32
    %592 = vector.broadcast %cst_189 : f32 to vector<16x16xf32>
    %593 = arith.mulf %591, %592 : vector<16x16xf32>
    %594 = vector.extract_strided_slice %0 {offsets = [1, 0, 0], sizes = [1, 16, 16], strides = [1, 1, 1]} : vector<2x16x16xf32> to vector<1x16x16xf32>
    %595 = vector.shape_cast %594 : vector<1x16x16xf32> to vector<16x16xf32>
    %596 = arith.addf %595, %593 : vector<16x16xf32>
    %cst_190 = arith.constant 0.000000e+00 : f32
    %597 = vector.broadcast %cst_190 : f32 to vector<16x16xf32>
    %598 = arith.cmpf ogt, %596, %597 : vector<16x16xf32>
    %599 = vector.extract_strided_slice %408 {offsets = [16, 0], sizes = [16, 128], strides = [1, 1]} : vector<32x128xf32> to vector<16x128xf32>
    %600 = vector.extract_strided_slice %388 {offsets = [16, 0], sizes = [16, 128], strides = [1, 1]} : vector<32x128xf32> to vector<16x128xf32>
    %601 = vector.extract_strided_slice %599 {offsets = [0, 0], sizes = [16, 32], strides = [1, 1]} : vector<16x128xf32> to vector<16x32xf32>
    %602 = vector.extract_strided_slice %4 {offsets = [0, 0], sizes = [1, 32], strides = [1, 1]} : vector<4x32xf32> to vector<1x32xf32>
    %603 = vector.broadcast %602 : vector<1x32xf32> to vector<16x32xf32>
    %604 = arith.mulf %601, %603 : vector<16x32xf32>
    %cst_191 = arith.constant dense<0.000000e+00> : vector<16xf32>
    %605 = vector.multi_reduction <add>, %604, %cst_191 [1] : vector<16x32xf32> to vector<16xf32>
    %606 = vector.shape_cast %605 : vector<16xf32> to vector<16x1xf32>
    %607 = vector.extract_strided_slice %5 {offsets = [0, 0], sizes = [1, 32], strides = [1, 1]} : vector<4x32xf32> to vector<1x32xf32>
    %cst_192 = arith.constant dense<0.000000e+00> : vector<1x16xf32>
    %608 = tpu.matmul %607, %601, %cst_192 {dimension_numbers = #tpu.dot_dimension_numbers<[1], [1], [0], [0], [0, 0, 1, 0], [], []>} : vector<1x32xf32>, vector<16x32xf32>, vector<1x16xf32> -> vector<1x16xf32>
    %609 = vector.broadcast %606 : vector<16x1xf32> to vector<16x16xf32>
    %610 = vector.broadcast %608 : vector<1x16xf32> to vector<16x16xf32>
    %611 = arith.addf %609, %610 : vector<16x16xf32>
    %cst_193 = arith.constant 0.000000e+00 : f32
    %612 = vector.broadcast %cst_193 : f32 to vector<16x16xf32>
    %613 = arith.cmpf ogt, %611, %612 : vector<16x16xf32>
    %cst_194 = arith.constant 2.000000e-01 : f32
    %614 = vector.broadcast %cst_194 : f32 to vector<16x16xf32>
    %615 = arith.mulf %614, %611 : vector<16x16xf32>
    %616 = arith.select %613, %611, %615 : vector<16x16xi1>, vector<16x16xf32>
    %cst_195 = arith.constant -1.000000e+09 : f32
    %617 = vector.broadcast %cst_195 : f32 to vector<16x16xf32>
    %618 = arith.select %598, %616, %617 : vector<16x16xi1>, vector<16x16xf32>
    %cst_196 = arith.constant dense<0xFF800000> : vector<16xf32>
    %619 = vector.multi_reduction <maximumf>, %618, %cst_196 [1] : vector<16x16xf32> to vector<16xf32>
    %620 = vector.shape_cast %619 : vector<16xf32> to vector<16x1xf32>
    %621 = vector.broadcast %620 : vector<16x1xf32> to vector<16x16xf32>
    %622 = arith.subf %618, %621 : vector<16x16xf32>
    %623 = math.exp %622 : vector<16x16xf32>
    %cst_197 = arith.constant dense<0.000000e+00> : vector<16xf32>
    %624 = vector.multi_reduction <add>, %623, %cst_197 [1] : vector<16x16xf32> to vector<16xf32>
    %625 = vector.shape_cast %624 : vector<16xf32> to vector<16x1xf32>
    %626 = tpu.reciprocal %625 {approx = true} : vector<16x1xf32> -> vector<16x1xf32>
    %627 = vector.broadcast %626 : vector<16x1xf32> to vector<16x16xf32>
    %628 = arith.mulf %623, %627 : vector<16x16xf32>
    %629 = arith.truncf %628 : vector<16x16xf32> to vector<16x16xbf16>
    %630 = arith.truncf %601 : vector<16x32xf32> to vector<16x32xbf16>
    %cst_198 = arith.constant dense<0.000000e+00> : vector<16x32xf32>
    %631 = tpu.matmul %629, %630, %cst_198 {dimension_numbers = #tpu.dot_dimension_numbers<[1], [0], [0], [1], [0, 0, 1, 1], [], []>} : vector<16x16xbf16>, vector<16x32xbf16>, vector<16x32xf32> -> vector<16x32xf32>
    %cst_199 = arith.constant 0.000000e+00 : f32
    %632 = vector.broadcast %cst_199 : f32 to vector<16x32xf32>
    %633 = arith.cmpf ogt, %631, %632 : vector<16x32xf32>
    %cst_200 = arith.constant 0.000000e+00 : f32
    %634 = vector.broadcast %cst_200 : f32 to vector<16x32xf32>
    %635 = arith.minimumf %631, %634 : vector<16x32xf32>
    %636 = math.exp %635 : vector<16x32xf32>
    %cst_201 = arith.constant 1.000000e+00 : f32
    %637 = vector.broadcast %cst_201 : f32 to vector<16x32xf32>
    %638 = arith.subf %636, %637 : vector<16x32xf32>
    %639 = arith.select %633, %631, %638 : vector<16x32xi1>, vector<16x32xf32>
    %640 = vector.extract_strided_slice %600 {offsets = [0, 0], sizes = [16, 32], strides = [1, 1]} : vector<16x128xf32> to vector<16x32xf32>
    %641 = arith.addf %640, %639 : vector<16x32xf32>
    %c16_202 = arith.constant 16 : index
    %c0_203 = arith.constant 0 : index
    %642 = vector.load %arg9[%c16_202, %c0_203] : memref<32x128xf32, #tpu.memory_space<vmem>>, vector<16x32xf32>
    tpu.vector_store %arg9[%c16_202, %c0_203], %641 {strides = array<i32>} : memref<32x128xf32, #tpu.memory_space<vmem>>, vector<16x32xf32>,
    %643 = vector.extract_strided_slice %599 {offsets = [0, 32], sizes = [16, 32], strides = [1, 1]} : vector<16x128xf32> to vector<16x32xf32>
    %644 = vector.extract_strided_slice %4 {offsets = [1, 0], sizes = [1, 32], strides = [1, 1]} : vector<4x32xf32> to vector<1x32xf32>
    %645 = vector.broadcast %644 : vector<1x32xf32> to vector<16x32xf32>
    %646 = arith.mulf %643, %645 : vector<16x32xf32>
    %cst_204 = arith.constant dense<0.000000e+00> : vector<16xf32>
    %647 = vector.multi_reduction <add>, %646, %cst_204 [1] : vector<16x32xf32> to vector<16xf32>
    %648 = vector.shape_cast %647 : vector<16xf32> to vector<16x1xf32>
    %649 = vector.extract_strided_slice %5 {offsets = [1, 0], sizes = [1, 32], strides = [1, 1]} : vector<4x32xf32> to vector<1x32xf32>
    %cst_205 = arith.constant dense<0.000000e+00> : vector<1x16xf32>
    %650 = tpu.matmul %649, %643, %cst_205 {dimension_numbers = #tpu.dot_dimension_numbers<[1], [1], [0], [0], [0, 0, 1, 0], [], []>} : vector<1x32xf32>, vector<16x32xf32>, vector<1x16xf32> -> vector<1x16xf32>
    %651 = vector.broadcast %648 : vector<16x1xf32> to vector<16x16xf32>
    %652 = vector.broadcast %650 : vector<1x16xf32> to vector<16x16xf32>
    %653 = arith.addf %651, %652 : vector<16x16xf32>
    %cst_206 = arith.constant 0.000000e+00 : f32
    %654 = vector.broadcast %cst_206 : f32 to vector<16x16xf32>
    %655 = arith.cmpf ogt, %653, %654 : vector<16x16xf32>
    %cst_207 = arith.constant 2.000000e-01 : f32
    %656 = vector.broadcast %cst_207 : f32 to vector<16x16xf32>
    %657 = arith.mulf %656, %653 : vector<16x16xf32>
    %658 = arith.select %655, %653, %657 : vector<16x16xi1>, vector<16x16xf32>
    %cst_208 = arith.constant -1.000000e+09 : f32
    %659 = vector.broadcast %cst_208 : f32 to vector<16x16xf32>
    %660 = arith.select %598, %658, %659 : vector<16x16xi1>, vector<16x16xf32>
    %cst_209 = arith.constant dense<0xFF800000> : vector<16xf32>
    %661 = vector.multi_reduction <maximumf>, %660, %cst_209 [1] : vector<16x16xf32> to vector<16xf32>
    %662 = vector.shape_cast %661 : vector<16xf32> to vector<16x1xf32>
    %663 = vector.broadcast %662 : vector<16x1xf32> to vector<16x16xf32>
    %664 = arith.subf %660, %663 : vector<16x16xf32>
    %665 = math.exp %664 : vector<16x16xf32>
    %cst_210 = arith.constant dense<0.000000e+00> : vector<16xf32>
    %666 = vector.multi_reduction <add>, %665, %cst_210 [1] : vector<16x16xf32> to vector<16xf32>
    %667 = vector.shape_cast %666 : vector<16xf32> to vector<16x1xf32>
    %668 = tpu.reciprocal %667 {approx = true} : vector<16x1xf32> -> vector<16x1xf32>
    %669 = vector.broadcast %668 : vector<16x1xf32> to vector<16x16xf32>
    %670 = arith.mulf %665, %669 : vector<16x16xf32>
    %671 = arith.truncf %670 : vector<16x16xf32> to vector<16x16xbf16>
    %672 = arith.truncf %643 : vector<16x32xf32> to vector<16x32xbf16>
    %cst_211 = arith.constant dense<0.000000e+00> : vector<16x32xf32>
    %673 = tpu.matmul %671, %672, %cst_211 {dimension_numbers = #tpu.dot_dimension_numbers<[1], [0], [0], [1], [0, 0, 1, 1], [], []>} : vector<16x16xbf16>, vector<16x32xbf16>, vector<16x32xf32> -> vector<16x32xf32>
    %cst_212 = arith.constant 0.000000e+00 : f32
    %674 = vector.broadcast %cst_212 : f32 to vector<16x32xf32>
    %675 = arith.cmpf ogt, %673, %674 : vector<16x32xf32>
    %cst_213 = arith.constant 0.000000e+00 : f32
    %676 = vector.broadcast %cst_213 : f32 to vector<16x32xf32>
    %677 = arith.minimumf %673, %676 : vector<16x32xf32>
    %678 = math.exp %677 : vector<16x32xf32>
    %cst_214 = arith.constant 1.000000e+00 : f32
    %679 = vector.broadcast %cst_214 : f32 to vector<16x32xf32>
    %680 = arith.subf %678, %679 : vector<16x32xf32>
    %681 = arith.select %675, %673, %680 : vector<16x32xi1>, vector<16x32xf32>
    %682 = vector.extract_strided_slice %600 {offsets = [0, 32], sizes = [16, 32], strides = [1, 1]} : vector<16x128xf32> to vector<16x32xf32>
    %683 = arith.addf %682, %681 : vector<16x32xf32>
    %c16_215 = arith.constant 16 : index
    %c32_216 = arith.constant 32 : index
    %684 = vector.load %arg9[%c16_215, %c32_216] : memref<32x128xf32, #tpu.memory_space<vmem>>, vector<16x32xf32>
    tpu.vector_store %arg9[%c16_215, %c32_216], %683 {strides = array<i32>} : memref<32x128xf32, #tpu.memory_space<vmem>>, vector<16x32xf32>,
    %685 = vector.extract_strided_slice %599 {offsets = [0, 64], sizes = [16, 32], strides = [1, 1]} : vector<16x128xf32> to vector<16x32xf32>
    %686 = vector.extract_strided_slice %4 {offsets = [2, 0], sizes = [1, 32], strides = [1, 1]} : vector<4x32xf32> to vector<1x32xf32>
    %687 = vector.broadcast %686 : vector<1x32xf32> to vector<16x32xf32>
    %688 = arith.mulf %685, %687 : vector<16x32xf32>
    %cst_217 = arith.constant dense<0.000000e+00> : vector<16xf32>
    %689 = vector.multi_reduction <add>, %688, %cst_217 [1] : vector<16x32xf32> to vector<16xf32>
    %690 = vector.shape_cast %689 : vector<16xf32> to vector<16x1xf32>
    %691 = vector.extract_strided_slice %5 {offsets = [2, 0], sizes = [1, 32], strides = [1, 1]} : vector<4x32xf32> to vector<1x32xf32>
    %cst_218 = arith.constant dense<0.000000e+00> : vector<1x16xf32>
    %692 = tpu.matmul %691, %685, %cst_218 {dimension_numbers = #tpu.dot_dimension_numbers<[1], [1], [0], [0], [0, 0, 1, 0], [], []>} : vector<1x32xf32>, vector<16x32xf32>, vector<1x16xf32> -> vector<1x16xf32>
    %693 = vector.broadcast %690 : vector<16x1xf32> to vector<16x16xf32>
    %694 = vector.broadcast %692 : vector<1x16xf32> to vector<16x16xf32>
    %695 = arith.addf %693, %694 : vector<16x16xf32>
    %cst_219 = arith.constant 0.000000e+00 : f32
    %696 = vector.broadcast %cst_219 : f32 to vector<16x16xf32>
    %697 = arith.cmpf ogt, %695, %696 : vector<16x16xf32>
    %cst_220 = arith.constant 2.000000e-01 : f32
    %698 = vector.broadcast %cst_220 : f32 to vector<16x16xf32>
    %699 = arith.mulf %698, %695 : vector<16x16xf32>
    %700 = arith.select %697, %695, %699 : vector<16x16xi1>, vector<16x16xf32>
    %cst_221 = arith.constant -1.000000e+09 : f32
    %701 = vector.broadcast %cst_221 : f32 to vector<16x16xf32>
    %702 = arith.select %598, %700, %701 : vector<16x16xi1>, vector<16x16xf32>
    %cst_222 = arith.constant dense<0xFF800000> : vector<16xf32>
    %703 = vector.multi_reduction <maximumf>, %702, %cst_222 [1] : vector<16x16xf32> to vector<16xf32>
    %704 = vector.shape_cast %703 : vector<16xf32> to vector<16x1xf32>
    %705 = vector.broadcast %704 : vector<16x1xf32> to vector<16x16xf32>
    %706 = arith.subf %702, %705 : vector<16x16xf32>
    %707 = math.exp %706 : vector<16x16xf32>
    %cst_223 = arith.constant dense<0.000000e+00> : vector<16xf32>
    %708 = vector.multi_reduction <add>, %707, %cst_223 [1] : vector<16x16xf32> to vector<16xf32>
    %709 = vector.shape_cast %708 : vector<16xf32> to vector<16x1xf32>
    %710 = tpu.reciprocal %709 {approx = true} : vector<16x1xf32> -> vector<16x1xf32>
    %711 = vector.broadcast %710 : vector<16x1xf32> to vector<16x16xf32>
    %712 = arith.mulf %707, %711 : vector<16x16xf32>
    %713 = arith.truncf %712 : vector<16x16xf32> to vector<16x16xbf16>
    %714 = arith.truncf %685 : vector<16x32xf32> to vector<16x32xbf16>
    %cst_224 = arith.constant dense<0.000000e+00> : vector<16x32xf32>
    %715 = tpu.matmul %713, %714, %cst_224 {dimension_numbers = #tpu.dot_dimension_numbers<[1], [0], [0], [1], [0, 0, 1, 1], [], []>} : vector<16x16xbf16>, vector<16x32xbf16>, vector<16x32xf32> -> vector<16x32xf32>
    %cst_225 = arith.constant 0.000000e+00 : f32
    %716 = vector.broadcast %cst_225 : f32 to vector<16x32xf32>
    %717 = arith.cmpf ogt, %715, %716 : vector<16x32xf32>
    %cst_226 = arith.constant 0.000000e+00 : f32
    %718 = vector.broadcast %cst_226 : f32 to vector<16x32xf32>
    %719 = arith.minimumf %715, %718 : vector<16x32xf32>
    %720 = math.exp %719 : vector<16x32xf32>
    %cst_227 = arith.constant 1.000000e+00 : f32
    %721 = vector.broadcast %cst_227 : f32 to vector<16x32xf32>
    %722 = arith.subf %720, %721 : vector<16x32xf32>
    %723 = arith.select %717, %715, %722 : vector<16x32xi1>, vector<16x32xf32>
    %724 = vector.extract_strided_slice %600 {offsets = [0, 64], sizes = [16, 32], strides = [1, 1]} : vector<16x128xf32> to vector<16x32xf32>
    %725 = arith.addf %724, %723 : vector<16x32xf32>
    %c16_228 = arith.constant 16 : index
    %c64_229 = arith.constant 64 : index
    %726 = vector.load %arg9[%c16_228, %c64_229] : memref<32x128xf32, #tpu.memory_space<vmem>>, vector<16x32xf32>
    tpu.vector_store %arg9[%c16_228, %c64_229], %725 {strides = array<i32>} : memref<32x128xf32, #tpu.memory_space<vmem>>, vector<16x32xf32>,
    %727 = vector.extract_strided_slice %599 {offsets = [0, 96], sizes = [16, 32], strides = [1, 1]} : vector<16x128xf32> to vector<16x32xf32>
    %728 = vector.extract_strided_slice %4 {offsets = [3, 0], sizes = [1, 32], strides = [1, 1]} : vector<4x32xf32> to vector<1x32xf32>
    %729 = vector.broadcast %728 : vector<1x32xf32> to vector<16x32xf32>
    %730 = arith.mulf %727, %729 : vector<16x32xf32>
    %cst_230 = arith.constant dense<0.000000e+00> : vector<16xf32>
    %731 = vector.multi_reduction <add>, %730, %cst_230 [1] : vector<16x32xf32> to vector<16xf32>
    %732 = vector.shape_cast %731 : vector<16xf32> to vector<16x1xf32>
    %733 = vector.extract_strided_slice %5 {offsets = [3, 0], sizes = [1, 32], strides = [1, 1]} : vector<4x32xf32> to vector<1x32xf32>
    %cst_231 = arith.constant dense<0.000000e+00> : vector<1x16xf32>
    %734 = tpu.matmul %733, %727, %cst_231 {dimension_numbers = #tpu.dot_dimension_numbers<[1], [1], [0], [0], [0, 0, 1, 0], [], []>} : vector<1x32xf32>, vector<16x32xf32>, vector<1x16xf32> -> vector<1x16xf32>
    %735 = vector.broadcast %732 : vector<16x1xf32> to vector<16x16xf32>
    %736 = vector.broadcast %734 : vector<1x16xf32> to vector<16x16xf32>
    %737 = arith.addf %735, %736 : vector<16x16xf32>
    %cst_232 = arith.constant 0.000000e+00 : f32
    %738 = vector.broadcast %cst_232 : f32 to vector<16x16xf32>
    %739 = arith.cmpf ogt, %737, %738 : vector<16x16xf32>
    %cst_233 = arith.constant 2.000000e-01 : f32
    %740 = vector.broadcast %cst_233 : f32 to vector<16x16xf32>
    %741 = arith.mulf %740, %737 : vector<16x16xf32>
    %742 = arith.select %739, %737, %741 : vector<16x16xi1>, vector<16x16xf32>
    %cst_234 = arith.constant -1.000000e+09 : f32
    %743 = vector.broadcast %cst_234 : f32 to vector<16x16xf32>
    %744 = arith.select %598, %742, %743 : vector<16x16xi1>, vector<16x16xf32>
    %cst_235 = arith.constant dense<0xFF800000> : vector<16xf32>
    %745 = vector.multi_reduction <maximumf>, %744, %cst_235 [1] : vector<16x16xf32> to vector<16xf32>
    %746 = vector.shape_cast %745 : vector<16xf32> to vector<16x1xf32>
    %747 = vector.broadcast %746 : vector<16x1xf32> to vector<16x16xf32>
    %748 = arith.subf %744, %747 : vector<16x16xf32>
    %749 = math.exp %748 : vector<16x16xf32>
    %cst_236 = arith.constant dense<0.000000e+00> : vector<16xf32>
    %750 = vector.multi_reduction <add>, %749, %cst_236 [1] : vector<16x16xf32> to vector<16xf32>
    %751 = vector.shape_cast %750 : vector<16xf32> to vector<16x1xf32>
    %752 = tpu.reciprocal %751 {approx = true} : vector<16x1xf32> -> vector<16x1xf32>
    %753 = vector.broadcast %752 : vector<16x1xf32> to vector<16x16xf32>
    %754 = arith.mulf %749, %753 : vector<16x16xf32>
    %755 = arith.truncf %754 : vector<16x16xf32> to vector<16x16xbf16>
    %756 = arith.truncf %727 : vector<16x32xf32> to vector<16x32xbf16>
    %cst_237 = arith.constant dense<0.000000e+00> : vector<16x32xf32>
    %757 = tpu.matmul %755, %756, %cst_237 {dimension_numbers = #tpu.dot_dimension_numbers<[1], [0], [0], [1], [0, 0, 1, 1], [], []>} : vector<16x16xbf16>, vector<16x32xbf16>, vector<16x32xf32> -> vector<16x32xf32>
    %cst_238 = arith.constant 0.000000e+00 : f32
    %758 = vector.broadcast %cst_238 : f32 to vector<16x32xf32>
    %759 = arith.cmpf ogt, %757, %758 : vector<16x32xf32>
    %cst_239 = arith.constant 0.000000e+00 : f32
    %760 = vector.broadcast %cst_239 : f32 to vector<16x32xf32>
    %761 = arith.minimumf %757, %760 : vector<16x32xf32>
    %762 = math.exp %761 : vector<16x32xf32>
    %cst_240 = arith.constant 1.000000e+00 : f32
    %763 = vector.broadcast %cst_240 : f32 to vector<16x32xf32>
    %764 = arith.subf %762, %763 : vector<16x32xf32>
    %765 = arith.select %759, %757, %764 : vector<16x32xi1>, vector<16x32xf32>
    %766 = vector.extract_strided_slice %600 {offsets = [0, 96], sizes = [16, 32], strides = [1, 1]} : vector<16x128xf32> to vector<16x32xf32>
    %767 = arith.addf %766, %765 : vector<16x32xf32>
    %c16_241 = arith.constant 16 : index
    %c96_242 = arith.constant 96 : index
    %768 = vector.load %arg9[%c16_241, %c96_242] : memref<32x128xf32, #tpu.memory_space<vmem>>, vector<16x32xf32>
    tpu.vector_store %arg9[%c16_241, %c96_242], %767 {strides = array<i32>} : memref<32x128xf32, #tpu.memory_space<vmem>>, vector<16x32xf32>,
    %c0_243 = arith.constant 0 : index
    %c0_244 = arith.constant 0 : index
    %769 = vector.load %arg9[%c0_243, %c0_244] : memref<32x128xf32, #tpu.memory_space<vmem>>, vector<32x128xf32>
    %770 = vector.shape_cast %769 : vector<32x128xf32> to vector<2x16x128xf32>
    %c0_245 = arith.constant 0 : index
    %c0_246 = arith.constant 0 : index
    %c0_247 = arith.constant 0 : index
    %771 = vector.load %arg8[%c0_245, %c0_246, %c0_247] : memref<2x16x128xf32, #tpu.memory_space<vmem>>, vector<2x16x128xf32>
    tpu.vector_store %arg8[%c0_245, %c0_246, %c0_247], %770 {strides = array<i32>} : memref<2x16x128xf32, #tpu.memory_space<vmem>>, vector<2x16x128xf32>,
    return
  }
  func.func @transform_0(%arg0: i32) -> (i32, i32, i32) {
    %c0_i32 = arith.constant 0 : i32
    %c0_i32_0 = arith.constant 0 : i32
    %c0_i32_1 = arith.constant 0 : i32
    return %arg0, %c0_i32, %c0_i32_0 : i32, i32, i32
  }
  func.func @transform_1(%arg0: i32) -> (i32, i32, i32) {
    %c0_i32 = arith.constant 0 : i32
    %c0_i32_0 = arith.constant 0 : i32
    %c0_i32_1 = arith.constant 0 : i32
    return %arg0, %c0_i32, %c0_i32_0 : i32, i32, i32
  }
  func.func @transform_2(%arg0: i32) -> (i32, i32, i32) {
    %c0_i32 = arith.constant 0 : i32
    %c0_i32_0 = arith.constant 0 : i32
    %c0_i32_1 = arith.constant 0 : i32
    %c0_i32_2 = arith.constant 0 : i32
    return %c0_i32, %c0_i32_0, %c0_i32_1 : i32, i32, i32
  }
  func.func @transform_3(%arg0: i32) -> (i32, i32) {
    %c0_i32 = arith.constant 0 : i32
    %c0_i32_0 = arith.constant 0 : i32
    %c0_i32_1 = arith.constant 0 : i32
    return %c0_i32, %c0_i32_0 : i32, i32
  }
  func.func @transform_4(%arg0: i32) -> (i32, i32) {
    %c0_i32 = arith.constant 0 : i32
    %c0_i32_0 = arith.constant 0 : i32
    %c0_i32_1 = arith.constant 0 : i32
    return %c0_i32, %c0_i32_0 : i32, i32
  }
  func.func @transform_5(%arg0: i32) -> (i32, i32) {
    %c0_i32 = arith.constant 0 : i32
    %c0_i32_0 = arith.constant 0 : i32
    %c0_i32_1 = arith.constant 0 : i32
    return %c0_i32, %c0_i32_0 : i32, i32
  }
  func.func @transform_6(%arg0: i32) -> (i32, i32) {
    %c0_i32 = arith.constant 0 : i32
    %c0_i32_0 = arith.constant 0 : i32
    %c0_i32_1 = arith.constant 0 : i32
    return %c0_i32, %c0_i32_0 : i32, i32
  }
  func.func @transform_7(%arg0: i32) -> (i32, i32, i32) {
    %c0_i32 = arith.constant 0 : i32
    %c0_i32_0 = arith.constant 0 : i32
    %c0_i32_1 = arith.constant 0 : i32
    return %arg0, %c0_i32, %c0_i32_0 : i32, i32, i32
  }
}

</mosaic_0001>

<bundles_post_ra>
// kernel: _lambda_.4
= control target key start
LH: loop header
LB: loop body
LE: loop exit
PB: predicated region body
PF: predicated region fallthrough
CT: control target
= control target key end

     0   :  { %vm171_vm0 = vcmask 654336   ;;  %vm565_vm1 = vcmask 1041409   ;;  %vm567_vm2 = vcmask 1042434   ;;  %vm569_vm3 = vcmask 1043459   ;;  %s951_s1 = inlined_call_operand.vmem [shape: bf16[80,128], index: 1, kind: input, shape index: {}]   ;;  %s952_s2 = inlined_call_operand.vmem [shape: f32[1,128], index: 2, kind: input, shape index: {}]   ;;  %s953_s0 = inlined_call_operand.vmem [shape: bf16[256,80], index: 0, kind: input, shape index: {}]   ;;  %s954_s3 = inlined_call_operand.vmem [shape: f32[32,128], index: 3, kind: output, shape index: {}]  }
   0x1   :  { %v732_v0 = vld [vmem:[%s951_s1 + $0x20] sm:$0xff]  ;;  %v731_v1 = vld [vmem:[%s951_s1 + $0x18] sm:$0xff]  ;;  %v730_v2 = vld [vmem:[%s951_s1 + $0x10] sm:$0xff]  ;;  %vm571_vm4 = vcmask 1044484   ;;  %vm573_vm5 = vcmask 1045509   ;;  %vm575_vm6 = vcmask 1046534  }
   0x2   :  { %223 = vmatpush.bf16.msra.mxu0 %v732_v0  ;;  %733 = vmatpush.bf16.msra.mxu1 %v732_v0  ;;  %v729_v3 = vld [vmem:[%s951_s1 + $0x8] sm:$0xff]  ;;  %v728_v4 = vld [vmem:[%s951_s1] sm:$0xff]  ;;  %v714_v13 = vld [vmem:[%s953_s0 + $0x10] sm:$0xff]  ;;  %vm577_vm7 = vcmask 1047559  }
   0x3   :  { %734 = vmatpush.bf16.msra.mxu2 %v732_v0  ;;  %735 = vmatpush.bf16.msra.mxu3 %v732_v0  ;;  %v712_v5 = vld [vmem:[%s953_s0] sm:$0xff]  ;;  %v713_v9 = vld [vmem:[%s953_s0 + $0x8] sm:$0xff]  ;;  %v718_v14 = vld [vmem:[%s953_s0 + $0x30] sm:$0xff] }
   0x4   :  { %v716_v6 = vld [vmem:[%s953_s0 + $0x20] sm:$0xff]  ;;  %v717_v10 = vld [vmem:[%s953_s0 + $0x28] sm:$0xff]  ;;  %v722_v15 = vld [vmem:[%s953_s0 + $0x50] sm:$0xff] }
   0x5   :  { %v720_v7 = vld [vmem:[%s953_s0 + $0x40] sm:$0xff]  ;;  %v721_v11 = vld [vmem:[%s953_s0 + $0x48] sm:$0xff]  ;;  %v726_v16 = vld [vmem:[%s953_s0 + $0x70] sm:$0xff] }
   0x6   :  { %224 = vmatpush.bf16.msra.mxu0 %v731_v1  ;;  %736 = vmatpush.bf16.msra.mxu1 %v731_v1  ;;  %v724_v8 = vld [vmem:[%s953_s0 + $0x60] sm:$0xff]  ;;  %v725_v12 = vld [vmem:[%s953_s0 + $0x68] sm:$0xff]  ;;  %v715_v17 = vld [vmem:[%s953_s0 + $0x18] sm:$0xff] }
   0x7   :  { %737 = vmatpush.bf16.msra.mxu2 %v731_v1  ;;  %738 = vmatpush.bf16.msra.mxu3 %v731_v1  ;;  %v719_v18 = vld [vmem:[%s953_s0 + $0x38] sm:$0xff]  ;;  %v851_v21 = vld [vmem:[%s952_s2] ss:$0 sm:$0xff] }
   0x8   :  { %v723_v19 = vld [vmem:[%s953_s0 + $0x58] sm:$0xff] }
   0x9   :  { %v727_v20 = vld [vmem:[%s953_s0 + $0x78] sm:$0xff] }
   0xa   :  { %225 = vmatpush.bf16.msra.mxu0 %v730_v2  ;;  %739 = vmatpush.bf16.msra.mxu1 %v730_v2 }
   0xb   :  { %740 = vmatpush.bf16.msra.mxu2 %v730_v2  ;;  %741 = vmatpush.bf16.msra.mxu3 %v730_v2 }
   0xe   :  { %226 = vmatpush.bf16.msra.mxu0 %v729_v3  ;;  %742 = vmatpush.bf16.msra.mxu1 %v729_v3 }
   0xf   :  { %743 = vmatpush.bf16.msra.mxu2 %v729_v3  ;;  %744 = vmatpush.bf16.msra.mxu3 %v729_v3 }
  0x12   :  { %227 = vmatpush.bf16.msra.mxu0 %v728_v4  ;;  %745 = vmatpush.bf16.msra.mxu1 %v728_v4 }
  0x13   :  { %746 = vmatpush.bf16.msra.mxu2 %v728_v4  ;;  %747 = vmatpush.bf16.msra.mxu3 %v728_v4 }
  0x15   :  { %696 = vmatmul.msk.bf16.vlgmr.msra.gmra.mxu0 %vm171_vm0, %v712_v5  ;;  %700 = vmatmul.msk.bf16.vlgmr.msra.gmra.mxu1 %vm171_vm0, %v716_v6 }
  0x16   :  { %704 = vmatmul.msk.bf16.vlgmr.msra.gmra.mxu2 %vm171_vm0, %v720_v7  ;;  %708 = vmatmul.msk.bf16.vlgmr.msra.gmra.mxu3 %vm171_vm0, %v724_v8 }
  0x25   :  { %697 = vmatmul.msk.bf16.gmra.mxu0 %vm171_vm0, %v713_v9  ;;  %701 = vmatmul.msk.bf16.gmra.mxu1 %vm171_vm0, %v717_v10 }
  0x26   :  { %705 = vmatmul.msk.bf16.gmra.mxu2 %vm171_vm0, %v721_v11  ;;  %709 = vmatmul.msk.bf16.gmra.mxu3 %vm171_vm0, %v725_v12 }
  0x35   :  { %698 = vmatmul.msk.bf16.gmra.mxu0 %vm171_vm0, %v714_v13  ;;  %702 = vmatmul.msk.bf16.gmra.mxu1 %vm171_vm0, %v718_v14 }
  0x36   :  { %706 = vmatmul.msk.bf16.gmra.mxu2 %vm171_vm0, %v722_v15  ;;  %710 = vmatmul.msk.bf16.gmra.mxu3 %vm171_vm0, %v726_v16 }
  0x45   :  { %699 = vmatmul.msk.bf16.gmra.mxu0 %vm171_vm0, %v715_v17  ;;  %703 = vmatmul.msk.bf16.gmra.mxu1 %vm171_vm0, %v719_v18 }
  0x46   :  { %707 = vmatmul.msk.bf16.gmra.mxu2 %vm171_vm0, %v723_v19  ;;  %711 = vmatmul.msk.bf16.gmra.mxu3 %vm171_vm0, %v727_v20 }
  0x92   :  { %v229_v22 = vpop.f32.mrf.mxu0  ;;  %v249_v23 = vpop.f32.mrf.mxu1 }
  0x93   :  { %v230_v24 = vadd.f32 %v851_v21, %v229_v22  ;;  %v250_v25 = vadd.f32 %v851_v21, %v249_v23 }
  0x95   :  { %v309_v26 = vmax.f32 %v230_v24, 0.0  ;;  %v317_v27 = vmax.f32 %v250_v25, 0.0 }
  0x97   :  { %v341_v34 = vrot.slane %v309_v26, 4  ;;  %v389_v37 = vrot.slane %v317_v27, 4 }
  0x99   :  { %v269_v28 = vpop.f32.mrf.mxu2  ;;  %v289_v29 = vpop.f32.mrf.mxu3  ;;  %v342_v43 = vmax.f32 %v309_v26, %v341_v34  ;;  %v390_v45 = vmax.f32 %v317_v27, %v389_v37 }
  0x9a   :  { %v270_v30 = vadd.f32 %v851_v21, %v269_v28  ;;  %v290_v31 = vadd.f32 %v851_v21, %v289_v29  ;;  %v231_v32 = vpop.f32.mrf.mxu0  ;;  %v251_v33 = vpop.f32.mrf.mxu1 }
  0x9b   :  { %v232_v35 = vadd.f32 %v851_v21, %v231_v32  ;;  %v252_v36 = vadd.f32 %v851_v21, %v251_v33  ;;  %v343_v55 = vrot.slane %v342_v43, 2  ;;  %v391_v59 = vrot.slane %v390_v45, 2 }
  0x9c   :  { %v325_v38 = vmax.f32 %v270_v30, 0.0  ;;  %v333_v39 = vmax.f32 %v290_v31, 0.0 }
  0x9d   :  { %v310_v40 = vmax.f32 %v232_v35, 0.0  ;;  %v318_v41 = vmax.f32 %v252_v36, 0.0  ;;  %v344_v3 = vmax.f32 %v342_v43, %v343_v55  ;;  %v392_v5 = vmax.f32 %v390_v45, %v391_v59 }
  0x9e   :  { %v437_v42 = vrot.slane %v325_v38, 4  ;;  %v485_v44 = vrot.slane %v333_v39, 4 }
  0x9f   :  { %v347_v46 = vrot.slane %v310_v40, 4  ;;  %v395_v48 = vrot.slane %v318_v41, 4  ;;  %v345_v19 = vrot.slane %v344_v3, 1  ;;  %v393_v22 = vrot.slane %v392_v5, 1 }
  0xa0   :  { %v438_v47 = vmax.f32 %v325_v38, %v437_v42  ;;  %v486_v56 = vmax.f32 %v333_v39, %v485_v44 }
  0xa1   :  { %v271_v49 = vpop.f32.mrf.mxu2  ;;  %v291_v50 = vpop.f32.mrf.mxu3  ;;  %v348_v60 = vmax.f32 %v310_v40, %v347_v46  ;;  %v396_v63 = vmax.f32 %v318_v41, %v395_v48  ;;  %v346_v40 = vmax.f32 %v344_v3, %v345_v19  ;;  %v394_v46 = vmax.f32 %v392_v5, %v393_v22 }
  0xa2   :  { %v272_v51 = vadd.f32 %v851_v21, %v271_v49  ;;  %v292_v52 = vadd.f32 %v851_v21, %v291_v50  ;;  %v234_v53 = vpop.f32.mrf.mxu0  ;;  %v254_v54 = vpop.f32.mrf.mxu1  ;;  %v439_v62 = vrot.slane %v438_v47, 2  ;;  %v487_v4 = vrot.slane %v486_v56, 2 }
  0xa3   :  { %v235_v57 = vadd.f32 %v851_v21, %v234_v53  ;;  %v255_v58 = vadd.f32 %v851_v21, %v254_v54  ;;  %v349_v6 = vrot.slane %v348_v60, 2  ;;  %v397_v9 = vrot.slane %v396_v63, 2 }
  0xa4   :  { %v326_v61 = vmax.f32 %v272_v51, 0.0  ;;  %v334_v0 = vmax.f32 %v292_v52, 0.0  ;;  %v440_v8 = vmax.f32 %v438_v47, %v439_v62  ;;  %v488_v20 = vmax.f32 %v486_v56, %v487_v4 }
  0xa5   :  { %v311_v1 = vmax.f32 %v235_v57, 0.0  ;;  %v319_v2 = vmax.f32 %v255_v58, 0.0  ;;  %v350_v23 = vmax.f32 %v348_v60, %v349_v6  ;;  %v398_v31 = vmax.f32 %v396_v63, %v397_v9 }
  0xa6   :  { %v443_v7 = vrot.slane %v326_v61, 4  ;;  %v491_v10 = vrot.slane %v334_v0, 4  ;;  %v441_v30 = vrot.slane %v440_v8, 1  ;;  %v489_v34 = vrot.slane %v488_v20, 1 }
  0xa7   :  { %v353_v13 = vrot.slane %v311_v1, 4  ;;  %v401_v14 = vrot.slane %v319_v2, 4  ;;  %v351_v38 = vrot.slane %v350_v23, 1  ;;  %v399_v47 = vrot.slane %v398_v31, 1 }
  0xa8   :  { %v444_v24 = vmax.f32 %v326_v61, %v443_v7  ;;  %v492_v26 = vmax.f32 %v334_v0, %v491_v10  ;;  %v867_v51 = vmax.f32 %v440_v8, %v441_v30  ;;  %v869_v52 = vmax.f32 %v488_v20, %v489_v34 }
  0xa9   :  { %v274_v11 = vpop.f32.mrf.mxu2  ;;  %v294_v12 = vpop.f32.mrf.mxu3  ;;  %v354_v32 = vmax.f32 %v311_v1, %v353_v13  ;;  %v402_v33 = vmax.f32 %v319_v2, %v401_v14  ;;  %v352_v55 = vmax.f32 %v350_v23, %v351_v38  ;;  %v400_v8 = vmax.f32 %v398_v31, %v399_v47 }
  0xaa   :  { %v275_v15 = vadd.f32 %v851_v21, %v274_v11  ;;  %v295_v16 = vadd.f32 %v851_v21, %v294_v12  ;;  %v236_v17 = vpop.f32.mrf.mxu0  ;;  %v256_v18 = vpop.f32.mrf.mxu1  ;;  %v445_v39 = vrot.slane %v444_v24, 2  ;;  %v493_v41 = vrot.slane %v492_v26, 2 }
  0xab   :  { %v237_v28 = vadd.f32 %v851_v21, %v236_v17  ;;  %v257_v29 = vadd.f32 %v851_v21, %v256_v18  ;;  %v355_v48 = vrot.slane %v354_v32, 2  ;;  %v403_v49 = vrot.slane %v402_v33, 2 }
  0xac   :  { %v327_v25 = vmax.f32 %v275_v15, 0.0  ;;  %v335_v27 = vmax.f32 %v295_v16, 0.0  ;;  %v446_v56 = vmax.f32 %v444_v24, %v445_v39  ;;  %v494_v60 = vmax.f32 %v492_v26, %v493_v41 }
  0xad   :  { %v312_v36 = vmax.f32 %v237_v28, 0.0  ;;  %v320_v37 = vmax.f32 %v257_v29, 0.0  ;;  %v356_v0 = vmax.f32 %v354_v32, %v355_v48  ;;  %v404_v1 = vmax.f32 %v402_v33, %v403_v49 }
  0xae   :  { %v449_v35 = vrot.slane %v327_v25, 4  ;;  %v497_v42 = vrot.slane %v335_v27, 4  ;;  %v447_v9 = vrot.slane %v446_v56, 1  ;;  %v495_v18 = vrot.slane %v494_v60, 1 }
  0xaf   :  { %v359_v43 = vrot.slane %v312_v36, 4  ;;  %v407_v54 = vrot.slane %v320_v37, 4  ;;  %v357_v19 = vrot.slane %v356_v0, 1  ;;  %v405_v20 = vrot.slane %v404_v1, 1 }
  0xb0   :  { %v450_v53 = vmax.f32 %v327_v25, %v449_v35  ;;  %v498_v61 = vmax.f32 %v335_v27, %v497_v42  ;;  %v566_v24 = vsel %vm565_vm1, %v352_v55, %v346_v40  ;;  %v579_v32 = vsel %vm565_vm1, %v400_v8, %v394_v46 }
  0xb1   :  { %v276_v44 = vpop.f32.mrf.mxu2  ;;  %v296_v45 = vpop.f32.mrf.mxu3  ;;  %v360_v62 = vmax.f32 %v312_v36, %v359_v43  ;;  %v408_v5 = vmax.f32 %v320_v37, %v407_v54  ;;  %v448_v33 = vmax.f32 %v446_v56, %v447_v9  ;;  %v496_v36 = vmax.f32 %v494_v60, %v495_v18 }
  0xb2   :  { %v239_v50 = vpop.f32.mrf.mxu0  ;;  %v277_v57 = vadd.f32 %v851_v21, %v276_v44  ;;  %v297_v58 = vadd.f32 %v851_v21, %v296_v45  ;;  %v259_v59 = vpop.f32.mrf.mxu1  ;;  %v451_v4 = vrot.slane %v450_v53, 2  ;;  %v499_v12 = vrot.slane %v498_v61, 2 }
  0xb3   :  { %v240_v63 = vadd.f32 %v851_v21, %v239_v50  ;;  %v260_v7 = vadd.f32 %v851_v21, %v259_v59  ;;  %v361_v13 = vrot.slane %v360_v62, 2  ;;  %v409_v26 = vrot.slane %v408_v5, 2 }
  0xb4   :  { %v328_v2 = vmax.f32 %v277_v57, 0.0  ;;  %v336_v3 = vmax.f32 %v297_v58, 0.0  ;;  %v452_v25 = vmax.f32 %v450_v53, %v451_v4  ;;  %v500_v34 = vmax.f32 %v498_v61, %v499_v12 }
  0xb5   :  { %v313_v6 = vmax.f32 %v240_v63, 0.0  ;;  %v321_v15 = vmax.f32 %v260_v7, 0.0  ;;  %v362_v35 = vmax.f32 %v360_v62, %v361_v13  ;;  %v358_v37 = vmax.f32 %v356_v0, %v357_v19 }
  0xb6   :  { %v455_v10 = vrot.slane %v328_v2, 4  ;;  %v503_v11 = vrot.slane %v336_v3, 4  ;;  %v406_v38 = vmax.f32 %v404_v1, %v405_v20  ;;  %v453_v40 = vrot.slane %v452_v25, 1 }
  0xb7   :  { %v365_v14 = vrot.slane %v313_v6, 4  ;;  %v413_v27 = vrot.slane %v321_v15, 4  ;;  %v410_v45 = vmax.f32 %v408_v5, %v409_v26  ;;  %v501_v50 = vrot.slane %v500_v34, 1 }
  0xb8   :  { %v456_v22 = vmax.f32 %v328_v2, %v455_v10  ;;  %v504_v28 = vmax.f32 %v336_v3, %v503_v11  ;;  %v363_v46 = vrot.slane %v362_v35, 1  ;;  %v586_v57 = vsel %vm565_vm1, %v448_v33, %v867_v51 }
  0xb9   :  { %v279_v16 = vpop.f32.mrf.mxu2  ;;  %v299_v17 = vpop.f32.mrf.mxu3  ;;  %v366_v29 = vmax.f32 %v313_v6, %v365_v14  ;;  %v414_v42 = vmax.f32 %v321_v15, %v413_v27  ;;  %v593_v58 = vsel %vm565_vm1, %v496_v36, %v869_v52  ;;  %v568_v59 = vsel %vm567_vm2, %v358_v37, %v566_v24 }
  0xba   :  { %v241_v23 = vpop.f32.mrf.mxu0  ;;  %v280_v30 = vadd.f32 %v851_v21, %v279_v16  ;;  %v300_v31 = vadd.f32 %v851_v21, %v299_v17  ;;  %v457_v39 = vrot.slane %v456_v22, 2  ;;  %v261_v41 = vpop.f32.mrf.mxu1  ;;  %v505_v47 = vrot.slane %v504_v28, 2 }
  0xbb   :  { %v242_v44 = vadd.f32 %v851_v21, %v241_v23  ;;  %v367_v48 = vrot.slane %v366_v29, 2  ;;  %v262_v54 = vadd.f32 %v851_v21, %v261_v41  ;;  %v454_v61 = vmax.f32 %v452_v25, %v453_v40 }
  0xbc   :  { %v329_v43 = vmax.f32 %v280_v30, 0.0  ;;  %v337_v49 = vmax.f32 %v300_v31, 0.0  ;;  %v458_v60 = vmax.f32 %v456_v22, %v457_v39  ;;  %v415_v62 = vrot.slane %v414_v42, 2 }
  0xbd   :  { %v314_v53 = vmax.f32 %v242_v44, 0.0  ;;  %v411_v1 = vrot.slane %v410_v45, 1  ;;  %v506_v2 = vmax.f32 %v504_v28, %v505_v47  ;;  %v368_v3 = vmax.f32 %v366_v29, %v367_v48 }
  0xbe   :  { %v461_v63 = vrot.slane %v329_v43, 4  ;;  %v509_v4 = vrot.slane %v337_v49, 4  ;;  %v580_v6 = vsel %vm567_vm2, %v406_v38, %v579_v32  ;;  %v502_v7 = vmax.f32 %v500_v34, %v501_v50 }
  0xbf   :  { %v371_v0 = vrot.slane %v314_v53, 4  ;;  %v364_v8 = vmax.f32 %v362_v35, %v363_v46  ;;  %v322_v51 = vmax.f32 %v262_v54, 0.0  ;;  %v459_v9 = vrot.slane %v458_v60, 1 }
  0xc0   :  { %v587_v12 = vsel %vm567_vm2, %v454_v61, %v586_v57  ;;  %v416_v13 = vmax.f32 %v414_v42, %v415_v62  ;;  %v462_v14 = vmax.f32 %v329_v43, %v461_v63  ;;  %v412_v16 = vmax.f32 %v410_v45, %v411_v1 }
  0xc1   :  { %v281_v55 = vpop.f32.mrf.mxu2  ;;  %v301_v56 = vpop.f32.mrf.mxu3  ;;  %v372_v10 = vmax.f32 %v314_v53, %v371_v0  ;;  %v507_v17 = vrot.slane %v506_v2, 1  ;;  %v369_v18 = vrot.slane %v368_v3, 1  ;;  %v510_v19 = vmax.f32 %v337_v49, %v509_v4 }
  0xc2   :  { %v244_v5 = vpop.f32.mrf.mxu0  ;;  %v282_v52 = vadd.f32 %v851_v21, %v281_v55  ;;  %v302_v11 = vadd.f32 %v851_v21, %v301_v56  ;;  %v264_v20 = vpop.f32.mrf.mxu1  ;;  %v892_v22 = vsel %vm567_vm2, %v502_v7, %v593_v58  ;;  %v419_v23 = vrot.slane %v322_v51, 4 }
  0xc3   :  { %v245_v15 = vadd.f32 %v851_v21, %v244_v5  ;;  %v570_v26 = vsel %vm569_vm3, %v364_v8, %v568_v59  ;;  %v460_v27 = vmax.f32 %v458_v60, %v459_v9  ;;  %v373_v28 = vrot.slane %v372_v10, 2 }
  0xc4   :  { %v330_v24 = vmax.f32 %v282_v52, 0.0  ;;  %v338_v29 = vmax.f32 %v302_v11, 0.0  ;;  %v417_v30 = vrot.slane %v416_v13, 1  ;;  %v463_v31 = vrot.slane %v462_v14, 2 }
  0xc5   :  { %v315_v25 = vmax.f32 %v245_v15, 0.0  ;;  %v265_v33 = vadd.f32 %v851_v21, %v264_v20  ;;  %v581_v36 = vsel %vm569_vm3, %v412_v16, %v580_v6  ;;  %v897_v37 = vmax.f32 %v506_v2, %v507_v17 }
  0xc6   :  { %v370_v38 = vmax.f32 %v368_v3, %v369_v18  ;;  %v511_v39 = vrot.slane %v510_v19, 2  ;;  %v420_v41 = vmax.f32 %v322_v51, %v419_v23  ;;  %v467_v40 = vrot.slane %v330_v24, 4 }
  0xc7   :  { %v377_v32 = vrot.slane %v315_v25, 4  ;;  %v323_v43 = vmax.f32 %v265_v33, 0.0  ;;  %v374_v44 = vmax.f32 %v372_v10, %v373_v28  ;;  %v515_v45 = vrot.slane %v338_v29, 4 }
  0xc8   :  { %v902_v50 = vsel %vm569_vm3, %v460_v27, %v587_v12  ;;  %v418_v46 = vmax.f32 %v416_v13, %v417_v30  ;;  %v904_v53 = vmax.f32 %v462_v14, %v463_v31  ;;  %v906_v55 = vmax.f32 %v510_v19, %v511_v39 }
  0xc9   :  { %v284_v34 = vpop.f32.mrf.mxu2  ;;  %v304_v35 = vpop.f32.mrf.mxu3  ;;  %v378_v42 = vmax.f32 %v315_v25, %v377_v32  ;;  %v425_v54 = vrot.slane %v323_v43, 4  ;;  %v421_v59 = vrot.slane %v420_v41, 2  ;;  %v468_v60 = vmax.f32 %v330_v24, %v467_v40 }
  0xca   :  { %v285_v47 = vadd.f32 %v851_v21, %v284_v34  ;;  %v305_v48 = vadd.f32 %v851_v21, %v304_v35  ;;  %v246_v49 = vpop.f32.mrf.mxu0  ;;  %v375_v63 = vrot.slane %v374_v44, 1  ;;  %v516_v0 = vmax.f32 %v338_v29, %v515_v45  ;;  %v266_v3 = vpop.f32.mrf.mxu1 }
  0xcb   :  { %v379_v56 = vrot.slane %v378_v42, 2  ;;  %v426_v61 = vmax.f32 %v323_v43, %v425_v54  ;;  %v247_v62 = vadd.f32 %v851_v21, %v246_v49  ;;  %v572_v4 = vsel %vm571_vm4, %v370_v38, %v570_v26 }
  0xcc   :  { %v331_v57 = vmax.f32 %v285_v47, 0.0  ;;  %v339_v58 = vmax.f32 %v305_v48, 0.0  ;;  %v911_v5 = vsel %vm571_vm4, %v418_v46, %v581_v36  ;;  %v465_v6 = vrot.slane %v904_v53, 1 }
  0xcd   :  { %v316_v7 = vmax.f32 %v247_v62, 0.0  ;;  %v380_v8 = vmax.f32 %v378_v42, %v379_v56  ;;  %v427_v51 = vrot.slane %v426_v61, 2  ;;  %v422_v52 = vmax.f32 %v420_v41, %v421_v59 }
  0xce   :  { %v473_v1 = vrot.slane %v331_v57, 4  ;;  %v521_v2 = vrot.slane %v339_v58, 4  ;;  %v469_v11 = vrot.slane %v468_v60, 2  ;;  %v267_v13 = vadd.f32 %v851_v21, %v266_v3 }
  0xcf   :  { %v383_v12 = vrot.slane %v316_v7, 4  ;;  %v513_v16 = vrot.slane %v906_v55, 1  ;;  %v376_v17 = vmax.f32 %v374_v44, %v375_v63  ;;  %v517_v18 = vrot.slane %v516_v0, 2 }
  0xd0   :  { %v474_v9 = vmax.f32 %v331_v57, %v473_v1  ;;  %v522_v10 = vmax.f32 %v339_v58, %v521_v2  ;;  %v324_v24 = vmax.f32 %v267_v13, 0.0  ;;  %v381_v25 = vrot.slane %v380_v8, 1 }
  0xd1   :  { %v286_v14 = vpop.f32.mrf.mxu2  ;;  %v306_v15 = vpop.f32.mrf.mxu3  ;;  %v384_v23 = vmax.f32 %v316_v7, %v383_v12  ;;  %v428_v26 = vmax.f32 %v426_v61, %v427_v51  ;;  %v423_v29 = vrot.slane %v422_v52, 1  ;;  %v470_v30 = vmax.f32 %v468_v60, %v469_v11 }
  0xd2   :  { %v475_v19 = vrot.slane %v474_v9, 2  ;;  %v523_v20 = vrot.slane %v522_v10, 2  ;;  %v287_v27 = vadd.f32 %v851_v21, %v286_v14  ;;  %v307_v28 = vadd.f32 %v851_v21, %v306_v15 }
  0xd3   :  { %v385_v31 = vrot.slane %v384_v23, 2  ;;  %v431_v32 = vrot.slane %v324_v24, 4  ;;  %v574_v33 = vsel %vm573_vm5, %v376_v17, %v572_v4  ;;  %v518_v34 = vmax.f32 %v516_v0, %v517_v18 }
  0xd4   :  { %v332_v35 = vmax.f32 %v287_v27, 0.0  ;;  %v340_v36 = vmax.f32 %v307_v28, 0.0  ;;  %v476_v38 = vmax.f32 %v474_v9, %v475_v19  ;;  %v524_v39 = vmax.f32 %v522_v10, %v523_v20 }
  0xd5   :  { %v386_v41 = vmax.f32 %v384_v23, %v385_v31  ;;  %v432_v40 = vmax.f32 %v324_v24, %v431_v32  ;;  %v382_v42 = vmax.f32 %v380_v8, %v381_v25  ;;  %v429_v43 = vrot.slane %v428_v26, 1 }
  0xd6   :  { %v479_v44 = vrot.slane %v332_v35, 4  ;;  %v527_v45 = vrot.slane %v340_v36, 4  ;;  %v424_v47 = vmax.f32 %v422_v52, %v423_v29  ;;  %v471_v48 = vrot.slane %v470_v30, 1 }
  0xd7   :  { %v387_v21 = vrot.slane %v386_v41, 1  ;;  %v433_v49 = vrot.slane %v432_v40, 2  ;;  %v519_v46 = vrot.slane %v518_v34, 1  ;;  %v477_v57 = vrot.slane %v476_v38, 1 }
  0xd8   :  { %v480_v54 = vmax.f32 %v332_v35, %v479_v44  ;;  %v528_v56 = vmax.f32 %v340_v36, %v527_v45  ;;  %v525_v58 = vrot.slane %v524_v39, 1  ;;  %v576_v61 = vsel %vm575_vm6, %v382_v42, %v574_v33 }
  0xd9   :  { %v388_v59 = vmax.f32 %v386_v41, %v387_v21  ;;  %v434_v60 = vmax.f32 %v432_v40, %v433_v49  ;;  %v430_v62 = vmax.f32 %v428_v26, %v429_v43  ;;  %v466_v1 = vmax.f32 %v904_v53, %v465_v6 }
  0xda   :  { %v481_v63 = vrot.slane %v480_v54, 2  ;;  %v529_v0 = vrot.slane %v528_v56, 2  ;;  %v514_v2 = vmax.f32 %v906_v55, %v513_v16  ;;  %v472_v7 = vmax.f32 %v470_v30, %v471_v48 }
  0xdb   :  { %v578_v3 = vsel %vm577_vm7, %v388_v59, %v576_v61  ;;  %v435_v4 = vrot.slane %v434_v60, 1  ;;  %v520_v8 = vmax.f32 %v518_v34, %v519_v46  ;;  %v583_v10 = vsel %vm573_vm5, %v424_v47, %v911_v5 }
  0xdc   :  { %604 = vst [vmem:[%s954_s3] sm:$0xff] %v578_v3  ;;  %v482_v51 = vmax.f32 %v480_v54, %v481_v63  ;;  %v530_v9 = vmax.f32 %v528_v56, %v529_v0  ;;  %v478_v52 = vmax.f32 %v476_v38, %v477_v57  ;;  %v526_v11 = vmax.f32 %v524_v39, %v525_v58 }
  0xdd   :  { %v436_v12 = vmax.f32 %v434_v60, %v435_v4  ;;  %v595_v53 = vsel %vm569_vm3, %v897_v37, %v892_v22  ;;  %v584_v55 = vsel %vm575_vm6, %v430_v62, %v583_v10  ;;  %v589_v14 = vsel %vm571_vm4, %v466_v1, %v902_v50 }
  0xde   :  { %v483_v6 = vrot.slane %v482_v51, 1  ;;  %v531_v13 = vrot.slane %v530_v9, 1  ;;  %v596_v15 = vsel %vm571_vm4, %v514_v2, %v595_v53  ;;  %v590_v5 = vsel %vm573_vm5, %v472_v7, %v589_v14 }
  0xdf   :  { %v585_v16 = vsel %vm577_vm7, %v436_v12, %v584_v55  ;;  %v597_v17 = vsel %vm573_vm5, %v520_v8, %v596_v15  ;;  %v591_v18 = vsel %vm575_vm6, %v478_v52, %v590_v5 }
  0xe0   :  { %605 = vst [vmem:[%s954_s3 + $0x8] sm:$0xff] %v585_v16  ;;  %v484_v22 = vmax.f32 %v482_v51, %v483_v6  ;;  %v532_v37 = vmax.f32 %v530_v9, %v531_v13  ;;  %v598_v19 = vsel %vm575_vm6, %v526_v11, %v597_v17 }
  0xe2   :  { %v592_v50 = vsel %vm577_vm7, %v484_v22, %v591_v18  ;;  %v599_v20 = vsel %vm577_vm7, %v532_v37, %v598_v19 }
  0xe3   :  { %606 = vst [vmem:[%s954_s3 + $0x10] sm:$0xff] %v592_v50 }
  0xe4   :  { %607 = vst [vmem:[%s954_s3 + $0x18] sm:$0xff] %v599_v20 }

// kernel: _lambda_.5
= control target key start
LH: loop header
LB: loop body
LE: loop exit
PB: predicated region body
PF: predicated region fallthrough
CT: control target
= control target key end

     0   :  { %vm150_vm0 = vcmask 261120   ;;  %s362_s3 = inlined_call_operand.vmem [shape: bf16[128,128], index: 3, kind: input, shape index: {}]   ;;  %s363_s2 = inlined_call_operand.vmem [shape: bf16[32,128], index: 2, kind: input, shape index: {}]   ;;  %s364_s0 = inlined_call_operand.vmem [shape: bf16[32,32], index: 0, kind: input, shape index: {}]   ;;  %s365_s4 = inlined_call_operand.vmem [shape: f32[1,128], index: 4, kind: input, shape index: {}]   ;;  %s366_s1 = inlined_call_operand.vmem [shape: bf16[32,128], index: 1, kind: input, shape index: {}]   ;;  %s367_s5 = inlined_call_operand.vmem [shape: f32[32,128], index: 5, kind: output, shape index: {}]  }
   0x1   :  { %v263_v0 = vld [vmem:[%s362_s3 + $0x38] sm:$0xff]  ;;  %v253_v1 = vld [vmem:[%s363_s2 + $0x8] sm:$0xff]  ;;  %v262_v2 = vld [vmem:[%s362_s3 + $0x30] sm:$0xff] }
   0x2   :  { %109 = vmatpush.bf16.msra.mxu0 %v263_v0  ;;  %264 = vmatpush.bf16.msra.mxu2 %v263_v0  ;;  %v252_v3 = vld [vmem:[%s363_s2] sm:$0xff]  ;;  %v261_v4 = vld [vmem:[%s362_s3 + $0x28] sm:$0xff]  ;;  %v259_v7 = vld [vmem:[%s362_s3 + $0x18] sm:$0xff] }
   0x3   :  { %163 = vmatpush.bf16.msra.mxu1 %v253_v1  ;;  %v250_v5 = vld [vmem:[%s364_s0] sm:$0xff]  ;;  %v258_v8 = vld [vmem:[%s362_s3 + $0x10] sm:$0xff]  ;;  %v257_v9 = vld [vmem:[%s362_s3 + $0x8] sm:$0xff] }
   0x4   :  { %v260_v6 = vld [vmem:[%s362_s3 + $0x20] sm:$0xff]  ;;  %v251_v10 = vld [vmem:[%s364_s0 + $0x8] sm:$0xff] }
   0x5   :  { %v256_v11 = vld [vmem:[%s362_s3] sm:$0xff]  ;;  %v255_v13 = vld [vmem:[%s366_s1 + $0x8] sm:$0xff] }
   0x6   :  { %110 = vmatpush.bf16.msra.mxu0 %v262_v2  ;;  %265 = vmatpush.bf16.msra.mxu2 %v262_v2  ;;  %v254_v12 = vld [vmem:[%s366_s1] sm:$0xff] }
   0x7   :  { %164 = vmatpush.bf16.msra.mxu1 %v252_v3  ;;  %v272_v16 = vld [vmem:[%s365_s4] ss:$0 sm:$0xff] }
   0xa   :  { %111 = vmatpush.bf16.msra.mxu0 %v261_v4  ;;  %266 = vmatpush.bf16.msra.mxu2 %v261_v4 }
   0xb   :  { %248 = vmatmul.msk.bf16.vlgmr.msra.gmra.mxu1 %vm150_vm0, %v250_v5 }
   0xe   :  { %112 = vmatpush.bf16.msra.mxu0 %v260_v6  ;;  %267 = vmatpush.bf16.msra.mxu2 %v260_v6 }
  0x12   :  { %113 = vmatpush.bf16.msra.mxu0 %v259_v7  ;;  %268 = vmatpush.bf16.msra.mxu2 %v259_v7 }
  0x16   :  { %114 = vmatpush.bf16.msra.mxu0 %v258_v8  ;;  %269 = vmatpush.bf16.msra.mxu2 %v258_v8 }
  0x1a   :  { %115 = vmatpush.bf16.msra.mxu0 %v257_v9  ;;  %270 = vmatpush.bf16.msra.mxu2 %v257_v9 }
  0x1b   :  { %249 = vmatmul.msk.bf16.gmra.mxu1 %vm150_vm0, %v251_v10 }
  0x1e   :  { %116 = vmatpush.bf16.msra.mxu0 %v256_v11  ;;  %271 = vmatpush.bf16.msra.mxu2 %v256_v11 }
  0x21   :  { %117 = vmatmul.bf16.vlgmr.msra.gmra.mxu0 %v254_v12  ;;  %122 = vmatmul.bf16.vlgmr.msra.gmra.mxu2 %v255_v13 }
  0x88   :  { %v166_v14 = vpop.f32.mrf.mxu1 }
  0x90   :  { %v168_v15 = vpop.f32.mrf.mxu1 }
  0x98   :  { %v171_v20 = vpop.f32.mrf.mxu1 }
  0x9e   :  { %v118_v17 = vpop.f32.mrf.mxu0 }
  0x9f   :  { %v167_v18 = vadd.f32 %v166_v14, %v118_v17 }
  0xa0   :  { %v173_v27 = vpop.f32.mrf.mxu1 }
  0xa1   :  { %v180_v19 = vadd.f32 %v272_v16, %v167_v18 }
  0xa3   :  { %184 = vst [vmem:[%s367_s5] sm:$0xff] %v180_v19 }
  0xa4   :  { %v123_v21 = vpop.f32.mrf.mxu2 }
  0xa5   :  { %v172_v22 = vadd.f32 %v171_v20, %v123_v21 }
  0xa6   :  { %v120_v23 = vpop.f32.mrf.mxu0 }
  0xa7   :  { %v182_v24 = vadd.f32 %v272_v16, %v172_v22  ;;  %v169_v25 = vadd.f32 %v168_v15, %v120_v23 }
  0xa9   :  { %186 = vst [vmem:[%s367_s5 + $0x10] sm:$0xff] %v182_v24  ;;  %v181_v26 = vadd.f32 %v272_v16, %v169_v25 }
  0xab   :  { %185 = vst [vmem:[%s367_s5 + $0x8] sm:$0xff] %v181_v26 }
  0xac   :  { %v125_v28 = vpop.f32.mrf.mxu2 }
  0xad   :  { %v174_v29 = vadd.f32 %v173_v27, %v125_v28 }
  0xaf   :  { %v183_v30 = vadd.f32 %v272_v16, %v174_v29 }
  0xb1   :  { %187 = vst [vmem:[%s367_s5 + $0x18] sm:$0xff] %v183_v30 }

// kernel: _lambda_.7
= control target key start
LH: loop header
LB: loop body
LE: loop exit
PB: predicated region body
PF: predicated region fallthrough
CT: control target
= control target key end

     0   :  { %vm60_vm0 = vcmask 1041409   ;;  %vm125_vm1 = vcmask 1024   ;;  %s234_s1 = inlined_call_operand.vmem [shape: bf16[128,1], index: 1, kind: input, shape index: {}]   ;;  %s235_s0 = inlined_call_operand.vmem [shape: f32[2,16,128], index: 0, kind: input, shape index: {}]   ;;  %s236_s2 = inlined_call_operand.<no memory space> [shape: f32[1,1], index: 2, kind: input, shape index: {}]   ;;  %s237_s3 = inlined_call_operand.vmem [shape: f32[2,1], index: 3, kind: output, shape index: {}]  }
   0x1   :  { %v170_v0 = vld [vmem:[%s234_s1 + $0x38] sm:$0xff]  ;;  %v8_v1 = vstv %s236_s2  ;;  %v169_v2 = vld [vmem:[%s234_s1 + $0x30] sm:$0xff]  ;;  %v16_v3 = vld [vmem:[%s235_s0] sm:$0xff] }
   0x2   :  { %112 = vmatpush.bf16.msra.mxu0 %v170_v0  ;;  %9 = vst [vmem:[#allocation2] sm:$0x1] %v8_v1  ;;  %v17_v4 = vld [vmem:[%s235_s0 + $0x8] sm:$0xff]  ;;  %v18_v5 = vld [vmem:[%s235_s0 + $0x10] sm:$0xff]  ;;  %v19_v6 = vld [vmem:[%s235_s0 + $0x18] sm:$0xff] }
   0x3   :  { %v20_v7 = vmax.f32 %v16_v3, %v17_v4  ;;  %v27_v8 = vmax.f32 %v18_v5, %v19_v6  ;;  %v168_v9 = vld [vmem:[%s234_s1 + $0x28] sm:$0xff]  ;;  %v167_v14 = vld [vmem:[%s234_s1 + $0x20] sm:$0xff]  ;;  %v166_v19 = vld [vmem:[%s234_s1 + $0x18] sm:$0xff] }
   0x4   :  { %v165_v24 = vld [vmem:[%s234_s1 + $0x10] sm:$0xff]  ;;  %v164_v27 = vld [vmem:[%s234_s1 + $0x8] sm:$0xff]  ;;  %v163_v30 = vld [vmem:[%s234_s1] sm:$0xff] }
   0x5   :  { %v21_v10 = vrot.slane %v20_v7, 4  ;;  %v28_v11 = vrot.slane %v27_v8, 4 }
   0x6   :  { %113 = vmatpush.bf16.msra.mxu0 %v169_v2 }
   0x7   :  { %v22_v12 = vmax.f32 %v20_v7, %v21_v10  ;;  %v29_v13 = vmax.f32 %v27_v8, %v28_v11 }
   0x9   :  { %v23_v15 = vrot.slane %v22_v12, 2  ;;  %v30_v16 = vrot.slane %v29_v13, 2  ;;  %v171_v33 = vld [vmem:[#allocation2] ss:$0 sm:$0xff] }
   0xa   :  { %114 = vmatpush.bf16.msra.mxu0 %v168_v9 }
   0xb   :  { %v24_v17 = vmax.f32 %v22_v12, %v23_v15  ;;  %v31_v18 = vmax.f32 %v29_v13, %v30_v16 }
   0xd   :  { %v25_v20 = vrot.slane %v24_v17, 1  ;;  %v32_v21 = vrot.slane %v31_v18, 1 }
   0xe   :  { %115 = vmatpush.bf16.msra.mxu0 %v167_v14 }
   0xf   :  { %v26_v22 = vmax.f32 %v24_v17, %v25_v20  ;;  %v33_v23 = vmax.f32 %v31_v18, %v32_v21 }
  0x11   :  { %v34_v25 = vpack.c.bf16 %v26_v22, %v26_v22  ;;  %v35_v26 = vpack.c.bf16 %v33_v23, %v33_v23 }
  0x12   :  { %116 = vmatpush.bf16.msra.mxu0 %v166_v19 }
  0x13   :  { %v58_v28 = vunpack.c.l.b16 %v34_v25  ;;  %v59_v29 = vunpack.c.l.b16 %v35_v26 }
  0x15   :  { %v61_v31 = vsel %vm60_vm0, %v59_v29, %v58_v28 }
  0x16   :  { %117 = vmatpush.bf16.msra.mxu0 %v165_v24  ;;  %v62_v32 = vpack.c.b16 %v61_v31, %v61_v31 }
  0x1a   :  { %118 = vmatpush.bf16.msra.mxu0 %v164_v27 }
  0x1e   :  { %119 = vmatpush.bf16.msra.mxu0 %v163_v30 }
  0x21   :  { %120 = vmatmul.bf16.vlgmr.msra.gmra.mxu0 %v62_v32 }
  0x9e   :  { %v121_v34 = vpop.f32.mrf.mxu0 }
  0x9f   :  { %v122_v35 = vadd.f32 %v171_v33, %v121_v34 }
  0xa1   :  { %126 = vst.msk [vmem:[%s237_s3] sm:$0x3] %vm125_vm1, %v122_v35 }
  0xa6   :  { %v123_v36 = vpop.f32.mrf.mxu0 }

// kernel: _lambda_.6
= control target key start
LH: loop header
LB: loop body
LE: loop exit
PB: predicated region body
PF: predicated region fallthrough
CT: control target
= control target key end

     0   :  { %vm325_vm0 = vcmask 261120   ;;  %vm372_vm2 = vcmask 130048   ;;  %s2824_s20 = smov 32   ;;  %s2825_s21 = smov 64   ;;  %s3825_s2 = inlined_call_operand.vmem [shape: bf16[2,128,128], index: 2, kind: input, shape index: {}]   ;;  %s3826_s4 = inlined_call_operand.vmem [shape: bf16[128,128], index: 4, kind: input, shape index: {}]   ;;  %s3827_s0 = inlined_call_operand.vmem [shape: f32[2,16,128], index: 0, kind: input, shape index: {}]   ;;  %s3828_s3 = inlined_call_operand.vmem [shape: f32[2,128], index: 3, kind: input, shape index: {}]   ;;  %s3829_s5 = inlined_call_operand.vmem [shape: f32[4,32], index: 5, kind: input, shape index: {}]   ;;  %s3830_s6 = inlined_call_operand.vmem [shape: f32[4,32], index: 6, kind: input, shape index: {}]   ;;  %s3831_s1 = inlined_call_operand.vmem [shape: f32[2,16,16], index: 1, kind: input, shape index: {}]   ;;  %s3832_s7 = inlined_call_operand.vmem [shape: f32[2,16,128], index: 7, kind: output, shape index: {}]  }
   0x1   :  { %v2578_v0 = vld [vmem:[%s3825_s2 + $0x38] sm:$0xff]  ;;  %v2577_v1 = vld [vmem:[%s3825_s2 + $0x30] sm:$0xff]  ;;  %v2576_v5 = vld [vmem:[%s3825_s2 + $0x28] sm:$0xff] }
   0x2   :  { %137 = vmatpush.bf16.msra.mxu0 %v2578_v0  ;;  %v2594_v2 = vld [vmem:[%s3826_s4 + $0x38] sm:$0xff]  ;;  %v2593_v4 = vld [vmem:[%s3826_s4 + $0x30] sm:$0xff]  ;;  %v2592_v7 = vld [vmem:[%s3826_s4 + $0x28] sm:$0xff] }
   0x3   :  { %v2586_v3 = vld [vmem:[%s3825_s2 + $0x78] sm:$0xff]  ;;  %282 = vmatpush.bf16.msra.mxu2 %v2594_v2  ;;  %v2585_v6 = vld [vmem:[%s3825_s2 + $0x70] sm:$0xff]  ;;  %v2575_v8 = vld [vmem:[%s3825_s2 + $0x20] sm:$0xff] }
   0x4   :  { %211 = vmatpush.bf16.msra.mxu1 %v2586_v3  ;;  %v2584_v9 = vld [vmem:[%s3825_s2 + $0x68] sm:$0xff]  ;;  %v2591_v10 = vld [vmem:[%s3826_s4 + $0x20] sm:$0xff]  ;;  %v2574_v11 = vld [vmem:[%s3825_s2 + $0x18] sm:$0xff] }
   0x5   :  { %v2583_v12 = vld [vmem:[%s3825_s2 + $0x60] sm:$0xff]  ;;  %v2590_v13 = vld [vmem:[%s3826_s4 + $0x18] sm:$0xff]  ;;  %v2573_v14 = vld [vmem:[%s3825_s2 + $0x10] sm:$0xff] }
   0x6   :  { %138 = vmatpush.bf16.msra.mxu0 %v2577_v1  ;;  %v2589_v15 = vld [vmem:[%s3826_s4 + $0x10] sm:$0xff]  ;;  %v2572_v16 = vld [vmem:[%s3825_s2 + $0x8] sm:$0xff]  ;;  %v2571_v18 = vld [vmem:[%s3825_s2] sm:$0xff] }
   0x7   :  { %283 = vmatpush.bf16.msra.mxu2 %v2593_v4  ;;  %v2588_v17 = vld [vmem:[%s3826_s4 + $0x8] sm:$0xff]  ;;  %v2926_v19 = vld [vmem:[%s3827_s0] sm:$0xff]  ;;  %v2582_v23 = vld [vmem:[%s3825_s2 + $0x58] sm:$0xff] }
   0x8   :  { %212 = vmatpush.bf16.msra.mxu1 %v2585_v6  ;;  %v2931_v20 = vld [vmem:[%s3827_s0 + $0x8] sm:$0xff]  ;;  %v2587_v22 = vld [vmem:[%s3826_s4] sm:$0xff]  ;;  %v2581_v24 = vld [vmem:[%s3825_s2 + $0x50] sm:$0xff] }
   0x9   :  { %v86_v21 = vpack.c.bf16 %v2931_v20, %v2926_v19  ;;  %v2580_v25 = vld [vmem:[%s3825_s2 + $0x48] sm:$0xff]  ;;  %v2579_v26 = vld [vmem:[%s3825_s2 + $0x40] sm:$0xff] }
   0xa   :  { %139 = vmatpush.bf16.msra.mxu0 %v2576_v5  ;;  %v63_v27 = vld [vmem:[%s3828_s3] sm:$0x3]  ;;  %s2823_s3 = smov 96   ;;  %v28_v4 = vld [vmem:[%s3831_s1 + $0x8] sm:$0xff] }
   0xb   :  { %284 = vmatpush.bf16.msra.mxu2 %v2592_v7  ;;  %v2953_v29 = vperm.slane %v63_v27, 0  ;;  %v2958_v30 = vld [vmem:[%s3829_s5] sm:$0xf]  ;;  %v2977_v45 = vperm.slane %v63_v27, 1 }
   0xc   :  { %213 = vmatpush.bf16.msra.mxu1 %v2584_v9  ;;  %v2961_v31 = vperm.slane %v2958_v30, 0  ;;  %v2993_v53 = vld [vmem:[%s3830_s6] sm:$0xf] }
   0xd   :  { %v27_v60 = vld [vmem:[%s3831_s1] sm:$0xff] }
   0xe   :  { %140 = vmatpush.bf16.msra.mxu0 %v2575_v8 }
   0xf   :  { %285 = vmatpush.bf16.msra.mxu2 %v2591_v10 }
  0x10   :  { %214 = vmatpush.bf16.msra.mxu1 %v2583_v12 }
  0x12   :  { %141 = vmatpush.bf16.msra.mxu0 %v2574_v11 }
  0x13   :  { %286 = vmatpush.bf16.msra.mxu2 %v2590_v13  ;;  %v84_v13 = vld [vmem:[%s3827_s0 + $0x10] sm:$0xff] }
  0x14   :  { %215 = vmatpush.bf16.msra.mxu1 %v2582_v23 }
  0x16   :  { %142 = vmatpush.bf16.msra.mxu0 %v2573_v14  ;;  %v85_v14 = vld [vmem:[%s3827_s0 + $0x18] sm:$0xff] }
  0x17   :  { %287 = vmatpush.bf16.msra.mxu2 %v2589_v15  ;;  %v87_v15 = vpack.c.bf16 %v85_v14, %v84_v13 }
  0x18   :  { %216 = vmatpush.bf16.msra.mxu1 %v2581_v24 }
  0x1a   :  { %143 = vmatpush.bf16.msra.mxu0 %v2572_v16 }
  0x1b   :  { %288 = vmatpush.bf16.msra.mxu2 %v2588_v17 }
  0x1c   :  { %217 = vmatpush.bf16.msra.mxu1 %v2580_v25 }
  0x1e   :  { %144 = vmatpush.bf16.msra.mxu0 %v2571_v18 }
  0x1f   :  { %289 = vmatpush.bf16.msra.mxu2 %v2587_v22 }
  0x20   :  { %218 = vmatpush.bf16.msra.mxu1 %v2579_v26 }
  0x21   :  { %145 = vmatmul.bf16.vlgmr.msra.gmra.mxu0 %v86_v21 }
  0x22   :  { %290 = vmatmul.bf16.vlgmr.msra.gmra.mxu2 %v86_v21 }
  0x31   :  { %150 = vmatmul.bf16.gmra.mxu0 %v87_v15 }
  0x32   :  { %295 = vmatmul.bf16.gmra.mxu2 %v87_v15 }
  0x9e   :  { %v146_v28 = vpop.f32.mrf.mxu0 }
  0x9f   :  { %v147_v32 = vadd.f32 %v146_v28, %v2953_v29 }
  0xa1   :  { %v156_v37 = vmax.f32 %v147_v32, 0.0  ;;  %v430_v32 = vperm.slane %v2958_v30, 1 }
  0xa5   :  { %v2965_v35 = vpop.f32.mrf.mxu2 }
  0xa6   :  { %v148_v33 = vpop.f32.mrf.mxu0  ;;  %v323_v36 = vmul.f32 %v2961_v31, %v2965_v35 }
  0xa7   :  { %v149_v34 = vadd.f32 %v148_v33, %v2953_v29 }
  0xa8   :  { %v326_v39 = vsel %vm325_vm0, %v323_v36, 0.0 }
  0xa9   :  { %v157_v38 = vmax.f32 %v149_v34, 0.0  ;;  %327 = vadd.xlane.f32.xlu0 %v326_v39 }
  0xab   :  { %v160_v40 = vpack.c.bf16 %v157_v38, %v156_v37 }
  0xad   :  { %219 = vmatmul.bf16.vlgmr.msra.gmra.mxu1 %v160_v40  ;;  %v2970_v41 = vpop.f32.mrf.mxu2 }
  0xae   :  { %v324_v42 = vmul.f32 %v2961_v31, %v2970_v41  ;;  %v2985_v52 = vpack.c.bf16 %v2970_v41, %v2965_v35 }
  0xb0   :  { %v329_v43 = vsel %vm325_vm0, %v324_v42, 0.0 }
  0xb1   :  { %330 = vadd.xlane.f32.xlu0 %v329_v43 }
  0xc5   :  { %454 = vrot.lane.b32.xlu0 %v2970_v41, %s2823_s3 }
 0x11c   :  { %v328_v54 = vpop.xlane.xlu0 %327 }
 0x124   :  { %v331_v55 = vpop.xlane.xlu0 %330 }
 0x12a   :  { %v220_v44 = vpop.f32.mrf.mxu1 }
 0x12b   :  { %v221_v46 = vadd.f32 %v220_v44, %v2977_v45 }
 0x12d   :  { %v230_v49 = vmax.f32 %v221_v46, 0.0  ;;  %v3039_v46 = vrot.slane %v2993_v53, 1 }
 0x132   :  { %v222_v47 = vpop.f32.mrf.mxu1 }
 0x133   :  { %v223_v48 = vadd.f32 %v222_v47, %v2977_v45 }
 0x135   :  { %v231_v50 = vmax.f32 %v223_v48, 0.0 }
 0x137   :  { %v301_v51 = vpack.c.bf16 %v231_v50, %v230_v49  ;;  %v455_v56 = vpop.permute.xlu0 %454 }
 0x139   :  { %309 = vmatpush.bf16.xpose.msra.mxu3 %v301_v51 }
 0x140   :  { %310 = vmatmul.bf16.vlgmr.msra.gmra.mxu3 %v301_v51 }
 0x141   :  { %2475 = vmatpush.xpose.msk.msrb.mxu3 %vm325_vm0, %v2970_v41 }
 0x145   :  { %2476 = vmatpush.xpose.msk.msrb.mxu3 %vm325_vm0, %v2965_v35 }
 0x149   :  { %407 = vmatpush.bf16.msra.mxu3 %v2985_v52 }
 0x150   :  { %2477 = vmatmul.msk.f32.vlgmr.msrb.gmra.mxu3 %vm325_vm0, %v2993_v53 }
 0x151   :  { %2481 = vmatpush.xpose.msk.msrb.mxu3 %vm325_vm0, %v455_v56 }
 0x1c3   :  { %v311_v57 = vpop.f32.mrf.mxu3 }
 0x1c4   :  { %v316_v59 = vmul.f32 0.088388346, %v311_v57 }
 0x1c6   :  { %v3001_v63 = vadd.f32 %v316_v59, %v27_v60 }
 0x1c8   :  { %vm320_vm3 = vcmp.gt.f32.partialorder %v3001_v63, 0.0 }
 0x1cb   :  { %v313_v58 = vpop.f32.mrf.mxu3 }
 0x1cc   :  { %v317_v2 = vmul.f32 0.088388346, %v313_v58 }
 0x1ce   :  { %v3009_v8 = vadd.f32 %v317_v2, %v28_v4 }
 0x1d0   :  { %vm321_vm5 = vcmp.gt.f32.partialorder %v3009_v8, 0.0  ;;  %v29_v8 = vld [vmem:[%s3831_s1 + $0x10] sm:$0xff] }
 0x1d3   :  { %v358_v61 = vpop.f32.mrf.mxu3 }
 0x1d4   :  { %v361_v62 = vperm.slane %v358_v61, 0 }
 0x1d6   :  { %v362_v0 = vadd.f32 %v361_v62, %v328_v54  ;;  %v363_v1 = vadd.f32 %v361_v62, %v331_v55 }
 0x1d8   :  { %vm364_vm1 = vcmp.gt.f32.partialorder %v362_v0, 0.0  ;;  %v366_v3 = vmul.f32 0.2, %v362_v0  ;;  %v367_v6 = vmul.f32 0.2, %v363_v1  ;;  %vm365_vm4 = vcmp.gt.f32.partialorder %v363_v1, 0.0 }
 0x1da   :  { %v368_v5 = vsel %vm364_vm1, %v362_v0, %v366_v3  ;;  %v369_v10 = vsel %vm365_vm4, %v363_v1, %v367_v6 }
 0x1db   :  { %v370_v7 = vsel %vm320_vm3, %v368_v5, -1e+09  ;;  %v371_v11 = vsel %vm321_vm5, %v369_v10, -1e+09 }
 0x1dc   :  { %v373_v9 = vsel %vm372_vm2, %v370_v7, -inf  ;;  %v376_v12 = vsel %vm372_vm2, %v371_v11, -inf }
 0x1dd   :  { %374 = vmax.xlane.f32.xlu1 %v373_v9 }
 0x1e5   :  { %377 = vmax.xlane.f32.xlu1 %v376_v12 }
 0x1fe   :  { %452 = vrot.lane.b32.xlu1 %v2965_v35, %s2823_s3 }
 0x250   :  { %v375_v16 = vpop.xlane.xlu1 %374 }
 0x251   :  { %v379_v17 = vsub.f32 %v370_v7, %v375_v16 }
 0x253   :  { %v381_v18 = vmul.f32 1.442695, %v379_v17 }
 0x255   :  { %2598 = vpow2.f32 %v381_v18  ;;  %v562_v18 = vperm.slane %v2958_v30, 2 }
 0x258   :  { %v378_v21 = vpop.xlane.xlu1 %377 }
 0x259   :  { %v380_v22 = vsub.f32 %v371_v11, %v378_v21  ;;  %v693_v21 = vperm.slane %v2958_v30, 3 }
 0x25b   :  { %v2599_v23 = vpop.eup %2598  ;;  %v383_v24 = vmul.f32 1.442695, %v380_v22 }
 0x25c   :  { %v385_v25 = vsel %vm372_vm2, %v2599_v23, 0.0 }
 0x25d   :  { %2600 = vpow2.f32 %v383_v24  ;;  %386 = vadd.xlane.f32.xlu2 %v385_v25  ;;  %v151_v24 = vpop.f32.mrf.mxu0 }
 0x25e   :  { %v152_v25 = vadd.f32 %v151_v24, %v2953_v29 }
 0x263   :  { %v2601_v26 = vpop.eup %2600 }
 0x264   :  { %v388_v27 = vsel %vm372_vm2, %v2601_v26, 0.0 }
 0x265   :  { %389 = vadd.xlane.f32.xlu2 %v388_v27  ;;  %v158_v27 = vmax.f32 %v152_v25, 0.0 }
 0x270   :  { %v453_v28 = vpop.permute.xlu1 %452 }
 0x271   :  { %2482 = vmatpush.xpose.msk.msrb.mxu3 %vm325_vm0, %v453_v28 }
 0x27d   :  { %432 = vrot.lane.b32.xlu2 %v430_v32, %s2824_s20 }
 0x2d0   :  { %v387_v33 = vpop.xlane.xlu2 %386 }
 0x2d1   :  { %2602 = vrcp.f32 %v387_v33 }
 0x2d7   :  { %v2603_v36 = vpop.eup %2602 }
 0x2d8   :  { %v390_v34 = vpop.xlane.xlu2 %389  ;;  %v393_v38 = vmul.f32 %v2603_v36, %v2599_v23 }
 0x2d9   :  { %2604 = vrcp.f32 %v390_v34 }
 0x2df   :  { %v2605_v37 = vpop.eup %2604 }
 0x2e0   :  { %v394_v39 = vmul.f32 %v2605_v37, %v2601_v26  ;;  %v3029_v40 = vpop.permute.xlu2 %432  ;;  %v153_v26 = vpop.f32.mrf.mxu0 }
 0x2e1   :  { %v436_v42 = vmul.f32 %v3029_v40, %v2970_v41  ;;  %v435_v43 = vmul.f32 %v3029_v40, %v2965_v35  ;;  %v154_v28 = vadd.f32 %v153_v26, %v2953_v29 }
 0x2e2   :  { %v395_v44 = vpack.c.bf16 %v394_v39, %v393_v38  ;;  %v3075_v39 = vpop.f32.mrf.mxu2 }
 0x2e3   :  { %441 = vrot.lane.b32.xlu2 %v436_v42, %s2823_s3  ;;  %439 = vrot.lane.b32.xlu0 %v435_v43, %s2823_s3  ;;  %v159_v32 = vmax.f32 %v154_v28, 0.0 }
 0x2e4   :  { %2478 = vmatmul.msk.bf16.vlgmr.msra.gmra.mxu3 %vm372_vm2, %v395_v44 }
 0x2e5   :  { %v161_v34 = vpack.c.bf16 %v159_v32, %v158_v27 }
 0x2e7   :  { %224 = vmatmul.bf16.gmra.mxu1 %v161_v34 }
 0x2ea   :  { %v3077_v44 = vpop.f32.mrf.mxu2 }
 0x2f4   :  { %2483 = vmatmul.msk.f32.vlgmr.msrb.gmra.mxu3 %vm325_vm0, %v3039_v46 }
 0x33d   :  { %v442_v47 = vpop.permute.xlu2 %441 }
 0x33e   :  { %v448_v48 = vsel %vm325_vm0, %v442_v47, 0.0 }
 0x33f   :  { %449 = vadd.xlane.f32.xlu0 %v448_v48 }
 0x353   :  { %717 = vrot.lane.b32.xlu0 %v2970_v41, %s2824_s20 }
 0x355   :  { %v440_v49 = vpop.permute.xlu0 %439 }
 0x356   :  { %v445_v50 = vsel %vm325_vm0, %v440_v49, 0.0 }
 0x357   :  { %446 = vadd.xlane.f32.xlu1 %v445_v50 }
 0x35b   :  { %584 = vrot.lane.b32.xlu0 %v2965_v35, %s2825_s21 }
 0x367   :  { %v409_v51 = vpop.f32.mrf.mxu3 }
 0x368   :  { %v416_v54 = vmin.f32 %v409_v51, 0.0  ;;  %vm414_vm6 = vcmp.gt.f32.partialorder %v409_v51, 0.0 }
 0x36a   :  { %v418_v55 = vmul.f32 1.442695, %v416_v54 }
 0x36c   :  { %2606 = vpow2.f32 %v418_v55 }
 0x36f   :  { %v411_v56 = vpop.f32.mrf.mxu3 }
 0x370   :  { %v417_v57 = vmin.f32 %v411_v56, 0.0  ;;  %586 = vrot.lane.b32.xlu1 %v2970_v41, %s2825_s21  ;;  %vm415_vm7 = vcmp.gt.f32.partialorder %v411_v56, 0.0 }
 0x372   :  { %v2607_v58 = vpop.eup %2606  ;;  %v420_v59 = vmul.f32 1.442695, %v417_v57 }
 0x373   :  { %v2479_v60 = vadd.f32 -1.0, %v2607_v58 }
 0x374   :  { %2608 = vpow2.f32 %v420_v59 }
 0x375   :  { %v424_v61 = vsel %vm414_vm6, %v409_v51, %v2479_v60  ;;  %v3102_v60 = vrot.slane %v2993_v53, 2 }
 0x376   :  { %v426_v62 = vadd.f32 %v424_v61, %v2926_v19  ;;  %v3105_v61 = vrot.slane %v2993_v53, 3 }
 0x377   :  { %v479_v4 = vpop.f32.mrf.mxu3 }
 0x378   :  { %428 = vst.msk [vmem:[#allocation2] sm:$0xff] %vm325_vm0, %v426_v62  ;;  %v482_v5 = vperm.slane %v479_v4, 0 }
 0x37a   :  { %v2609_v0 = vpop.eup %2608 }
 0x37b   :  { %v2480_v1 = vadd.f32 -1.0, %v2609_v0 }
 0x37d   :  { %v425_v2 = vsel %vm415_vm7, %v411_v56, %v2480_v1 }
 0x37e   :  { %v427_v3 = vadd.f32 %v425_v2, %v2931_v20 }
 0x380   :  { %429 = vst.msk [vmem:[#allocation2 + $0x8] sm:$0xff] %vm325_vm0, %v427_v3 }
 0x3b2   :  { %v450_v6 = vpop.xlane.xlu0 %449 }
 0x3b3   :  { %v484_v7 = vadd.f32 %v482_v5, %v450_v6 }
 0x3b5   :  { %v488_v9 = vmul.f32 0.2, %v484_v7  ;;  %vm486_vm8 = vcmp.gt.f32.partialorder %v484_v7, 0.0 }
 0x3b7   :  { %v490_v10 = vsel %vm486_vm8, %v484_v7, %v488_v9 }
 0x3b8   :  { %v492_v19 = vsel %vm321_vm5, %v490_v10, -1e+09 }
 0x3b9   :  { %v496_v11 = vsel %vm372_vm2, %v492_v19, -inf }
 0x3ba   :  { %497 = vmax.xlane.f32.xlu1 %v496_v11 }
 0x3c5   :  { %v718_v12 = vpop.permute.xlu0 %717 }
 0x3c6   :  { %2493 = vmatpush.xpose.msk.msrb.mxu2 %vm325_vm0, %v718_v12 }
 0x3ca   :  { %v447_v13 = vpop.xlane.xlu1 %446 }
 0x3cb   :  { %v483_v20 = vadd.f32 %v482_v5, %v447_v13 }
 0x3cd   :  { %v487_v14 = vmul.f32 0.2, %v483_v20  ;;  %vm485_vm9 = vcmp.gt.f32.partialorder %v483_v20, 0.0  ;;  %v585_v23 = vpop.permute.xlu0 %584 }
 0x3cf   :  { %v489_v15 = vsel %vm485_vm9, %v483_v20, %v487_v14 }
 0x3d0   :  { %v491_v16 = vsel %vm320_vm3, %v489_v15, -1e+09 }
 0x3d1   :  { %v493_v17 = vsel %vm372_vm2, %v491_v16, -inf }
 0x3d2   :  { %494 = vmax.xlane.f32.xlu2 %v493_v17 }
 0x3d3   :  { %517 = vrot.lane.b32.xlu1 %v2985_v52, %s2823_s3 }
 0x3db   :  { %564 = vrot.lane.b32.xlu1 %v562_v18, %s2825_s21 }
 0x3e2   :  { %v587_v22 = vpop.permute.xlu1 %586 }
 0x3e3   :  { %695 = vrot.lane.b32.xlu1 %v693_v21, %s2823_s3  ;;  %2487 = vmatpush.xpose.msk.msrb.mxu0 %vm325_vm0, %v587_v22  ;;  %v846_v22 = vmul.f32 %v2961_v31, %v3077_v44 }
 0x3e7   :  { %2488 = vmatpush.xpose.msk.msrb.mxu0 %vm325_vm0, %v585_v23  ;;  %v850_v23 = vsel %vm325_vm0, %v846_v22, 0.0 }
 0x3ea   :  { %715 = vrot.lane.b32.xlu2 %v2965_v35, %s2824_s20  ;;  %2489 = vmatmul.msk.f32.vlgmr.msrb.gmra.mxu0 %vm325_vm0, %v3102_v60 }
 0x42d   :  { %v498_v30 = vpop.xlane.xlu1 %497 }
 0x42e   :  { %v500_v33 = vsub.f32 %v492_v19, %v498_v30 }
 0x430   :  { %v503_v36 = vmul.f32 1.442695, %v500_v33 }
 0x432   :  { %2610 = vpow2.f32 %v503_v36 }
 0x438   :  { %v2611_v37 = vpop.eup %2610 }
 0x439   :  { %v508_v38 = vsel %vm372_vm2, %v2611_v37, 0.0 }
 0x43a   :  { %509 = vadd.xlane.f32.xlu0 %v508_v38 }
 0x445   :  { %v495_v42 = vpop.xlane.xlu2 %494  ;;  %v518_v43 = vpop.permute.xlu1 %517 }
 0x446   :  { %v499_v47 = vsub.f32 %v491_v16, %v495_v42  ;;  %530 = vmatpush.bf16.msra.mxu3 %v518_v43  ;;  %v845_v16 = vmul.f32 %v2961_v31, %v3075_v39 }
 0x448   :  { %v501_v48 = vmul.f32 1.442695, %v499_v47  ;;  %v847_v21 = vsel %vm325_vm0, %v845_v16, 0.0 }
 0x44a   :  { %2499 = vmatpush.xpose.msk.msrb.mxu3 %vm325_vm0, %v3077_v44  ;;  %2612 = vpow2.f32 %v501_v48 }
 0x44d   :  { %v716_v49 = vpop.permute.xlu2 %715  ;;  %v3083_v50 = vpop.permute.xlu1 %564 }
 0x44e   :  { %2500 = vmatpush.xpose.msk.msrb.mxu3 %vm325_vm0, %v3075_v39  ;;  %2494 = vmatpush.xpose.msk.msrb.mxu2 %vm325_vm0, %v716_v49  ;;  %v567_v51 = vmul.f32 %v3083_v50, %v2965_v35  ;;  %v568_v57 = vmul.f32 %v3083_v50, %v2970_v41 }
 0x450   :  { %v2613_v54 = vpop.eup %2612  ;;  %571 = vrot.lane.b32.xlu1 %v567_v51, %s2825_s21 }
 0x451   :  { %v505_v55 = vsel %vm372_vm2, %v2613_v54, 0.0  ;;  %2495 = vmatmul.msk.f32.vlgmr.msrb.gmra.mxu2 %vm325_vm0, %v3105_v61 }
 0x452   :  { %506 = vadd.xlane.f32.xlu2 %v505_v55 }
 0x455   :  { %v3090_v56 = vpop.permute.xlu1 %695 }
 0x456   :  { %v699_v58 = vmul.f32 %v3090_v56, %v2970_v41  ;;  %v698_v59 = vmul.f32 %v3090_v56, %v2965_v35  ;;  %v225_v41 = vpop.f32.mrf.mxu1 }
 0x457   :  { %v226_v62 = vadd.f32 %v225_v41, %v2977_v45 }
 0x458   :  { %573 = vrot.lane.b32.xlu1 %v568_v57, %s2825_s21  ;;  %704 = vrot.lane.b32.xlu0 %v699_v58, %s2824_s20 }
 0x459   :  { %v232_v1 = vmax.f32 %v226_v62, 0.0 }
 0x45e   :  { %v227_v0 = vpop.f32.mrf.mxu1 }
 0x45f   :  { %v228_v35 = vadd.f32 %v227_v0, %v2977_v45 }
 0x461   :  { %v233_v2 = vmax.f32 %v228_v35, 0.0 }
 0x463   :  { %v824_v3 = vpack.c.bf16 %v233_v2, %v232_v1 }
 0x465   :  { %832 = vmatpush.bf16.xpose.msra.mxu2 %v824_v3 }
 0x467   :  { %v611_v24 = vpop.f32.mrf.mxu0 }
 0x468   :  { %v614_v25 = vperm.slane %v611_v24, 0 }
 0x46a   :  { %702 = vrot.lane.b32.xlu2 %v698_v59, %s2824_s20 }
 0x46c   :  { %833 = vmatmul.bf16.vlgmr.msra.gmra.mxu2 %v824_v3 }
 0x4ad   :  { %v510_v4 = vpop.xlane.xlu0 %509 }
 0x4ae   :  { %2614 = vrcp.f32 %v510_v4 }
 0x4b4   :  { %v2615_v9 = vpop.eup %2614 }
 0x4b5   :  { %v514_v20 = vmul.f32 %v2615_v9, %v2611_v37 }
 0x4c2   :  { %v572_v5 = vpop.permute.xlu1 %571 }
 0x4c3   :  { %v577_v6 = vsel %vm325_vm0, %v572_v5, 0.0 }
 0x4c4   :  { %578 = vadd.xlane.f32.xlu1 %v577_v6 }
 0x4c5   :  { %v507_v7 = vpop.xlane.xlu2 %506 }
 0x4c6   :  { %2616 = vrcp.f32 %v507_v7 }
 0x4ca   :  { %v705_v10 = vpop.permute.xlu0 %704  ;;  %v574_v19 = vpop.permute.xlu1 %573 }
 0x4cb   :  { %v711_v11 = vsel %vm325_vm0, %v705_v10, 0.0  ;;  %v580_v12 = vsel %vm325_vm0, %v574_v19, 0.0 }
 0x4cc   :  { %v2617_v13 = vpop.eup %2616  ;;  %712 = vadd.xlane.f32.xlu1 %v711_v11  ;;  %581 = vadd.xlane.f32.xlu0 %v580_v12 }
 0x4cd   :  { %v513_v14 = vmul.f32 %v2617_v13, %v2613_v54  ;;  %v703_v15 = vpop.permute.xlu2 %702 }
 0x4ce   :  { %v708_v17 = vsel %vm325_vm0, %v703_v15, 0.0 }
 0x4cf   :  { %v515_v18 = vpack.c.bf16 %v514_v20, %v513_v14  ;;  %709 = vadd.xlane.f32.xlu2 %v708_v17 }
 0x4d1   :  { %2484 = vmatmul.msk.bf16.vlgmr.msra.gmra.mxu3 %vm372_vm2, %v515_v18 }
 0x4d4   :  { %848 = vadd.xlane.f32.xlu1 %v847_v21  ;;  %v742_v28 = vpop.f32.mrf.mxu2 }
 0x4d5   :  { %v745_v30 = vperm.slane %v742_v28, 0 }
 0x4dc   :  { %851 = vadd.xlane.f32.xlu1 %v850_v23 }
 0x4e0   :  { %965 = vrot.lane.b32.xlu0 %v3077_v44, %s2823_s3 }
 0x4e1   :  { %2501 = vmatmul.msk.f32.vlgmr.msrb.gmra.mxu3 %vm325_vm0, %v2993_v53 }
 0x4e8   :  { %779 = vrot.lane.b32.xlu0 %v2985_v52, %s2824_s20 }
 0x4ef   :  { %v834_v63 = vpop.f32.mrf.mxu2 }
 0x4f0   :  { %v839_v5 = vmul.f32 0.088388346, %v834_v63 }
 0x4f2   :  { %v3152_v10 = vadd.f32 %v839_v5, %v29_v8 }
 0x4f4   :  { %vm843_vm14 = vcmp.gt.f32.partialorder %v3152_v10, 0.0 }
 0x537   :  { %v579_v26 = vpop.xlane.xlu1 %578 }
 0x538   :  { %v615_v27 = vadd.f32 %v614_v25, %v579_v26 }
 0x53a   :  { %v619_v32 = vmul.f32 0.2, %v615_v27  ;;  %vm617_vm10 = vcmp.gt.f32.partialorder %v615_v27, 0.0 }
 0x53c   :  { %v621_v33 = vsel %vm617_vm10, %v615_v27, %v619_v32 }
 0x53d   :  { %v623_v34 = vsel %vm320_vm3, %v621_v33, -1e+09 }
 0x53e   :  { %v625_v36 = vsel %vm372_vm2, %v623_v34, -inf }
 0x53f   :  { %v582_v37 = vpop.xlane.xlu0 %581  ;;  %626 = vmax.xlane.f32.xlu2 %v625_v36  ;;  %v713_v53 = vpop.xlane.xlu1 %712 }
 0x540   :  { %v616_v38 = vadd.f32 %v614_v25, %v582_v37  ;;  %v747_v42 = vadd.f32 %v745_v30, %v713_v53 }
 0x542   :  { %v620_v43 = vmul.f32 0.2, %v616_v38  ;;  %v710_v47 = vpop.xlane.xlu2 %709  ;;  %vm618_vm11 = vcmp.gt.f32.partialorder %v616_v38, 0.0  ;;  %v751_v49 = vmul.f32 0.2, %v747_v42  ;;  %vm749_vm13 = vcmp.gt.f32.partialorder %v747_v42, 0.0 }
 0x543   :  { %v746_v48 = vadd.f32 %v745_v30, %v710_v47  ;;  %v948_v47 = vmul.f32 %v3029_v40, %v3077_v44 }
 0x544   :  { %v622_v51 = vsel %vm618_vm11, %v616_v38, %v620_v43  ;;  %v753_v41 = vsel %vm749_vm13, %v747_v42, %v751_v49  ;;  %v947_v43 = vmul.f32 %v3029_v40, %v3075_v39 }
 0x545   :  { %v750_v54 = vmul.f32 0.2, %v746_v48  ;;  %v624_v55 = vsel %vm321_vm5, %v622_v51, -1e+09  ;;  %vm748_vm12 = vcmp.gt.f32.partialorder %v746_v48, 0.0 }
 0x546   :  { %v628_v57 = vsel %vm372_vm2, %v624_v55, -inf  ;;  %v755_v0 = vsel %vm321_vm5, %v753_v41, -1e+09 }
 0x547   :  { %629 = vmax.xlane.f32.xlu1 %v628_v57  ;;  %v752_v58 = vsel %vm748_vm12, %v746_v48, %v750_v54  ;;  %v759_v1 = vsel %vm372_vm2, %v755_v0, -inf  ;;  %v849_v7 = vpop.xlane.xlu1 %848  ;;  %v836_v48 = vpop.f32.mrf.mxu2  ;;  %v30_v54 = vld [vmem:[%s3831_s1 + $0x18] sm:$0xff] }
 0x548   :  { %v754_v59 = vsel %vm320_vm3, %v752_v58, -1e+09  ;;  %v840_v49 = vmul.f32 0.088388346, %v836_v48 }
 0x549   :  { %v756_v62 = vsel %vm372_vm2, %v754_v59, -inf }
 0x54a   :  { %757 = vmax.xlane.f32.xlu2 %v756_v62 }
 0x54f   :  { %760 = vmax.xlane.f32.xlu1 %v759_v1  ;;  %v852_v14 = vpop.xlane.xlu1 %851 }
 0x552   :  { %v966_v35 = vpop.permute.xlu0 %965 }
 0x553   :  { %2505 = vmatpush.xpose.msk.msra.mxu3 %vm325_vm0, %v966_v35 }
 0x554   :  { %v3143_v2 = vpop.f32.mrf.mxu3 }
 0x555   :  { %vm537_vm8 = vcmp.gt.f32.partialorder %v3143_v2, 0.0 }
 0x55a   :  { %v780_v3 = vpop.permute.xlu0 %779 }
 0x55b   :  { %792 = vmatpush.bf16.msra.mxu0 %v780_v3 }
 0x55c   :  { %v3145_v4 = vpop.f32.mrf.mxu3 }
 0x55d   :  { %vm538_vm7 = vcmp.gt.f32.partialorder %v3145_v4, 0.0 }
 0x562   :  { %963 = vrot.lane.b32.xlu2 %v3075_v39, %s2823_s3 }
 0x564   :  { %v876_v6 = vpop.f32.mrf.mxu3 }
 0x565   :  { %v879_v9 = vperm.slane %v876_v6, 0 }
 0x567   :  { %v880_v19 = vadd.f32 %v879_v9, %v849_v7  ;;  %v881_v51 = vadd.f32 %v879_v9, %v852_v14 }
 0x569   :  { %v884_v11 = vmul.f32 0.2, %v880_v19  ;;  %vm882_vm15 = vcmp.gt.f32.partialorder %v880_v19, 0.0  ;;  %vm883_vm1 = vcmp.gt.f32.partialorder %v881_v51, 0.0 }
 0x56b   :  { %v886_v12 = vsel %vm882_vm15, %v880_v19, %v884_v11  ;;  %vm559_vm15 = vcmask 523520  }
 0x56c   :  { %v3157_v13 = vsel %vm843_vm14, %v886_v12, -1e+09 }
 0x56d   :  { %v890_v20 = vsel %vm372_vm2, %v3157_v13, -inf }
 0x56e   :  { %891 = vmax.xlane.f32.xlu0 %v890_v20 }
 0x582   :  { %1208 = vrot.lane.b32.xlu0 %v3075_v39, %s2824_s20 }
 0x5b2   :  { %v627_v15 = vpop.xlane.xlu2 %626 }
 0x5b3   :  { %v631_v16 = vsub.f32 %v623_v34, %v627_v15 }
 0x5b5   :  { %v633_v17 = vmul.f32 1.442695, %v631_v16 }
 0x5b7   :  { %2618 = vpow2.f32 %v633_v17 }
 0x5ba   :  { %v630_v18 = vpop.xlane.xlu1 %629 }
 0x5bb   :  { %v632_v21 = vsub.f32 %v624_v55, %v630_v18  ;;  %v3188_v55 = vadd.f32 %v840_v49, %v30_v54  ;;  %v3203_v18 = vpack.c.bf16 %v3077_v44, %v3075_v39 }
 0x5bd   :  { %v3163_v22 = vpop.eup %2618  ;;  %v635_v23 = vmul.f32 1.442695, %v632_v21  ;;  %v758_v24 = vpop.xlane.xlu2 %757  ;;  %vm844_vm3 = vcmp.gt.f32.partialorder %v3188_v55, 0.0 }
 0x5be   :  { %v762_v25 = vsub.f32 %v754_v59, %v758_v24  ;;  %v637_v26 = vsel %vm372_vm2, %v3163_v22, 0.0  ;;  %v1070_v24 = vmul.f32 %v3083_v50, %v3075_v39 }
 0x5bf   :  { %2620 = vpow2.f32 %v635_v23  ;;  %638 = vadd.xlane.f32.xlu1 %v637_v26 }
 0x5c0   :  { %v764_v27 = vmul.f32 1.442695, %v762_v25 }
 0x5c2   :  { %2622 = vpow2.f32 %v764_v27  ;;  %v761_v28 = vpop.xlane.xlu1 %760 }
 0x5c3   :  { %v763_v32 = vsub.f32 %v755_v0, %v761_v28 }
 0x5c5   :  { %v2621_v30 = vpop.eup %2620  ;;  %v766_v33 = vmul.f32 1.442695, %v763_v32  ;;  %v964_v34 = vpop.permute.xlu2 %963 }
 0x5c6   :  { %2506 = vmatpush.xpose.msk.msra.mxu3 %vm325_vm0, %v964_v34  ;;  %v640_v36 = vsel %vm372_vm2, %v2621_v30, 0.0 }
 0x5c7   :  { %2624 = vpow2.f32 %v766_v33  ;;  %641 = vadd.xlane.f32.xlu1 %v640_v36  ;;  %v1071_v33 = vmul.f32 %v3083_v50, %v3077_v44 }
 0x5c8   :  { %v2623_v37 = vpop.eup %2622 }
 0x5c9   :  { %v768_v53 = vsel %vm372_vm2, %v2623_v37, 0.0  ;;  %2507 = vmatmul.msk.f32.vlgmr.msra.gmra.mxu3 %vm325_vm0, %v3039_v46 }
 0x5ca   :  { %769 = vadd.xlane.f32.xlu2 %v768_v53 }
 0x5cd   :  { %v2625_v38 = vpop.eup %2624 }
 0x5ce   :  { %v771_v42 = vsel %vm372_vm2, %v2625_v38, 0.0 }
 0x5cf   :  { %772 = vadd.xlane.f32.xlu1 %v771_v42 }
 0x5e1   :  { %v892_v15 = vpop.xlane.xlu0 %891 }
 0x5e2   :  { %951 = vrot.lane.b32.xlu2 %v947_v43, %s2823_s3 }
 0x5e8   :  { %648 = vrot.lane.b32.xlu1 %v2985_v52, %s2825_s21  ;;  %v885_v52 = vmul.f32 0.2, %v881_v51 }
 0x5ea   :  { %953 = vrot.lane.b32.xlu2 %v948_v47, %s2823_s3  ;;  %v887_v57 = vsel %vm883_vm1, %v881_v51, %v885_v52 }
 0x5eb   :  { %v889_v58 = vsel %vm844_vm3, %v887_v57, -1e+09 }
 0x5ec   :  { %v893_v59 = vsel %vm372_vm2, %v889_v58, -inf }
 0x5f2   :  { %1088 = vrot.lane.b32.xlu2 %v3077_v44, %s2825_s21 }
 0x5fa   :  { %1210 = vrot.lane.b32.xlu2 %v3077_v44, %s2824_s20 }
 0x612   :  { %894 = vmax.xlane.f32.xlu1 %v893_v59 }
 0x62b   :  { %1086 = vrot.lane.b32.xlu1 %v3075_v39, %s2825_s21 }
 0x632   :  { %v639_v41 = vpop.xlane.xlu1 %638 }
 0x63a   :  { %v642_v62 = vpop.xlane.xlu1 %641 }
 0x63d   :  { %v770_v0 = vpop.xlane.xlu2 %769 }
 0x63e   :  { %2626 = vrcp.f32 %v770_v0  ;;  %v1192_v0 = vmul.f32 %v3090_v56, %v3075_v39 }
 0x642   :  { %v773_v1 = vpop.xlane.xlu1 %772 }
 0x643   :  { %2628 = vrcp.f32 %v773_v1 }
 0x644   :  { %v2627_v63 = vpop.eup %2626  ;;  %2630 = vrcp.f32 %v642_v62  ;;  %v1193_v62 = vmul.f32 %v3090_v56, %v3077_v44 }
 0x645   :  { %v952_v35 = vpop.permute.xlu2 %951  ;;  %v776_v8 = vmul.f32 %v2627_v63, %v2623_v37  ;;  %2632 = vrcp.f32 %v639_v41  ;;  %v896_v37 = vsub.f32 %v3157_v13, %v892_v15 }
 0x646   :  { %v957_v3 = vsel %vm325_vm0, %v952_v35, 0.0 }
 0x647   :  { %958 = vadd.xlane.f32.xlu2 %v957_v3  ;;  %v898_v42 = vmul.f32 1.442695, %v896_v37  ;;  %v539_v37 = vmin.f32 %v3143_v2, 0.0 }
 0x649   :  { %v2629_v5 = vpop.eup %2628 }
 0x64a   :  { %v777_v6 = vmul.f32 %v2629_v5, %v2625_v38  ;;  %v2631_v11 = vpop.eup %2630 }
 0x64b   :  { %v2633_v20 = vpop.eup %2632  ;;  %v646_v14 = vmul.f32 %v2631_v11, %v2621_v30 }
 0x64c   :  { %v778_v7 = vpack.c.bf16 %v777_v6, %v776_v8  ;;  %v645_v16 = vmul.f32 %v2633_v20, %v3163_v22  ;;  %v1209_v22 = vpop.permute.xlu0 %1208  ;;  %v988_v34 = vpop.f32.mrf.mxu3 }
 0x64d   :  { %v954_v9 = vpop.permute.xlu2 %953  ;;  %v991_v36 = vperm.slane %v988_v34, 0  ;;  %v2793_v34 = vld [vmem:[%s3826_s4 + $0x20] sm:$0xff] }
 0x64e   :  { %2496 = vmatmul.msk.bf16.vlgmr.msra.gmra.mxu0 %vm372_vm2, %v778_v7  ;;  %v960_v19 = vsel %vm325_vm0, %v954_v9, 0.0  ;;  %v647_v21 = vpack.c.bf16 %v646_v14, %v645_v16 }
 0x64f   :  { %961 = vadd.xlane.f32.xlu0 %v960_v19 }
 0x655   :  { %v1089_v12 = vpop.permute.xlu2 %1088 }
 0x656   :  { %2511 = vmatpush.xpose.msk.msrb.mxu2 %vm325_vm0, %v1089_v12 }
 0x65a   :  { %v649_v17 = vpop.permute.xlu1 %648 }
 0x65b   :  { %661 = vmatpush.bf16.msrb.mxu1 %v649_v17 }
 0x65d   :  { %v1211_v23 = vpop.permute.xlu2 %1210 }
 0x65e   :  { %2490 = vmatmul.msk.bf16.vlgmr.msrb.gmra.mxu1 %vm372_vm2, %v647_v21 }
 0x65f   :  { %924 = vmatpush.bf16.msra.mxu1 %v3203_v18  ;;  %1074 = vrot.lane.b32.xlu2 %v1070_v24, %s2825_s21  ;;  %v540_v24 = vmin.f32 %v3145_v4, 0.0 }
 0x663   :  { %2517 = vmatpush.xpose.msk.msrb.mxu1 %vm325_vm0, %v1211_v23 }
 0x667   :  { %2518 = vmatpush.xpose.msk.msrb.mxu1 %vm325_vm0, %v1209_v22  ;;  %v2790_v22 = vld [vmem:[%s3826_s4 + $0x38] sm:$0xff] }
 0x685   :  { %v895_v25 = vpop.xlane.xlu1 %894 }
 0x686   :  { %v897_v26 = vsub.f32 %v889_v58, %v895_v25  ;;  %v543_v25 = vmul.f32 1.442695, %v540_v24 }
 0x688   :  { %v900_v27 = vmul.f32 1.442695, %v897_v26 }
 0x68a   :  { %2634 = vpow2.f32 %v900_v27  ;;  %v2791_v27 = vld [vmem:[%s3826_s4 + $0x30] sm:$0xff] }
 0x68b   :  { %2636 = vpow2.f32 %v898_v42 }
 0x690   :  { %v2635_v28 = vpop.eup %2634 }
 0x691   :  { %v905_v32 = vsel %vm372_vm2, %v2635_v28, 0.0  ;;  %v2637_v57 = vpop.eup %2636 }
 0x692   :  { %906 = vadd.xlane.f32.xlu0 %v905_v32  ;;  %v902_v41 = vsel %vm372_vm2, %v2637_v57, 0.0  ;;  %v2792_v32 = vld [vmem:[%s3826_s4 + $0x28] sm:$0xff] }
 0x69d   :  { %v1087_v30 = vpop.permute.xlu1 %1086 }
 0x69e   :  { %2512 = vmatpush.xpose.msk.msrb.mxu2 %vm325_vm0, %v1087_v30 }
 0x6a1   :  { %2513 = vmatmul.msk.f32.vlgmr.msrb.gmra.mxu2 %vm325_vm0, %v3102_v60 }
 0x6a6   :  { %1076 = vrot.lane.b32.xlu0 %v1071_v33, %s2825_s21 }
 0x6ba   :  { %v959_v53 = vpop.xlane.xlu2 %958 }
 0x6bb   :  { %v992_v38 = vadd.f32 %v991_v36, %v959_v53  ;;  %v2794_v53 = vld [vmem:[%s3826_s4 + $0x18] sm:$0xff] }
 0x6bd   :  { %v996_v43 = vmul.f32 0.2, %v992_v38  ;;  %vm994_vm4 = vcmp.gt.f32.partialorder %v992_v38, 0.0 }
 0x6bf   :  { %v998_v47 = vsel %vm994_vm4, %v992_v38, %v996_v43  ;;  %vm690_vm4 = vcmask 785920  }
 0x6c0   :  { %v1000_v48 = vsel %vm843_vm14, %v998_v47, -1e+09  ;;  %v541_v47 = vmul.f32 1.442695, %v539_v37  ;;  %v2800_v37 = vld [vmem:[%s3825_s2 + $0x28] sm:$0xff] }
 0x6c1   :  { %v1002_v49 = vsel %vm372_vm2, %v1000_v48, -inf }
 0x6c2   :  { %v962_v51 = vpop.xlane.xlu0 %961  ;;  %1003 = vmax.xlane.f32.xlu1 %v1002_v49  ;;  %v1075_v1 = vpop.permute.xlu2 %1074 }
 0x6c3   :  { %v993_v54 = vadd.f32 %v991_v36, %v962_v51  ;;  %v1080_v35 = vsel %vm325_vm0, %v1075_v1, 0.0  ;;  %v2795_v51 = vld [vmem:[%s3826_s4 + $0x10] sm:$0xff] }
 0x6c5   :  { %v997_v52 = vmul.f32 0.2, %v993_v54  ;;  %vm995_vm5 = vcmp.gt.f32.partialorder %v993_v54, 0.0 }
 0x6c7   :  { %v999_v58 = vsel %vm995_vm5, %v993_v54, %v997_v52  ;;  %vm821_vm5 = vcmask 1048320  }
 0x6c8   :  { %v3225_v13 = vsel %vm844_vm3, %v999_v58, -1e+09 }
 0x6c9   :  { %v1005_v59 = vsel %vm372_vm2, %v3225_v13, -inf }
 0x6ca   :  { %1006 = vmax.xlane.f32.xlu2 %v1005_v59  ;;  %903 = vadd.xlane.f32.xlu1 %v902_v41  ;;  %v2796_v59 = vld [vmem:[%s3826_s4 + $0x8] sm:$0xff] }
 0x6db   :  { %v663_v8 = vpop.f32.mrf.mxu1 }
 0x6dc   :  { %v670_v6 = vmin.f32 %v663_v8, 0.0  ;;  %vm668_vm6 = vcmp.gt.f32.partialorder %v663_v8, 0.0 }
 0x6de   :  { %v672_v7 = vmul.f32 1.442695, %v670_v6 }
 0x6e0   :  { %2638 = vpow2.f32 %v672_v7 }
 0x6e2   :  { %1198 = vrot.lane.b32.xlu2 %v1193_v62, %s2824_s20 }
 0x6e3   :  { %1196 = vrot.lane.b32.xlu1 %v1192_v0, %s2824_s20  ;;  %v665_v38 = vpop.f32.mrf.mxu1 }
 0x6e4   :  { %v671_v49 = vmin.f32 %v665_v38, 0.0  ;;  %vm669_vm9 = vcmp.gt.f32.partialorder %v665_v38, 0.0 }
 0x6e6   :  { %v2639_v44 = vpop.eup %2638  ;;  %v674_v58 = vmul.f32 1.442695, %v671_v49 }
 0x6e7   :  { %v2491_v39 = vadd.f32 -1.0, %v2639_v44 }
 0x6e9   :  { %v678_v19 = vsel %vm668_vm6, %v663_v8, %v2491_v39 }
 0x705   :  { %v907_v3 = vpop.xlane.xlu0 %906 }
 0x706   :  { %2640 = vrcp.f32 %v907_v3 }
 0x70b   :  { %1081 = vadd.xlane.f32.xlu2 %v1080_v35 }
 0x70c   :  { %v2641_v20 = vpop.eup %2640 }
 0x70d   :  { %v911_v15 = vmul.f32 %v2641_v20, %v2635_v28 }
 0x718   :  { %v1077_v63 = vpop.permute.xlu0 %1076 }
 0x719   :  { %v1083_v5 = vsel %vm325_vm0, %v1077_v63, 0.0 }
 0x71a   :  { %1084 = vadd.xlane.f32.xlu0 %v1083_v5 }
 0x72e   :  { %1026 = vrot.lane.b32.xlu0 %v3203_v18, %s2823_s3 }
 0x735   :  { %v1004_v9 = vpop.xlane.xlu1 %1003 }
 0x736   :  { %682 = vrot.lane.b32.xlu0 %v678_v19, %s2825_s21  ;;  %v1008_v26 = vsub.f32 %v1000_v48, %v1004_v9  ;;  %v794_v48 = vpop.f32.mrf.mxu0 }
 0x737   :  { %vm799_vm10 = vcmp.gt.f32.partialorder %v794_v48, 0.0 }
 0x738   :  { %v1010_v28 = vmul.f32 1.442695, %v1008_v26 }
 0x73d   :  { %v3241_v11 = vpop.xlane.xlu2 %1006  ;;  %v904_v12 = vpop.xlane.xlu1 %903 }
 0x73e   :  { %2642 = vrcp.f32 %v904_v12  ;;  %v1009_v7 = vsub.f32 %v3225_v13, %v3241_v11  ;;  %v796_v19 = vpop.f32.mrf.mxu0 }
 0x73f   :  { %2644 = vpow2.f32 %v543_v25  ;;  %vm800_vm13 = vcmp.gt.f32.partialorder %v796_v19, 0.0 }
 0x740   :  { %2646 = vpow2.f32 %v1010_v28  ;;  %v1012_v44 = vmul.f32 1.442695, %v1009_v7  ;;  %v3338_v7 = vld [vmem:[%s3827_s0 + $0x10] sm:$0xff] }
 0x741   :  { %2648 = vpow2.f32 %v541_v47  ;;  %v2804_v47 = vld [vmem:[%s3825_s2 + $0x8] sm:$0xff] }
 0x742   :  { %2650 = vpow2.f32 %v674_v58 }
 0x744   :  { %v2643_v14 = vpop.eup %2642 }
 0x745   :  { %v910_v16 = vmul.f32 %v2643_v14, %v2637_v57  ;;  %v1199_v17 = vpop.permute.xlu2 %1198  ;;  %v2645_v36 = vpop.eup %2644  ;;  %v801_v57 = vmin.f32 %v794_v48, 0.0  ;;  %v802_v14 = vmin.f32 %v796_v19, 0.0 }
 0x746   :  { %v1205_v21 = vsel %vm325_vm0, %v1199_v17, 0.0  ;;  %v2486_v42 = vadd.f32 -1.0, %v2645_v36  ;;  %v3265_v43 = vpop.eup %2646  ;;  %v2799_v36 = vld [vmem:[%s3825_s2 + $0x30] sm:$0xff] }
 0x747   :  { %v912_v23 = vpack.c.bf16 %v911_v15, %v910_v16  ;;  %1206 = vadd.xlane.f32.xlu1 %v1205_v21  ;;  %v1014_v52 = vsel %vm372_vm2, %v3265_v43, 0.0  ;;  %v803_v41 = vmul.f32 1.442695, %v801_v57  ;;  %v2649_v62 = vpop.eup %2648  ;;  %v805_v17 = vmul.f32 1.442695, %v802_v14 }
 0x748   :  { %v548_v54 = vsel %vm538_vm7, %v3145_v4, %v2486_v42  ;;  %v2797_v4 = vld [vmem:[%s3826_s4] sm:$0xff]  ;;  %v2485_v0 = vadd.f32 -1.0, %v2649_v62  ;;  %v2651_v1 = vpop.eup %2650  ;;  %v2803_v42 = vld [vmem:[%s3825_s2 + $0x10] sm:$0xff] }
 0x749   :  { %2502 = vmatmul.msk.bf16.vlgmr.msra.gmra.mxu1 %vm372_vm2, %v912_v23  ;;  %2652 = vpow2.f32 %v803_v41  ;;  %v2492_v63 = vadd.f32 -1.0, %v2651_v1 }
 0x74a   :  { %1368 = vmatpush.bf16.msra.mxu1 %v2790_v22  ;;  %v547_v35 = vsel %vm537_vm8, %v3143_v2, %v2485_v0  ;;  %2654 = vpow2.f32 %v1012_v44  ;;  %v1111_v2 = vpop.f32.mrf.mxu2 }
 0x74b   :  { %v679_v8 = vsel %vm669_vm9, %v665_v38, %v2492_v63  ;;  %v1114_v12 = vperm.slane %v1111_v2, 0  ;;  %2656 = vpow2.f32 %v805_v17  ;;  %v2802_v38 = vld [vmem:[%s3825_s2 + $0x18] sm:$0xff] }
 0x74e   :  { %1369 = vmatpush.bf16.msra.mxu1 %v2791_v27 }
 0x74f   :  { %v2653_v3 = vpop.eup %2652 }
 0x750   :  { %v2497_v5 = vadd.f32 -1.0, %v2653_v3  ;;  %v3288_v39 = vpop.eup %2654  ;;  %v2806_v3 = vld [vmem:[%s3827_s0] sm:$0xff] }
 0x751   :  { %v1017_v9 = vsel %vm372_vm2, %v3288_v39, 0.0  ;;  %v2657_v25 = vpop.eup %2656 }
 0x752   :  { %1370 = vmatpush.bf16.msra.mxu1 %v2792_v32  ;;  %v809_v6 = vsel %vm799_vm10, %v794_v48, %v2497_v5  ;;  %v2498_v28 = vadd.f32 -1.0, %v2657_v25  ;;  %v2805_v48 = vld [vmem:[%s3825_s2] sm:$0xff]  ;;  %v2807_v5 = vld [vmem:[%s3827_s0 + $0x8] sm:$0xff] }
 0x755   :  { %v1197_v30 = vpop.permute.xlu1 %1196 }
 0x756   :  { %v1202_v33 = vsel %vm325_vm0, %v1197_v30, 0.0  ;;  %1371 = vmatpush.bf16.msra.mxu1 %v2793_v34  ;;  %v2798_v34 = vld [vmem:[%s3825_s2 + $0x38] sm:$0xff] }
 0x757   :  { %1203 = vadd.xlane.f32.xlu2 %v1202_v33  ;;  %v810_v33 = vsel %vm800_vm13, %v796_v19, %v2498_v28 }
 0x759   :  { %2519 = vmatmul.msk.f32.vlgmr.msrb.gmra.mxu1 %vm325_vm0, %v3105_v61 }
 0x75a   :  { %1372 = vmatpush.bf16.msra.mxu1 %v2794_v53  ;;  %v2801_v53 = vld [vmem:[%s3825_s2 + $0x20] sm:$0xff] }
 0x75e   :  { %1373 = vmatpush.bf16.msra.mxu1 %v2795_v51 }
 0x760   :  { %553 = vrot.lane.b32.xlu1 %v548_v54, %s2824_s20  ;;  %1015 = vadd.xlane.f32.xlu0 %v1014_v52 }
 0x762   :  { %1374 = vmatpush.bf16.msra.mxu1 %v2796_v59 }
 0x766   :  { %1375 = vmatpush.bf16.msra.mxu1 %v2797_v4 }
 0x76f   :  { %551 = vrot.lane.b32.xlu2 %v547_v35, %s2824_s20 }
 0x774   :  { %684 = vrot.lane.b32.xlu0 %v679_v8, %s2825_s21 }
 0x777   :  { %813 = vrot.lane.b32.xlu2 %v809_v6, %s2823_s3 }
 0x77e   :  { %v1082_v20 = vpop.xlane.xlu2 %1081 }
 0x77f   :  { %v1115_v16 = vadd.f32 %v1114_v12, %v1082_v20 }
 0x781   :  { %v1119_v23 = vmul.f32 0.2, %v1115_v16  ;;  %vm1117_vm11 = vcmp.gt.f32.partialorder %v1115_v16, 0.0 }
 0x783   :  { %v1121_v11 = vsel %vm1117_vm11, %v1115_v16, %v1119_v23 }
 0x784   :  { %v3294_v22 = vsel %vm843_vm14, %v1121_v11, -1e+09  ;;  %v3348_v11 = vld [vmem:[%s3827_s0 + $0x18] sm:$0xff] }
 0x785   :  { %v1125_v27 = vsel %vm372_vm2, %v3294_v22, -inf }
 0x78a   :  { %1018 = vadd.xlane.f32.xlu1 %v1017_v9 }
 0x78d   :  { %v1085_v15 = vpop.xlane.xlu0 %1084 }
 0x78e   :  { %v1116_v21 = vadd.f32 %v1114_v12, %v1085_v15 }
 0x790   :  { %v1120_v13 = vmul.f32 0.2, %v1116_v21  ;;  %vm1118_vm12 = vcmp.gt.f32.partialorder %v1116_v21, 0.0 }
 0x792   :  { %v1122_v24 = vsel %vm1118_vm12, %v1116_v21, %v1120_v13 }
 0x793   :  { %v3298_v26 = vsel %vm844_vm3, %v1122_v24, -1e+09 }
 0x794   :  { %v1128_v32 = vsel %vm372_vm2, %v3298_v26, -inf }
 0x79e   :  { %1126 = vmax.xlane.f32.xlu0 %v1125_v27 }
 0x7a0   :  { %v1027_v30 = vpop.permute.xlu0 %1026  ;;  %1129 = vmax.xlane.f32.xlu2 %v1128_v32 }
 0x7a1   :  { %1039 = vmatpush.bf16.msrb.mxu0 %v1027_v30 }
 0x7a3   :  { %815 = vrot.lane.b32.xlu1 %v810_v33, %s2823_s3 }
 0x7a5   :  { %1320 = vmatpush.bf16.msra.mxu0 %v2798_v34 }
 0x7a8   :  { %v683_v35 = vpop.permute.xlu0 %682 }
 0x7a9   :  { %1321 = vmatpush.bf16.msra.mxu0 %v2799_v36  ;;  %v688_v2 = vadd.f32 %v2806_v3, %v683_v35 }
 0x7ad   :  { %1322 = vmatpush.bf16.msra.mxu0 %v2800_v37 }
 0x7b1   :  { %1323 = vmatpush.bf16.msra.mxu0 %v2801_v53 }
 0x7b5   :  { %1324 = vmatpush.bf16.msra.mxu0 %v2802_v38 }
 0x7b9   :  { %1325 = vmatpush.bf16.msra.mxu0 %v2803_v42 }
 0x7ba   :  { %v1207_v52 = vpop.xlane.xlu1 %1206 }
 0x7bd   :  { %1326 = vmatpush.bf16.msra.mxu0 %v2804_v47 }
 0x7c1   :  { %1327 = vmatpush.bf16.msra.mxu0 %v2805_v48 }
 0x7c6   :  { %v926_v49 = vpop.f32.mrf.mxu1 }
 0x7c7   :  { %v933_v51 = vmin.f32 %v926_v49, 0.0  ;;  %vm931_vm1 = vcmp.gt.f32.partialorder %v926_v49, 0.0 }
 0x7c9   :  { %v935_v54 = vmul.f32 1.442695, %v933_v51 }
 0x7ca   :  { %v1204_v57 = vpop.xlane.xlu2 %1203 }
 0x7cb   :  { %2658 = vpow2.f32 %v935_v54 }
 0x7ce   :  { %v928_v58 = vpop.f32.mrf.mxu1 }
 0x7cf   :  { %v934_v59 = vmin.f32 %v928_v58, 0.0  ;;  %vm932_vm6 = vcmp.gt.f32.partialorder %v928_v58, 0.0 }
 0x7d1   :  { %v2659_v41 = vpop.eup %2658  ;;  %v937_v4 = vmul.f32 1.442695, %v934_v59 }
 0x7d2   :  { %v2503_v62 = vadd.f32 -1.0, %v2659_v41  ;;  %v552_v0 = vpop.permute.xlu2 %551  ;;  %v554_v1 = vpop.permute.xlu1 %553 }
 0x7d3   :  { %2660 = vpow2.f32 %v937_v4  ;;  %v557_v63 = vadd.f32 %v2806_v3, %v552_v0  ;;  %v558_v8 = vadd.f32 %v2807_v5, %v554_v1  ;;  %v1016_v27 = vpop.xlane.xlu0 %1015 }
 0x7d4   :  { %v941_v6 = vsel %vm931_vm1, %v926_v49, %v2503_v62  ;;  %2662 = vrcp.f32 %v1016_v27 }
 0x7d5   :  { %v943_v44 = vadd.f32 %v3338_v7, %v941_v6  ;;  %560 = vst.msk [vmem:[#allocation2] sm:$0xff] %vm559_vm15, %v557_v63 }
 0x7d6   :  { %561 = vst.msk [vmem:[#allocation2 + $0x8] sm:$0xff] %vm559_vm15, %v558_v8  ;;  %v1233_v9 = vpop.f32.mrf.mxu1 }
 0x7d7   :  { %945 = vst.msk [vmem:[#allocation2 + $0x10] sm:$0xff] %vm325_vm0, %v943_v44  ;;  %v1236_v19 = vperm.slane %v1233_v9, 0 }
 0x7d8   :  { %691 = vst.msk [vmem:[#allocation2] sm:$0xff] %vm690_vm4, %v688_v2 }
 0x7d9   :  { %v2661_v12 = vpop.eup %2660  ;;  %v1237_v20 = vadd.f32 %v1236_v19, %v1204_v57  ;;  %v1238_v14 = vadd.f32 %v1236_v19, %v1207_v52 }
 0x7da   :  { %v2504_v15 = vadd.f32 -1.0, %v2661_v12  ;;  %v814_v16 = vpop.permute.xlu2 %813  ;;  %v2663_v10 = vpop.eup %2662 }
 0x7db   :  { %v819_v17 = vadd.f32 %v2806_v3, %v814_v16  ;;  %vm1239_vm7 = vcmp.gt.f32.partialorder %v1237_v20, 0.0  ;;  %v1241_v21 = vmul.f32 0.2, %v1237_v20  ;;  %vm1240_vm8 = vcmp.gt.f32.partialorder %v1238_v14, 0.0 }
 0x7dc   :  { %v942_v23 = vsel %vm932_vm6, %v928_v58, %v2504_v15  ;;  %v1242_v13 = vmul.f32 0.2, %v1238_v14  ;;  %v1022_v42 = vmul.f32 %v2663_v10, %v3265_v43  ;;  %v2812_v10 = vld [vmem:[%s3825_s2 + $0x68] sm:$0xff] }
 0x7dd   :  { %v944_v24 = vadd.f32 %v3348_v11, %v942_v23  ;;  %822 = vst.msk [vmem:[#allocation2] sm:$0xff] %vm821_vm5, %v819_v17  ;;  %v1243_v25 = vsel %vm1239_vm7, %v1237_v20, %v1241_v21 }
 0x7de   :  { %v1245_v28 = vsel %vm843_vm14, %v1243_v25, -1e+09  ;;  %v1244_v32 = vsel %vm1240_vm8, %v1238_v14, %v1242_v13 }
 0x7df   :  { %946 = vst.msk [vmem:[#allocation2 + $0x18] sm:$0xff] %vm325_vm0, %v944_v24  ;;  %v1247_v30 = vsel %vm372_vm2, %v1245_v28, -inf  ;;  %v1246_v33 = vsel %vm844_vm3, %v1244_v32, -1e+09 }
 0x7e0   :  { %1248 = vmax.xlane.f32.xlu1 %v1247_v30  ;;  %v1250_v34 = vsel %vm372_vm2, %v1246_v33, -inf }
 0x7e1   :  { %1251 = vmax.xlane.f32.xlu2 %v1250_v34 }
 0x7e4   :  { %v3368_v62 = vld [vmem:[#allocation2] sm:$0xff] }
 0x7e6   :  { %v685_v36 = vpop.permute.xlu0 %684 }
 0x7e7   :  { %v689_v37 = vadd.f32 %v2807_v5, %v685_v36  ;;  %v2810_v36 = vld [vmem:[%s3825_s2 + $0x78] sm:$0xff] }
 0x7e9   :  { %692 = vst.msk [vmem:[#allocation2 + $0x8] sm:$0xff] %vm690_vm4, %v689_v37  ;;  %v2811_v37 = vld [vmem:[%s3825_s2 + $0x70] sm:$0xff] }
 0x7fd   :  { %v1019_v53 = vpop.xlane.xlu1 %1018 }
 0x7fe   :  { %2664 = vrcp.f32 %v1019_v53 }
 0x804   :  { %v2665_v38 = vpop.eup %2664 }
 0x805   :  { %v1023_v47 = vmul.f32 %v2665_v38, %v3288_v39  ;;  %v2813_v38 = vld [vmem:[%s3825_s2 + $0x60] sm:$0xff] }
 0x807   :  { %v1024_v48 = vpack.c.bf16 %v1023_v47, %v1022_v42  ;;  %v2814_v42 = vld [vmem:[%s3825_s2 + $0x58] sm:$0xff] }
 0x809   :  { %2508 = vmatmul.msk.bf16.vlgmr.msrb.gmra.mxu0 %vm372_vm2, %v1024_v48  ;;  %v2815_v48 = vld [vmem:[%s3825_s2 + $0x50] sm:$0xff] }
 0x811   :  { %v1127_v55 = vpop.xlane.xlu0 %1126 }
 0x812   :  { %v1131_v49 = vsub.f32 %v3294_v22, %v1127_v55 }
 0x813   :  { %v1130_v51 = vpop.xlane.xlu2 %1129 }
 0x814   :  { %v1133_v54 = vmul.f32 1.442695, %v1131_v49  ;;  %v1132_v52 = vsub.f32 %v3298_v26, %v1130_v51  ;;  %v2816_v51 = vld [vmem:[%s3825_s2 + $0x48] sm:$0xff] }
 0x815   :  { %v816_v57 = vpop.permute.xlu1 %815 }
 0x816   :  { %2666 = vpow2.f32 %v1133_v54  ;;  %v1135_v58 = vmul.f32 1.442695, %v1132_v52  ;;  %v820_v59 = vadd.f32 %v2807_v5, %v816_v57  ;;  %v2817_v57 = vld [vmem:[%s3825_s2 + $0x40] sm:$0xff] }
 0x818   :  { %2668 = vpow2.f32 %v1135_v58  ;;  %823 = vst.msk [vmem:[#allocation2 + $0x8] sm:$0xff] %vm821_vm5, %v820_v59 }
 0x81c   :  { %v2667_v43 = vpop.eup %2666 }
 0x81d   :  { %v1137_v39 = vsel %vm372_vm2, %v2667_v43, 0.0 }
 0x81e   :  { %v2669_v41 = vpop.eup %2668  ;;  %1138 = vadd.xlane.f32.xlu0 %v1137_v39 }
 0x81f   :  { %v1140_v4 = vsel %vm372_vm2, %v2669_v41, 0.0  ;;  %v3370_v22 = vld [vmem:[#allocation2 + $0x8] sm:$0xff] }
 0x820   :  { %1141 = vadd.xlane.f32.xlu1 %v1140_v4  ;;  %v1318_v26 = vpack.c.bf16 %v3370_v22, %v3368_v62 }
 0x822   :  { %1328 = vmatmul.bf16.vlgmr.msra.gmra.mxu0 %v1318_v26  ;;  %1376 = vmatmul.bf16.vlgmr.msra.gmra.mxu1 %v1318_v26 }
 0x839   :  { %1148 = vrot.lane.b32.xlu1 %v3203_v18, %s2825_s21 }
 0x853   :  { %v1249_v0 = vpop.xlane.xlu1 %1248 }
 0x854   :  { %v1252_v1 = vpop.xlane.xlu2 %1251  ;;  %v1253_v35 = vsub.f32 %v1245_v28, %v1249_v0 }
 0x855   :  { %v1254_v3 = vsub.f32 %v1246_v33, %v1252_v1 }
 0x856   :  { %v1255_v63 = vmul.f32 1.442695, %v1253_v35 }
 0x857   :  { %v1257_v5 = vmul.f32 1.442695, %v1254_v3 }
 0x858   :  { %2670 = vpow2.f32 %v1255_v63 }
 0x859   :  { %2672 = vpow2.f32 %v1257_v5 }
 0x85e   :  { %v3376_v8 = vpop.eup %2670 }
 0x85f   :  { %v3378_v6 = vpop.eup %2672  ;;  %v1259_v44 = vsel %vm372_vm2, %v3376_v8, 0.0 }
 0x860   :  { %v1262_v2 = vsel %vm372_vm2, %v3378_v6, 0.0  ;;  %1260 = vadd.xlane.f32.xlu2 %v1259_v44 }
 0x861   :  { %1263 = vadd.xlane.f32.xlu0 %v1262_v2 }
 0x878   :  { %1270 = vrot.lane.b32.xlu2 %v3203_v18, %s2824_s20 }
 0x886   :  { %v1041_v9 = vpop.f32.mrf.mxu0 }
 0x887   :  { %v1048_v19 = vmin.f32 %v1041_v9, 0.0  ;;  %vm1046_vm14 = vcmp.gt.f32.partialorder %v1041_v9, 0.0 }
 0x889   :  { %v1050_v12 = vmul.f32 1.442695, %v1048_v19 }
 0x88b   :  { %2674 = vpow2.f32 %v1050_v12 }
 0x88e   :  { %v1043_v20 = vpop.f32.mrf.mxu0 }
 0x88f   :  { %v1049_v14 = vmin.f32 %v1043_v20, 0.0  ;;  %vm1047_vm3 = vcmp.gt.f32.partialorder %v1043_v20, 0.0 }
 0x891   :  { %v2675_v15 = vpop.eup %2674  ;;  %v1052_v16 = vmul.f32 1.442695, %v1049_v14  ;;  %v1139_v18 = vpop.xlane.xlu0 %1138 }
 0x892   :  { %v2509_v17 = vadd.f32 -1.0, %v2675_v15 }
 0x893   :  { %2676 = vpow2.f32 %v1052_v16  ;;  %v1142_v25 = vpop.xlane.xlu1 %1141 }
 0x894   :  { %v1056_v21 = vsel %vm1046_vm14, %v1041_v9, %v2509_v17  ;;  %2678 = vrcp.f32 %v1142_v25 }
 0x895   :  { %1060 = vrot.lane.b32.xlu0 %v1056_v21, %s2824_s20  ;;  %2680 = vrcp.f32 %v1139_v18 }
 0x899   :  { %v2677_v23 = vpop.eup %2676 }
 0x89a   :  { %v2510_v13 = vadd.f32 -1.0, %v2677_v23  ;;  %v2679_v27 = vpop.eup %2678 }
 0x89b   :  { %v2681_v28 = vpop.eup %2680  ;;  %v1146_v32 = vmul.f32 %v2679_v27, %v2669_v41 }
 0x89c   :  { %v1057_v24 = vsel %vm1047_vm3, %v1043_v20, %v2510_v13  ;;  %v1145_v30 = vmul.f32 %v2681_v28, %v2667_v43 }
 0x89d   :  { %1062 = vrot.lane.b32.xlu1 %v1057_v24, %s2824_s20 }
 0x89e   :  { %v1147_v34 = vpack.c.bf16 %v1146_v32, %v1145_v30 }
 0x89f   :  { %v1329_v53 = vpop.f32.mrf.mxu0  ;;  %v3423_v16 = vpop.f32.mrf.mxu1 }
 0x8a0   :  { %v1330_v49 = vadd.f32 %v1329_v53, %v2953_v29 }
 0x8a2   :  { %v1339_v52 = vmax.f32 %v1330_v49, 0.0 }
 0x8a7   :  { %v1331_v47 = vpop.f32.mrf.mxu0  ;;  %v3426_v13 = vpop.f32.mrf.mxu1 }
 0x8a8   :  { %v1332_v55 = vadd.f32 %v1331_v47, %v2953_v29  ;;  %v1511_v18 = vmul.f32 %v3426_v13, %v3029_v40 }
 0x8aa   :  { %v1340_v54 = vmax.f32 %v1332_v55, 0.0  ;;  %v3448_v55 = vld [vmem:[%s3830_s6] sm:$0xf] }
 0x8ab   :  { %v1149_v33 = vpop.permute.xlu1 %1148 }
 0x8ac   :  { %1161 = vmatpush.bf16.msrb.mxu3 %v1149_v33  ;;  %v1343_v58 = vpack.c.bf16 %v1340_v54, %v1339_v52  ;;  %v1510_v52 = vmul.f32 %v3423_v16, %v3029_v40 }
 0x8af   :  { %2514 = vmatmul.msk.bf16.vlgmr.msrb.gmra.mxu3 %vm372_vm2, %v1147_v34 }
 0x8b0   :  { %1345 = vmatpush.bf16.msra.mxu3 %v2810_v36  ;;  %v3441_v36 = vpack.c.bf16 %v3426_v13, %v3423_v16 }
 0x8b4   :  { %1346 = vmatpush.bf16.msra.mxu3 %v2811_v37 }
 0x8b8   :  { %1347 = vmatpush.bf16.msra.mxu3 %v2812_v10 }
 0x8bc   :  { %1348 = vmatpush.bf16.msra.mxu3 %v2813_v38 }
 0x8c0   :  { %1349 = vmatpush.bf16.msra.mxu3 %v2814_v42 }
 0x8c4   :  { %1350 = vmatpush.bf16.msra.mxu3 %v2815_v48 }
 0x8c8   :  { %1351 = vmatpush.bf16.msra.mxu3 %v2816_v51 }
 0x8cc   :  { %1352 = vmatpush.bf16.msra.mxu3 %v2817_v57  ;;  %v1408_v57 = vmul.f32 %v3423_v16, %v2961_v31 }
 0x8cf   :  { %1353 = vmatmul.bf16.vlgmr.msra.gmra.mxu3 %v1343_v58  ;;  %v1410_v58 = vsel %vm325_vm0, %v1408_v57, 0.0 }
 0x8d3   :  { %v1261_v59 = vpop.xlane.xlu2 %1260 }
 0x8d4   :  { %v1264_v43 = vpop.xlane.xlu0 %1263  ;;  %2682 = vrcp.f32 %v1261_v59 }
 0x8d5   :  { %2684 = vrcp.f32 %v1264_v43 }
 0x8da   :  { %v2683_v39 = vpop.eup %2682 }
 0x8db   :  { %v2685_v41 = vpop.eup %2684  ;;  %v1267_v4 = vmul.f32 %v2683_v39, %v3376_v8  ;;  %v1271_v26 = vpop.permute.xlu2 %1270  ;;  %v1409_v39 = vmul.f32 %v3426_v13, %v2961_v31 }
 0x8dc   :  { %v1268_v0 = vmul.f32 %v2685_v41, %v3378_v6  ;;  %1283 = vmatpush.bf16.msra.mxu2 %v1271_v26 }
 0x8dd   :  { %v1413_v41 = vsel %vm325_vm0, %v1409_v39, 0.0 }
 0x8de   :  { %v1269_v1 = vpack.c.bf16 %v1268_v0, %v1267_v4 }
 0x8e0   :  { %2520 = vmatmul.msk.bf16.vlgmr.msra.gmra.mxu2 %vm372_vm2, %v1269_v1 }
 0x907   :  { %v1061_v35 = vpop.permute.xlu0 %1060 }
 0x908   :  { %v1066_v3 = vadd.f32 %v3338_v7, %v1061_v35 }
 0x90a   :  { %1068 = vst.msk [vmem:[#allocation2 + $0x10] sm:$0xff] %vm559_vm15, %v1066_v3 }
 0x90f   :  { %v1063_v63 = vpop.permute.xlu1 %1062 }
 0x910   :  { %v1067_v5 = vadd.f32 %v3348_v11, %v1063_v63 }
 0x912   :  { %1069 = vst.msk [vmem:[#allocation2 + $0x18] sm:$0xff] %vm559_vm15, %v1067_v5 }
 0x932   :  { %v1163_v44 = vpop.f32.mrf.mxu3 }
 0x933   :  { %v1170_v2 = vmin.f32 %v1163_v44, 0.0  ;;  %vm1168_vm9 = vcmp.gt.f32.partialorder %v1163_v44, 0.0 }
 0x935   :  { %v1172_v8 = vmul.f32 1.442695, %v1170_v2 }
 0x937   :  { %2686 = vpow2.f32 %v1172_v8 }
 0x93a   :  { %v1165_v9 = vpop.f32.mrf.mxu3 }
 0x93b   :  { %v1171_v6 = vmin.f32 %v1165_v9, 0.0  ;;  %vm1169_vm10 = vcmp.gt.f32.partialorder %v1165_v9, 0.0 }
 0x93d   :  { %v2687_v19 = vpop.eup %2686  ;;  %v1174_v12 = vmul.f32 1.442695, %v1171_v6 }
 0x93e   :  { %v2515_v20 = vadd.f32 -1.0, %v2687_v19 }
 0x93f   :  { %2688 = vpow2.f32 %v1174_v12 }
 0x940   :  { %v1178_v14 = vsel %vm1168_vm9, %v1163_v44, %v2515_v20 }
 0x941   :  { %1182 = vrot.lane.b32.xlu0 %v1178_v14, %s2825_s21 }
 0x945   :  { %v2689_v15 = vpop.eup %2688 }
 0x946   :  { %v2516_v17 = vadd.f32 -1.0, %v2689_v15 }
 0x948   :  { %v1179_v21 = vsel %vm1169_vm10, %v1165_v9, %v2516_v17 }
 0x949   :  { %1184 = vrot.lane.b32.xlu2 %v1179_v21, %s2825_s21  ;;  %v2819_v21 = vld [vmem:[%s3831_s1] sm:$0xff] }
 0x951   :  { %1528 = vrot.lane.b32.xlu2 %v3426_v13, %s2823_s3 }
 0x952   :  { %v1354_v23 = vpop.f32.mrf.mxu3 }
 0x953   :  { %v1355_v24 = vadd.f32 %v1354_v23, %v2977_v45 }
 0x955   :  { %v1364_v28 = vmax.f32 %v1355_v24, 0.0 }
 0x959   :  { %1516 = vrot.lane.b32.xlu2 %v1511_v18, %s2823_s3 }
 0x95a   :  { %v1356_v25 = vpop.f32.mrf.mxu3 }
 0x95b   :  { %v1357_v27 = vadd.f32 %v1356_v25, %v2977_v45 }
 0x95d   :  { %v1365_v32 = vmax.f32 %v1357_v27, 0.0 }
 0x95f   :  { %v1387_v30 = vpack.c.bf16 %v1365_v32, %v1364_v28 }
 0x961   :  { %1395 = vmatpush.bf16.xpose.msrb.mxu2 %v1387_v30 }
 0x963   :  { %v1285_v33 = vpop.f32.mrf.mxu2 }
 0x964   :  { %v1292_v34 = vmin.f32 %v1285_v33, 0.0  ;;  %vm1290_vm11 = vcmp.gt.f32.partialorder %v1285_v33, 0.0 }
 0x966   :  { %v1294_v37 = vmul.f32 1.442695, %v1292_v34 }
 0x968   :  { %1396 = vmatmul.bf16.vlgmr.msrb.gmra.mxu2 %v1387_v30  ;;  %2690 = vpow2.f32 %v1294_v37 }
 0x969   :  { %2523 = vmatpush.xpose.msk.msra.mxu2 %vm325_vm0, %v3426_v13 }
 0x96b   :  { %v1287_v53 = vpop.f32.mrf.mxu2 }
 0x96c   :  { %v1293_v10 = vmin.f32 %v1287_v53, 0.0  ;;  %vm1291_vm12 = vcmp.gt.f32.partialorder %v1287_v53, 0.0 }
 0x96d   :  { %2524 = vmatpush.xpose.msk.msra.mxu2 %vm325_vm0, %v3423_v16 }
 0x96e   :  { %v2691_v38 = vpop.eup %2690  ;;  %v1296_v42 = vmul.f32 1.442695, %v1293_v10 }
 0x96f   :  { %v2521_v47 = vadd.f32 -1.0, %v2691_v38 }
 0x970   :  { %2692 = vpow2.f32 %v1296_v42 }
 0x971   :  { %1487 = vmatpush.bf16.msrb.mxu2 %v3441_v36  ;;  %v1300_v48 = vsel %vm1290_vm11, %v1285_v33, %v2521_v47  ;;  %v2820_v33 = vld [vmem:[%s3831_s1 + $0x8] sm:$0xff] }
 0x972   :  { %1304 = vrot.lane.b32.xlu1 %v1300_v48, %s2823_s3 }
 0x976   :  { %v2693_v49 = vpop.eup %2692 }
 0x977   :  { %v2522_v51 = vadd.f32 -1.0, %v2693_v49 }
 0x978   :  { %2525 = vmatmul.msk.f32.vlgmr.msra.gmra.mxu2 %vm325_vm0, %v3448_v55 }
 0x979   :  { %v1301_v54 = vsel %vm1291_vm12, %v1287_v53, %v2522_v51 }
 0x97a   :  { %1526 = vrot.lane.b32.xlu1 %v3423_v16, %s2823_s3  ;;  %1306 = vrot.lane.b32.xlu0 %v1301_v54, %s2823_s3 }
 0x982   :  { %1514 = vrot.lane.b32.xlu0 %v1510_v52, %s2823_s3 }
 0x9a3   :  { %v1185_v59 = vpop.permute.xlu2 %1184 }
 0x9a4   :  { %1411 = vadd.xlane.f32.xlu1 %v1410_v58  ;;  %v1189_v43 = vadd.f32 %v3348_v11, %v1185_v59 }
 0x9a6   :  { %1191 = vst.msk [vmem:[#allocation2 + $0x18] sm:$0xff] %vm690_vm4, %v1189_v43 }
 0x9ab   :  { %v1529_v4 = vpop.permute.xlu2 %1528 }
 0x9ac   :  { %1414 = vadd.xlane.f32.xlu0 %v1413_v41  ;;  %2529 = vmatpush.xpose.msk.msrb.mxu0 %vm325_vm0, %v1529_v4 }
 0x9b3   :  { %v1183_v26 = vpop.permute.xlu0 %1182  ;;  %v1517_v0 = vpop.permute.xlu2 %1516 }
 0x9b4   :  { %v1188_v1 = vadd.f32 %v3338_v7, %v1183_v26  ;;  %v1523_v35 = vsel %vm325_vm0, %v1517_v0, 0.0 }
 0x9b5   :  { %1524 = vadd.xlane.f32.xlu1 %v1523_v35 }
 0x9b6   :  { %1190 = vst.msk [vmem:[#allocation2 + $0x10] sm:$0xff] %vm690_vm4, %v1188_v1 }
 0x9e4   :  { %v1305_v3 = vpop.permute.xlu1 %1304 }
 0x9e5   :  { %v1310_v63 = vadd.f32 %v3338_v7, %v1305_v3 }
 0x9e7   :  { %1312 = vst.msk [vmem:[#allocation2 + $0x10] sm:$0xff] %vm821_vm5, %v1310_v63 }
 0x9eb   :  { %v1397_v12 = vpop.f32.mrf.mxu2 }
 0x9ec   :  { %v1307_v5 = vpop.permute.xlu0 %1306  ;;  %v1527_v44 = vpop.permute.xlu1 %1526  ;;  %v1402_v14 = vmul.f32 0.088388346, %v1397_v12 }
 0x9ed   :  { %v1311_v2 = vadd.f32 %v3348_v11, %v1307_v5  ;;  %2530 = vmatpush.xpose.msk.msrb.mxu0 %vm325_vm0, %v1527_v44 }
 0x9ee   :  { %v3476_v6 = vld [vmem:[#allocation2 + $0x10] sm:$0xff]  ;;  %v3487_v23 = vadd.f32 %v2819_v21, %v1402_v14 }
 0x9ef   :  { %1313 = vst.msk [vmem:[#allocation2 + $0x18] sm:$0xff] %vm821_vm5, %v1311_v2 }
 0x9f0   :  { %vm1406_vm1 = vcmp.gt.f32.partialorder %v3487_v23, 0.0 }
 0x9f3   :  { %v1399_v20 = vpop.f32.mrf.mxu2 }
 0x9f4   :  { %v1515_v8 = vpop.permute.xlu0 %1514  ;;  %v1403_v18 = vmul.f32 0.088388346, %v1399_v20 }
 0x9f5   :  { %v1520_v9 = vsel %vm325_vm0, %v1515_v8, 0.0 }
 0x9f6   :  { %1521 = vadd.xlane.f32.xlu2 %v1520_v9  ;;  %v3478_v19 = vld [vmem:[#allocation2 + $0x18] sm:$0xff]  ;;  %v3496_v34 = vadd.f32 %v2820_v33, %v1403_v18 }
 0x9f7   :  { %v1319_v7 = vpack.c.bf16 %v3478_v19, %v3476_v6 }
 0x9f8   :  { %vm1407_vm7 = vcmp.gt.f32.partialorder %v3496_v34, 0.0 }
 0x9f9   :  { %1333 = vmatmul.bf16.gmra.mxu0 %v1319_v7  ;;  %1381 = vmatmul.bf16.gmra.mxu1 %v1319_v7 }
 0x9fb   :  { %v1439_v11 = vpop.f32.mrf.mxu2 }
 0x9fc   :  { %v1442_v15 = vperm.slane %v1439_v11, 0 }
 0xa09   :  { %2531 = vmatmul.msk.f32.vlgmr.msrb.gmra.mxu0 %vm325_vm0, %v3039_v46 }
 0xa17   :  { %v1412_v17 = vpop.xlane.xlu1 %1411 }
 0xa18   :  { %v1443_v24 = vadd.f32 %v1442_v15, %v1412_v17  ;;  %v1634_v17 = vmul.f32 %v3426_v13, %v3083_v50 }
 0xa1a   :  { %v1447_v25 = vmul.f32 0.2, %v1443_v24  ;;  %vm1445_vm13 = vcmp.gt.f32.partialorder %v1443_v24, 0.0 }
 0xa1c   :  { %v1449_v27 = vsel %vm1445_vm13, %v1443_v24, %v1447_v25 }
 0xa1d   :  { %v1451_v28 = vsel %vm1406_vm1, %v1449_v27, -1e+09 }
 0xa1e   :  { %v1453_v32 = vsel %vm372_vm2, %v1451_v28, -inf }
 0xa1f   :  { %v1415_v30 = vpop.xlane.xlu0 %1414  ;;  %1454 = vmax.xlane.f32.xlu0 %v1453_v32 }
 0xa20   :  { %v1444_v37 = vadd.f32 %v1442_v15, %v1415_v30 }
 0xa22   :  { %v1448_v53 = vmul.f32 0.2, %v1444_v37  ;;  %vm1446_vm6 = vcmp.gt.f32.partialorder %v1444_v37, 0.0 }
 0xa24   :  { %v1450_v10 = vsel %vm1446_vm6, %v1444_v37, %v1448_v53 }
 0xa25   :  { %v1452_v38 = vsel %vm1407_vm7, %v1450_v10, -1e+09 }
 0xa26   :  { %v1456_v42 = vsel %vm372_vm2, %v1452_v38, -inf }
 0xa27   :  { %1457 = vmax.xlane.f32.xlu2 %v1456_v42 }
 0xa28   :  { %v1525_v43 = vpop.xlane.xlu1 %1524 }
 0xa69   :  { %v1522_v39 = vpop.xlane.xlu2 %1521 }
 0xa76   :  { %v1334_v47 = vpop.f32.mrf.mxu0  ;;  %v3517_v21 = vpop.f32.mrf.mxu1 }
 0xa77   :  { %v1335_v48 = vadd.f32 %v1334_v47, %v2953_v29  ;;  %v1898_v24 = vmul.f32 %v3517_v21, %v2961_v31 }
 0xa79   :  { %v1341_v54 = vmax.f32 %v1335_v48, 0.0  ;;  %v1900_v25 = vsel %vm325_vm0, %v1898_v24, 0.0 }
 0xa7e   :  { %v1336_v49 = vpop.f32.mrf.mxu0 }
 0xa7f   :  { %v1337_v51 = vadd.f32 %v1336_v49, %v2953_v29 }
 0xa81   :  { %v1342_v52 = vmax.f32 %v1337_v51, 0.0 }
 0xa83   :  { %v1344_v57 = vpack.c.bf16 %v1342_v52, %v1341_v54 }
 0xa85   :  { %1358 = vmatmul.bf16.gmra.mxu3 %v1344_v57 }
 0xa86   :  { %v1551_v58 = vpop.f32.mrf.mxu0 }
 0xa87   :  { %v1554_v59 = vperm.slane %v1551_v58, 0 }
 0xa89   :  { %v1555_v41 = vadd.f32 %v1554_v59, %v1522_v39  ;;  %v1556_v4 = vadd.f32 %v1554_v59, %v1525_v43 }
 0xa8b   :  { %vm1557_vm8 = vcmp.gt.f32.partialorder %v1555_v41, 0.0  ;;  %v1559_v26 = vmul.f32 0.2, %v1555_v41  ;;  %vm1558_vm14 = vcmp.gt.f32.partialorder %v1556_v4, 0.0  ;;  %v1560_v0 = vmul.f32 0.2, %v1556_v4 }
 0xa8d   :  { %v1561_v1 = vsel %vm1557_vm8, %v1555_v41, %v1559_v26  ;;  %v1562_v35 = vsel %vm1558_vm14, %v1556_v4, %v1560_v0 }
 0xa8e   :  { %v1563_v3 = vsel %vm1406_vm1, %v1561_v1, -1e+09  ;;  %v1564_v29 = vsel %vm1407_vm7, %v1562_v35, -1e+09 }
 0xa8f   :  { %v1565_v63 = vsel %vm372_vm2, %v1563_v3, -inf  ;;  %v1568_v5 = vsel %vm372_vm2, %v1564_v29, -inf }
 0xa90   :  { %1566 = vmax.xlane.f32.xlu1 %v1565_v63  ;;  %1569 = vmax.xlane.f32.xlu0 %v1568_v5 }
 0xa92   :  { %v1455_v44 = vpop.xlane.xlu0 %1454 }
 0xa93   :  { %v1459_v2 = vsub.f32 %v1451_v28, %v1455_v44 }
 0xa95   :  { %v1461_v8 = vmul.f32 1.442695, %v1459_v2 }
 0xa97   :  { %2694 = vpow2.f32 %v1461_v8 }
 0xa9a   :  { %v1458_v9 = vpop.xlane.xlu2 %1457 }
 0xa9b   :  { %v1460_v7 = vsub.f32 %v1452_v38, %v1458_v9  ;;  %v3539_v9 = vpop.f32.mrf.mxu1 }
 0xa9d   :  { %v2695_v12 = vpop.eup %2694  ;;  %v1463_v20 = vmul.f32 1.442695, %v1460_v7 }
 0xa9e   :  { %v1465_v11 = vsel %vm372_vm2, %v2695_v12, 0.0 }
 0xa9f   :  { %2696 = vpow2.f32 %v1463_v20  ;;  %1466 = vadd.xlane.f32.xlu2 %v1465_v11  ;;  %v1899_v11 = vmul.f32 %v3539_v9, %v2961_v31 }
 0xaa5   :  { %v2697_v14 = vpop.eup %2696 }
 0xaa6   :  { %v1468_v15 = vsel %vm372_vm2, %v2697_v14, 0.0 }
 0xaa7   :  { %1469 = vadd.xlane.f32.xlu1 %v1468_v15 }
 0xac0   :  { %1651 = vrot.lane.b32.xlu1 %v3426_v13, %s2825_s21 }
 0xac8   :  { %1639 = vrot.lane.b32.xlu1 %v1634_v17, %s2825_s21 }
 0xaf2   :  { %1901 = vadd.xlane.f32.xlu1 %v1900_v25 }
 0xb03   :  { %v1570_v18 = vpop.xlane.xlu0 %1569  ;;  %v1567_v27 = vpop.xlane.xlu1 %1566 }
 0xb04   :  { %v1572_v28 = vsub.f32 %v1564_v29, %v1570_v18  ;;  %v1571_v32 = vsub.f32 %v1563_v3, %v1567_v27 }
 0xb06   :  { %v1575_v30 = vmul.f32 1.442695, %v1572_v28  ;;  %v1573_v33 = vmul.f32 1.442695, %v1571_v32 }
 0xb08   :  { %2698 = vpow2.f32 %v1575_v30  ;;  %v1359_v37 = vpop.f32.mrf.mxu3 }
 0xb09   :  { %2700 = vpow2.f32 %v1573_v33  ;;  %v1360_v38 = vadd.f32 %v1359_v37, %v2977_v45 }
 0xb0b   :  { %v1366_v51 = vmax.f32 %v1360_v38, 0.0 }
 0xb0e   :  { %v2699_v53 = vpop.eup %2698 }
 0xb0f   :  { %v2701_v10 = vpop.eup %2700  ;;  %v1580_v42 = vsel %vm372_vm2, %v2699_v53, 0.0 }
 0xb10   :  { %v1361_v47 = vpop.f32.mrf.mxu3  ;;  %1581 = vadd.xlane.f32.xlu2 %v1580_v42  ;;  %v1577_v48 = vsel %vm372_vm2, %v2701_v10, 0.0 }
 0xb11   :  { %v1362_v49 = vadd.f32 %v1361_v47, %v2977_v45  ;;  %1578 = vadd.xlane.f32.xlu0 %v1577_v48  ;;  %v1633_v45 = vmul.f32 %v3423_v16, %v3083_v50 }
 0xb12   :  { %v1467_v57 = vpop.xlane.xlu2 %1466 }
 0xb13   :  { %v1367_v54 = vmax.f32 %v1362_v49, 0.0  ;;  %2702 = vrcp.f32 %v1467_v57 }
 0xb15   :  { %v1877_v52 = vpack.c.bf16 %v1367_v54, %v1366_v51 }
 0xb17   :  { %1885 = vmatpush.bf16.xpose.msrb.mxu1 %v1877_v52 }
 0xb19   :  { %v2703_v59 = vpop.eup %2702 }
 0xb1a   :  { %v1470_v58 = vpop.xlane.xlu1 %1469  ;;  %v1473_v39 = vmul.f32 %v2703_v59, %v2695_v12 }
 0xb1b   :  { %2704 = vrcp.f32 %v1470_v58 }
 0xb1e   :  { %1886 = vmatmul.bf16.vlgmr.msrb.gmra.mxu1 %v1877_v52 }
 0xb21   :  { %v2705_v43 = vpop.eup %2704 }
 0xb22   :  { %v1474_v41 = vmul.f32 %v2705_v43, %v2697_v14  ;;  %v1903_v14 = vsel %vm325_vm0, %v1899_v11, 0.0 }
 0xb24   :  { %v1475_v4 = vpack.c.bf16 %v1474_v41, %v1473_v39 }
 0xb25   :  { %1589 = vrot.lane.b32.xlu0 %v3441_v36, %s2823_s3 }
 0xb26   :  { %2526 = vmatmul.msk.bf16.vlgmr.msrb.gmra.mxu2 %vm372_vm2, %v1475_v4 }
 0xb28   :  { %1649 = vrot.lane.b32.xlu2 %v3423_v16, %s2825_s21 }
 0xb2d   :  { %1637 = vrot.lane.b32.xlu0 %v1633_v45, %s2825_s21 }
 0xb32   :  { %v1652_v26 = vpop.permute.xlu1 %1651 }
 0xb33   :  { %2535 = vmatpush.xpose.msk.msrb.mxu3 %vm325_vm0, %v1652_v26 }
 0xb3a   :  { %v1640_v0 = vpop.permute.xlu1 %1639 }
 0xb3b   :  { %v1646_v1 = vsel %vm325_vm0, %v1640_v0, 0.0 }
 0xb57   :  { %1647 = vadd.xlane.f32.xlu0 %v1646_v1 }
 0xb83   :  { %v1582_v35 = vpop.xlane.xlu2 %1581 }
 0xb84   :  { %v1579_v3 = vpop.xlane.xlu0 %1578  ;;  %2706 = vrcp.f32 %v1582_v35 }
 0xb85   :  { %2708 = vrcp.f32 %v1579_v3 }
 0xb8a   :  { %v2707_v63 = vpop.eup %2706 }
 0xb8b   :  { %v1650_v29 = vpop.permute.xlu2 %1649  ;;  %v2709_v5 = vpop.eup %2708  ;;  %v1586_v44 = vmul.f32 %v2707_v63, %v2699_v53 }
 0xb8c   :  { %2536 = vmatpush.xpose.msk.msrb.mxu3 %vm325_vm0, %v1650_v29  ;;  %v1585_v2 = vmul.f32 %v2709_v5, %v2701_v10  ;;  %v2821_v29 = vld [vmem:[%s3831_s1 + $0x18] sm:$0xff] }
 0xb8e   :  { %v1587_v7 = vpack.c.bf16 %v1586_v44, %v1585_v2 }
 0xb8f   :  { %2537 = vmatmul.msk.f32.vlgmr.msrb.gmra.mxu3 %vm325_vm0, %v3102_v60 }
 0xb97   :  { %v1590_v8 = vpop.permute.xlu0 %1589 }
 0xb98   :  { %1602 = vmatpush.bf16.msra.mxu2 %v1590_v8 }
 0xb9b   :  { %2532 = vmatmul.msk.bf16.vlgmr.msra.gmra.mxu2 %vm372_vm2, %v1587_v7  ;;  %v1887_v4 = vpop.f32.mrf.mxu1 }
 0xb9c   :  { %2547 = vmatpush.xpose.msk.msrb.mxu2 %vm325_vm0, %v3539_v9 }
 0xb9f   :  { %v1638_v12 = vpop.permute.xlu0 %1637 }
 0xba0   :  { %2548 = vmatpush.xpose.msk.msrb.mxu2 %vm325_vm0, %v3517_v21  ;;  %v1643_v20 = vsel %vm325_vm0, %v1638_v12, 0.0  ;;  %v1902_v12 = vpop.xlane.xlu1 %1901 }
 0xba1   :  { %1644 = vadd.xlane.f32.xlu2 %v1643_v20 }
 0xba3   :  { %v1889_v26 = vpop.f32.mrf.mxu1 }
 0xba4   :  { %v1893_v0 = vmul.f32 0.088388346, %v1889_v26 }
 0xba6   :  { %v3569_v63 = vadd.f32 %v2821_v29, %v1893_v0 }
 0xba8   :  { %vm1897_vm13 = vcmp.gt.f32.partialorder %v3569_v63, 0.0 }
 0xba9   :  { %1904 = vadd.xlane.f32.xlu2 %v1903_v14  ;;  %v1489_v15 = vpop.f32.mrf.mxu2 }
 0xbaa   :  { %v1496_v17 = vmin.f32 %v1489_v15, 0.0  ;;  %vm1494_vm3 = vcmp.gt.f32.partialorder %v1489_v15, 0.0 }
 0xbab   :  { %2549 = vmatmul.msk.f32.vlgmr.msrb.gmra.mxu2 %vm325_vm0, %v3448_v55 }
 0xbac   :  { %v1498_v24 = vmul.f32 1.442695, %v1496_v17 }
 0xbae   :  { %2710 = vpow2.f32 %v1498_v24 }
 0xbb1   :  { %v1491_v25 = vpop.f32.mrf.mxu2 }
 0xbb2   :  { %v1497_v18 = vmin.f32 %v1491_v25, 0.0  ;;  %vm1495_vm9 = vcmp.gt.f32.partialorder %v1491_v25, 0.0 }
 0xbb4   :  { %v2711_v27 = vpop.eup %2710  ;;  %v1500_v28 = vmul.f32 1.442695, %v1497_v18  ;;  %v1892_v18 = vmul.f32 0.088388346, %v1887_v4 }
 0xbb5   :  { %v2527_v32 = vadd.f32 -1.0, %v2711_v27 }
 0xbb6   :  { %2712 = vpow2.f32 %v1500_v28 }
 0xbb7   :  { %v1504_v30 = vsel %vm1494_vm3, %v1489_v15, %v2527_v32 }
 0xbb8   :  { %v1506_v31 = vadd.f32 %v1504_v30, %v3368_v62 }
 0xbba   :  { %1508 = vst.msk [vmem:[#allocation2] sm:$0xff] %vm325_vm0, %v1506_v31  ;;  %v2822_v31 = vld [vmem:[%s3831_s1 + $0x10] sm:$0xff] }
 0xbbc   :  { %v2713_v33 = vpop.eup %2712 }
 0xbbd   :  { %v2528_v37 = vadd.f32 -1.0, %v2713_v33  ;;  %v3581_v33 = vadd.f32 %v2822_v31, %v1892_v18 }
 0xbbf   :  { %v1505_v53 = vsel %vm1495_vm9, %v1491_v25, %v2528_v37  ;;  %vm1896_vm8 = vcmp.gt.f32.partialorder %v3581_v33, 0.0 }
 0xbc0   :  { %v1507_v55 = vadd.f32 %v1505_v53, %v3370_v22 }
 0xbc2   :  { %1509 = vst.msk [vmem:[#allocation2 + $0x8] sm:$0xff] %vm325_vm0, %v1507_v55 }
 0xbca   :  { %v1648_v42 = vpop.xlane.xlu0 %1647 }
 0xc12   :  { %v1674_v10 = vpop.f32.mrf.mxu3 }
 0xc13   :  { %v1677_v38 = vperm.slane %v1674_v10, 0 }
 0xc14   :  { %v1645_v47 = vpop.xlane.xlu2 %1644 }
 0xc15   :  { %v1679_v48 = vadd.f32 %v1677_v38, %v1648_v42  ;;  %v1678_v49 = vadd.f32 %v1677_v38, %v1645_v47 }
 0xc17   :  { %v1682_v51 = vmul.f32 0.2, %v1678_v49  ;;  %vm1680_vm10 = vcmp.gt.f32.partialorder %v1678_v49, 0.0  ;;  %vm1681_vm11 = vcmp.gt.f32.partialorder %v1679_v48, 0.0  ;;  %v1683_v54 = vmul.f32 0.2, %v1679_v48 }
 0xc19   :  { %v1684_v52 = vsel %vm1680_vm10, %v1678_v49, %v1682_v51  ;;  %v1685_v57 = vsel %vm1681_vm11, %v1679_v48, %v1683_v54  ;;  %v1755_v54 = vmul.f32 %v3423_v16, %v3090_v56 }
 0xc1a   :  { %v1686_v58 = vsel %vm1406_vm1, %v1684_v52, -1e+09  ;;  %v1687_v59 = vsel %vm1407_vm7, %v1685_v57, -1e+09  ;;  %v2000_v52 = vmul.f32 %v3517_v21, %v3029_v40  ;;  %v1756_v57 = vmul.f32 %v3426_v13, %v3090_v56 }
 0xc1b   :  { %v1688_v43 = vsel %vm372_vm2, %v1686_v58, -inf  ;;  %v1691_v39 = vsel %vm372_vm2, %v1687_v59, -inf }
 0xc1c   :  { %1689 = vmax.xlane.f32.xlu0 %v1688_v43  ;;  %1692 = vmax.xlane.f32.xlu1 %v1691_v39  ;;  %v1905_v3 = vpop.xlane.xlu2 %1904 }
 0xc1e   :  { %v3562_v41 = vpop.f32.mrf.mxu2 }
 0xc26   :  { %v3564_v45 = vpop.f32.mrf.mxu2 }
 0xc2e   :  { %v1929_v1 = vpop.f32.mrf.mxu2 }
 0xc2f   :  { %v1932_v35 = vperm.slane %v1929_v1, 0 }
 0xc31   :  { %v1934_v5 = vadd.f32 %v1932_v35, %v1905_v3  ;;  %v1933_v25 = vadd.f32 %v1932_v35, %v1902_v12 }
 0xc33   :  { %vm1936_vm12 = vcmp.gt.f32.partialorder %v1934_v5, 0.0  ;;  %v1938_v44 = vmul.f32 0.2, %v1934_v5  ;;  %v1937_v28 = vmul.f32 0.2, %v1933_v25  ;;  %vm1935_vm6 = vcmp.gt.f32.partialorder %v1933_v25, 0.0 }
 0xc35   :  { %v1940_v2 = vsel %vm1936_vm12, %v1934_v5, %v1938_v44  ;;  %v1939_v53 = vsel %vm1935_vm6, %v1933_v25, %v1937_v28  ;;  %vm1610_vm6 = vcmp.gt.f32.partialorder %v3564_v45, 0.0 }
 0xc36   :  { %v1942_v8 = vsel %vm1897_vm13, %v1940_v2, -1e+09  ;;  %v1941_v55 = vsel %vm1896_vm8, %v1939_v53, -1e+09  ;;  %v3631_v2 = vpack.c.bf16 %v3539_v9, %v3517_v21 }
 0xc37   :  { %v1946_v7 = vsel %vm372_vm2, %v1942_v8, -inf  ;;  %v1943_v10 = vsel %vm372_vm2, %v1941_v55, -inf }
 0xc38   :  { %1947 = vmax.xlane.f32.xlu0 %v1946_v7 }
 0xc4c   :  { %1773 = vrot.lane.b32.xlu0 %v3426_v13, %s2824_s20 }
 0xc8f   :  { %v1690_v20 = vpop.xlane.xlu0 %1689  ;;  %v1693_v11 = vpop.xlane.xlu1 %1692 }
 0xc90   :  { %v1694_v14 = vsub.f32 %v1686_v58, %v1690_v20  ;;  %v1695_v15 = vsub.f32 %v1687_v59, %v1693_v11  ;;  %v2123_v58 = vmul.f32 %v3517_v21, %v3083_v50  ;;  %v2245_v59 = vmul.f32 %v3517_v21, %v3090_v56 }
 0xc91   :  { %v2001_v11 = vmul.f32 %v3539_v9, %v3029_v40 }
 0xc92   :  { %v1696_v17 = vmul.f32 1.442695, %v1694_v14  ;;  %v1698_v24 = vmul.f32 1.442695, %v1695_v15 }
 0xc94   :  { %2714 = vpow2.f32 %v1696_v17 }
 0xc95   :  { %2716 = vpow2.f32 %v1698_v24 }
 0xc9a   :  { %v2715_v27 = vpop.eup %2714 }
 0xc9b   :  { %v2717_v32 = vpop.eup %2716  ;;  %v1700_v30 = vsel %vm372_vm2, %v2715_v27, 0.0 }
 0xc9c   :  { %1701 = vadd.xlane.f32.xlu1 %v1700_v30  ;;  %v1703_v37 = vsel %vm372_vm2, %v2717_v32, 0.0 }
 0xc9d   :  { %1704 = vadd.xlane.f32.xlu2 %v1703_v37 }
 0xca5   :  { %1944 = vmax.xlane.f32.xlu2 %v1943_v10 }
 0xcab   :  { %v1948_v38 = vpop.xlane.xlu0 %1947 }
 0xcac   :  { %v1950_v47 = vsub.f32 %v1942_v8, %v1948_v38 }
 0xcae   :  { %v1953_v48 = vmul.f32 1.442695, %v1950_v47 }
 0xcb0   :  { %2718 = vpow2.f32 %v1953_v48 }
 0xcb5   :  { %1711 = vrot.lane.b32.xlu1 %v3441_v36, %s2825_s21 }
 0xcb6   :  { %v3599_v49 = vpop.eup %2718 }
 0xcb7   :  { %v1958_v51 = vsel %vm372_vm2, %v3599_v49, 0.0 }
 0xcbd   :  { %1771 = vrot.lane.b32.xlu2 %v3423_v16, %s2824_s20  ;;  %v2246_v16 = vmul.f32 %v3539_v9, %v3090_v56 }
 0xcbe   :  { %v1774_v42 = vpop.permute.xlu0 %1773 }
 0xcbf   :  { %2541 = vmatpush.xpose.msk.msra.mxu3 %vm325_vm0, %v1774_v42 }
 0xcc5   :  { %2018 = vrot.lane.b32.xlu2 %v3539_v9, %s2823_s3 }
 0xccd   :  { %2016 = vrot.lane.b32.xlu2 %v3517_v21, %s2823_s3 }
 0xcd5   :  { %2141 = vrot.lane.b32.xlu2 %v3539_v9, %s2825_s21 }
 0xcdd   :  { %2139 = vrot.lane.b32.xlu2 %v3517_v21, %s2825_s21 }
 0xcdf   :  { %1959 = vadd.xlane.f32.xlu1 %v1958_v51 }
 0xce5   :  { %2263 = vrot.lane.b32.xlu2 %v3539_v9, %s2824_s20 }
 0xced   :  { %1759 = vrot.lane.b32.xlu2 %v1755_v54, %s2824_s20 }
 0xcf5   :  { %2004 = vrot.lane.b32.xlu2 %v2000_v52, %s2823_s3 }
 0xcf8   :  { %1761 = vrot.lane.b32.xlu1 %v1756_v57, %s2824_s20 }
 0xcfd   :  { %2127 = vrot.lane.b32.xlu2 %v2123_v58, %s2825_s21 }
 0xd00   :  { %2251 = vrot.lane.b32.xlu1 %v2246_v16, %s2824_s20 }
 0xd05   :  { %2249 = vrot.lane.b32.xlu2 %v2245_v59, %s2824_s20 }
 0xd0f   :  { %v1702_v39 = vpop.xlane.xlu1 %1701 }
 0xd10   :  { %v1705_v43 = vpop.xlane.xlu2 %1704  ;;  %2720 = vrcp.f32 %v1702_v39 }
 0xd11   :  { %2722 = vrcp.f32 %v1705_v43 }
 0xd16   :  { %v2721_v1 = vpop.eup %2720 }
 0xd17   :  { %v2723_v35 = vpop.eup %2722  ;;  %v1708_v5 = vmul.f32 %v2721_v1, %v2715_v27 }
 0xd18   :  { %v1945_v13 = vpop.xlane.xlu2 %1944  ;;  %v1709_v56 = vmul.f32 %v2723_v35, %v2717_v32 }
 0xd19   :  { %v1949_v4 = vsub.f32 %v1941_v55, %v1945_v13 }
 0xd1a   :  { %v1710_v7 = vpack.c.bf16 %v1709_v56, %v1708_v5 }
 0xd1b   :  { %v1951_v26 = vmul.f32 1.442695, %v1949_v4 }
 0xd1d   :  { %2724 = vpow2.f32 %v1951_v26 }
 0xd20   :  { %v1772_v0 = vpop.permute.xlu2 %1771 }
 0xd21   :  { %2542 = vmatpush.xpose.msk.msra.mxu3 %vm325_vm0, %v1772_v0 }
 0xd23   :  { %v2725_v3 = vpop.eup %2724 }
 0xd24   :  { %v1955_v29 = vsel %vm372_vm2, %v2725_v3, 0.0  ;;  %2543 = vmatmul.msk.f32.vlgmr.msra.gmra.mxu3 %vm325_vm0, %v3105_v61 }
 0xd25   :  { %1956 = vadd.xlane.f32.xlu0 %v1955_v29 }
 0xd27   :  { %v1712_v44 = vpop.permute.xlu1 %1711 }
 0xd28   :  { %v2019_v8 = vpop.permute.xlu2 %2018  ;;  %1724 = vmatpush.bf16.msra.mxu0 %v1712_v44 }
 0xd29   :  { %2553 = vmatpush.xpose.msk.msra.mxu2 %vm325_vm0, %v2019_v8 }
 0xd2b   :  { %2538 = vmatmul.msk.bf16.vlgmr.msra.gmra.mxu0 %vm372_vm2, %v1710_v7 }
 0xd2c   :  { %1977 = vmatpush.bf16.msrb.mxu0 %v3631_v2 }
 0xd30   :  { %v2017_v12 = vpop.permute.xlu2 %2016 }
 0xd31   :  { %2554 = vmatpush.xpose.msk.msra.mxu2 %vm325_vm0, %v2017_v12 }
 0xd34   :  { %2555 = vmatmul.msk.f32.vlgmr.msra.gmra.mxu2 %vm325_vm0, %v3039_v46  ;;  %v2124_v46 = vmul.f32 %v3539_v9, %v3083_v50 }
 0xd38   :  { %v2142_v20 = vpop.permute.xlu2 %2141 }
 0xd39   :  { %2261 = vrot.lane.b32.xlu0 %v3517_v21, %s2824_s20  ;;  %2559 = vmatpush.xpose.msk.msra.mxu1 %vm325_vm0, %v2142_v20 }
 0xd40   :  { %v2140_v14 = vpop.permute.xlu2 %2139 }
 0xd41   :  { %2006 = vrot.lane.b32.xlu0 %v2001_v11, %s2823_s3  ;;  %2560 = vmatpush.xpose.msk.msra.mxu1 %vm325_vm0, %v2140_v14 }
 0xd44   :  { %2561 = vmatmul.msk.f32.vlgmr.msra.gmra.mxu1 %vm325_vm0, %v3102_v60 }
 0xd48   :  { %v2264_v15 = vpop.permute.xlu2 %2263 }
 0xd49   :  { %2129 = vrot.lane.b32.xlu0 %v2124_v46, %s2825_s21  ;;  %2565 = vmatpush.xpose.msk.msra.mxu0 %vm325_vm0, %v2264_v15 }
 0xd50   :  { %v1760_v21 = vpop.permute.xlu2 %1759 }
 0xd51   :  { %v1765_v60 = vsel %vm325_vm0, %v1760_v21, 0.0 }
 0xd52   :  { %v1960_v24 = vpop.xlane.xlu1 %1959 }
 0xd53   :  { %2726 = vrcp.f32 %v1960_v24 }
 0xd58   :  { %v2005_v17 = vpop.permute.xlu2 %2004 }
 0xd59   :  { %v2010_v40 = vsel %vm325_vm0, %v2005_v17, 0.0  ;;  %v2727_v30 = vpop.eup %2726 }
 0xd5a   :  { %2011 = vadd.xlane.f32.xlu1 %v2010_v40  ;;  %v1964_v37 = vmul.f32 %v2727_v30, %v3599_v49 }
 0xd60   :  { %v2128_v27 = vpop.permute.xlu2 %2127 }
 0xd61   :  { %v2133_v50 = vsel %vm325_vm0, %v2128_v27, 0.0 }
 0xd68   :  { %v2250_v47 = vpop.permute.xlu2 %2249 }
 0xd69   :  { %v2255_v49 = vsel %vm325_vm0, %v2250_v47, 0.0  ;;  %v1612_v47 = vmin.f32 %v3564_v45, 0.0 }
 0xd6a   :  { %v1762_v25 = vpop.permute.xlu1 %1761 }
 0xd6b   :  { %v1768_v18 = vsel %vm325_vm0, %v1762_v25, 0.0 }
 0xd6c   :  { %1769 = vadd.xlane.f32.xlu2 %v1768_v18 }
 0xd72   :  { %v2252_v9 = vpop.permute.xlu1 %2251 }
 0xd73   :  { %1766 = vadd.xlane.f32.xlu0 %v1765_v60  ;;  %v2258_v28 = vsel %vm325_vm0, %v2252_v9, 0.0 }
 0xd74   :  { %2134 = vadd.xlane.f32.xlu2 %v2133_v50 }
 0xd7c   :  { %2259 = vadd.xlane.f32.xlu2 %v2258_v28 }
 0xd98   :  { %v1957_v32 = vpop.xlane.xlu0 %1956 }
 0xd99   :  { %2728 = vrcp.f32 %v1957_v32 }
 0xd9f   :  { %v2729_v31 = vpop.eup %2728 }
 0xda0   :  { %v1963_v53 = vmul.f32 %v2729_v31, %v2725_v3 }
 0xda2   :  { %v1965_v55 = vpack.c.bf16 %v1964_v37, %v1963_v53 }
 0xda4   :  { %2550 = vmatmul.msk.bf16.vlgmr.msrb.gmra.mxu0 %vm372_vm2, %v1965_v55 }
 0xda7   :  { %v1796_v39 = vpop.f32.mrf.mxu3 }
 0xda8   :  { %v1799_v13 = vperm.slane %v1796_v39, 0  ;;  %v3689_v17 = vpop.f32.mrf.mxu0 }
 0xdab   :  { %v2262_v10 = vpop.permute.xlu0 %2261 }
 0xdac   :  { %2566 = vmatpush.xpose.msk.msra.mxu0 %vm325_vm0, %v2262_v10 }
 0xdb0   :  { %v3691_v40 = vpop.f32.mrf.mxu0 }
 0xdb3   :  { %v2007_v38 = vpop.permute.xlu0 %2006 }
 0xdb4   :  { %2567 = vmatmul.msk.f32.vlgmr.msra.gmra.mxu0 %vm325_vm0, %v3105_v61  ;;  %v2013_v42 = vsel %vm325_vm0, %v2007_v38, 0.0 }
 0xdb5   :  { %2014 = vadd.xlane.f32.xlu0 %v2013_v42 }
 0xdb7   :  { %v2041_v54 = vpop.f32.mrf.mxu2 }
 0xdb8   :  { %v2044_v52 = vperm.slane %v2041_v54, 0 }
 0xdbb   :  { %v2130_v48 = vpop.permute.xlu0 %2129 }
 0xdbc   :  { %v2136_v51 = vsel %vm325_vm0, %v2130_v48, 0.0 }
 0xdbd   :  { %2137 = vadd.xlane.f32.xlu1 %v2136_v51  ;;  %2256 = vadd.xlane.f32.xlu0 %v2255_v49 }
 0xdc1   :  { %v2164_v0 = vpop.f32.mrf.mxu1 }
 0xdc2   :  { %v2167_v35 = vperm.slane %v2164_v0, 0 }
 0xdcd   :  { %v2012_v57 = vpop.xlane.xlu1 %2011 }
 0xdce   :  { %v2045_v58 = vadd.f32 %v2044_v52, %v2012_v57  ;;  %v1615_v57 = vmul.f32 1.442695, %v1612_v47 }
 0xdd0   :  { %vm2047_vm14 = vcmp.gt.f32.partialorder %v2045_v58, 0.0  ;;  %v2049_v16 = vmul.f32 0.2, %v2045_v58 }
 0xdd2   :  { %v2051_v59 = vsel %vm2047_vm14, %v2045_v58, %v2049_v16  ;;  %vm1609_vm14 = vcmp.gt.f32.partialorder %v3562_v41, 0.0 }
 0xdd3   :  { %v3667_v61 = vsel %vm1896_vm8, %v2051_v59, -1e+09 }
 0xdd4   :  { %v2055_v43 = vsel %vm372_vm2, %v3667_v61, -inf }
 0xdd5   :  { %2056 = vmax.xlane.f32.xlu2 %v2055_v43  ;;  %v1611_v43 = vmin.f32 %v3562_v41, 0.0 }
 0xdd7   :  { %v1613_v39 = vmul.f32 1.442695, %v1611_v43 }
 0xddf   :  { %v1770_v4 = vpop.xlane.xlu2 %1769 }
 0xde0   :  { %v1801_v26 = vadd.f32 %v1799_v13, %v1770_v4 }
 0xde2   :  { %v1805_v1 = vmul.f32 0.2, %v1801_v26  ;;  %vm1803_vm3 = vcmp.gt.f32.partialorder %v1801_v26, 0.0 }
 0xde4   :  { %v1807_v3 = vsel %vm1803_vm3, %v1801_v26, %v1805_v1  ;;  %vm1731_vm3 = vcmp.gt.f32.partialorder %v3689_v17, 0.0 }
 0xde5   :  { %v3673_v29 = vsel %vm1407_vm7, %v1807_v3, -1e+09 }
 0xde6   :  { %v1767_v56 = vpop.xlane.xlu0 %1766  ;;  %v1813_v5 = vsel %vm372_vm2, %v3673_v29, -inf }
 0xde7   :  { %v1800_v44 = vadd.f32 %v1799_v13, %v1767_v56  ;;  %1814 = vmax.xlane.f32.xlu0 %v1813_v5  ;;  %v2135_v8 = vpop.xlane.xlu2 %2134 }
 0xde8   :  { %v2168_v7 = vadd.f32 %v2167_v35, %v2135_v8 }
 0xde9   :  { %vm1802_vm9 = vcmp.gt.f32.partialorder %v1800_v44, 0.0  ;;  %v1804_v12 = vmul.f32 0.2, %v1800_v44 }
 0xdea   :  { %v2172_v20 = vmul.f32 0.2, %v2168_v7  ;;  %vm2170_vm10 = vcmp.gt.f32.partialorder %v2168_v7, 0.0 }
 0xdeb   :  { %v1806_v11 = vsel %vm1802_vm9, %v1800_v44, %v1804_v12 }
 0xdec   :  { %v3679_v14 = vsel %vm1406_vm1, %v1806_v11, -1e+09  ;;  %v2174_v34 = vsel %vm2170_vm10, %v2168_v7, %v2172_v20 }
 0xded   :  { %v1810_v46 = vsel %vm372_vm2, %v3679_v14, -inf  ;;  %v3685_v15 = vsel %vm1896_vm8, %v2174_v34, -1e+09  ;;  %v1733_v34 = vmin.f32 %v3689_v17, 0.0 }
 0xdee   :  { %1811 = vmax.xlane.f32.xlu1 %v1810_v46  ;;  %v2178_v21 = vsel %vm372_vm2, %v3685_v15, -inf }
 0xdef   :  { %2179 = vmax.xlane.f32.xlu0 %v2178_v21 }
 0xe21   :  { %v1979_v23 = vpop.f32.mrf.mxu0 }
 0xe22   :  { %v1986_v24 = vmin.f32 %v1979_v23, 0.0  ;;  %vm1984_vm7 = vcmp.gt.f32.partialorder %v1979_v23, 0.0 }
 0xe24   :  { %v1988_v25 = vmul.f32 1.442695, %v1986_v24  ;;  %v1735_v24 = vmul.f32 1.442695, %v1733_v34 }
 0xe26   :  { %2730 = vpow2.f32 %v1988_v25 }
 0xe28   :  { %v2015_v18 = vpop.xlane.xlu0 %2014 }
 0xe29   :  { %v2046_v27 = vadd.f32 %v2044_v52, %v2015_v18  ;;  %v1981_v60 = vpop.f32.mrf.mxu0 }
 0xe2a   :  { %v1987_v50 = vmin.f32 %v1981_v60, 0.0  ;;  %vm1985_vm12 = vcmp.gt.f32.partialorder %v1981_v60, 0.0 }
 0xe2b   :  { %vm2048_vm1 = vcmp.gt.f32.partialorder %v2046_v27, 0.0  ;;  %v2050_v9 = vmul.f32 0.2, %v2046_v27 }
 0xe2c   :  { %v2731_v28 = vpop.eup %2730  ;;  %v1990_v32 = vmul.f32 1.442695, %v1987_v50 }
 0xe2d   :  { %v2551_v30 = vadd.f32 -1.0, %v2731_v28  ;;  %v2052_v31 = vsel %vm2048_vm1, %v2046_v27, %v2050_v9 }
 0xe2e   :  { %2732 = vpow2.f32 %v1990_v32  ;;  %v3695_v37 = vsel %vm1897_vm13, %v2052_v31, -1e+09 }
 0xe2f   :  { %v1994_v53 = vsel %vm1984_vm7, %v1979_v23, %v2551_v30  ;;  %v2058_v55 = vsel %vm372_vm2, %v3695_v37, -inf  ;;  %2734 = vpow2.f32 %v1615_v57 }
 0xe30   :  { %v1996_v10 = vadd.f32 %v1994_v53, %v3476_v6  ;;  %2059 = vmax.xlane.f32.xlu1 %v2058_v55  ;;  %v2138_v38 = vpop.xlane.xlu1 %2137  ;;  %2736 = vpow2.f32 %v1613_v39  ;;  %v2257_v3 = vpop.xlane.xlu0 %2256 }
 0xe31   :  { %v2169_v42 = vadd.f32 %v2167_v35, %v2138_v38  ;;  %v2286_v12 = vpop.f32.mrf.mxu0 }
 0xe32   :  { %1998 = vst.msk [vmem:[#allocation2 + $0x10] sm:$0xff] %vm325_vm0, %v1996_v10  ;;  %v2289_v11 = vperm.slane %v2286_v12, 0  ;;  %v1734_v10 = vmin.f32 %v3691_v40, 0.0 }
 0xe33   :  { %vm2171_vm11 = vcmp.gt.f32.partialorder %v2169_v42, 0.0  ;;  %v2173_v48 = vmul.f32 0.2, %v2169_v42 }
 0xe34   :  { %v2733_v51 = vpop.eup %2732  ;;  %v2290_v46 = vadd.f32 %v2289_v11, %v2257_v3  ;;  %v1737_v38 = vmul.f32 1.442695, %v1734_v10 }
 0xe35   :  { %v2552_v49 = vadd.f32 -1.0, %v2733_v51  ;;  %v2175_v54 = vsel %vm2171_vm11, %v2169_v42, %v2173_v48  ;;  %v2735_v13 = vpop.eup %2734 }
 0xe36   :  { %v3704_v52 = vsel %vm1897_vm13, %v2175_v54, -1e+09  ;;  %v2534_v4 = vadd.f32 -1.0, %v2735_v13  ;;  %v2737_v26 = vpop.eup %2736  ;;  %v2294_v25 = vmul.f32 0.2, %v2290_v46 }
 0xe37   :  { %v1995_v58 = vsel %vm1985_vm12, %v1981_v60, %v2552_v49  ;;  %v2181_v16 = vsel %vm372_vm2, %v3704_v52, -inf  ;;  %v2533_v1 = vadd.f32 -1.0, %v2737_v26 }
 0xe38   :  { %v1997_v59 = vadd.f32 %v1995_v58, %v3478_v19  ;;  %2182 = vmax.xlane.f32.xlu2 %v2181_v16  ;;  %v1620_v0 = vsel %vm1610_vm6, %v3564_v45, %v2534_v4  ;;  %v2260_v45 = vpop.xlane.xlu2 %2259 }
 0xe39   :  { %v1619_v35 = vsel %vm1609_vm14, %v3562_v41, %v2533_v1  ;;  %v2291_v51 = vadd.f32 %v2289_v11, %v2260_v45 }
 0xe3a   :  { %1999 = vst.msk [vmem:[#allocation2 + $0x18] sm:$0xff] %vm325_vm0, %v1997_v59  ;;  %vm2292_vm0 = vcmp.gt.f32.partialorder %v2290_v46, 0.0 }
 0xe3b   :  { %v2296_v50 = vsel %vm2292_vm0, %v2290_v46, %v2294_v25  ;;  %vm2293_vm9 = vcmp.gt.f32.partialorder %v2291_v51, 0.0 }
 0xe3c   :  { %v3734_v28 = vsel %vm1896_vm8, %v2296_v50, -1e+09  ;;  %vm1732_vm8 = vcmp.gt.f32.partialorder %v3691_v40, 0.0 }
 0xe3d   :  { %v2300_v32 = vsel %vm372_vm2, %v3734_v28, -inf }
 0xe48   :  { %v2057_v21 = vpop.xlane.xlu2 %2056 }
 0xe49   :  { %1625 = vrot.lane.b32.xlu1 %v1620_v0, %s2824_s20 }
 0xe50   :  { %1623 = vrot.lane.b32.xlu2 %v1619_v35, %s2824_s20 }
 0xe58   :  { %1833 = vrot.lane.b32.xlu2 %v3441_v36, %s2824_s20 }
 0xe5a   :  { %v1815_v56 = vpop.xlane.xlu0 %1814 }
 0xe5b   :  { %v1817_v5 = vsub.f32 %v3673_v29, %v1815_v56 }
 0xe5d   :  { %v1820_v20 = vmul.f32 1.442695, %v1817_v5 }
 0xe61   :  { %v1812_v44 = vpop.xlane.xlu1 %1811 }
 0xe62   :  { %v1816_v8 = vsub.f32 %v3679_v14, %v1812_v44  ;;  %v2180_v29 = vpop.xlane.xlu0 %2179  ;;  %v2061_v14 = vsub.f32 %v3667_v61, %v2057_v21 }
 0xe63   :  { %v2184_v18 = vsub.f32 %v3685_v15, %v2180_v29 }
 0xe64   :  { %v1818_v7 = vmul.f32 1.442695, %v1816_v8  ;;  %v2063_v60 = vmul.f32 1.442695, %v2061_v14 }
 0xe65   :  { %v2186_v9 = vmul.f32 1.442695, %v2184_v18 }
 0xe66   :  { %2738 = vpow2.f32 %v1818_v7 }
 0xe67   :  { %2740 = vpow2.f32 %v1820_v20 }
 0xe68   :  { %2742 = vpow2.f32 %v1735_v24 }
 0xe69   :  { %2744 = vpow2.f32 %v2063_v60 }
 0xe6a   :  { %2746 = vpow2.f32 %v2186_v9 }
 0xe6b   :  { %2748 = vpow2.f32 %v1737_v38 }
 0xe6c   :  { %v3721_v41 = vpop.eup %2738 }
 0xe6d   :  { %v1822_v36 = vsel %vm372_vm2, %v3721_v41, 0.0  ;;  %v3726_v23 = vpop.eup %2740 }
 0xe6e   :  { %1823 = vadd.xlane.f32.xlu0 %v1822_v36  ;;  %v1825_v27 = vsel %vm372_vm2, %v3726_v23, 0.0  ;;  %v2743_v61 = vpop.eup %2742 }
 0xe6f   :  { %v3738_v15 = vpop.eup %2744  ;;  %v2539_v30 = vadd.f32 -1.0, %v2743_v61 }
 0xe70   :  { %v3740_v31 = vpop.eup %2746  ;;  %v2067_v53 = vsel %vm372_vm2, %v3738_v15, 0.0 }
 0xe71   :  { %v1741_v33 = vsel %vm1731_vm3, %v3689_v17, %v2539_v30  ;;  %v2190_v55 = vsel %vm372_vm2, %v3740_v31, 0.0  ;;  %v2749_v42 = vpop.eup %2748  ;;  %v2295_v17 = vmul.f32 0.2, %v2291_v51 }
 0xe72   :  { %v2540_v47 = vadd.f32 -1.0, %v2749_v42 }
 0xe73   :  { %1826 = vadd.xlane.f32.xlu1 %v1825_v27  ;;  %v2297_v57 = vsel %vm2293_vm9, %v2291_v51, %v2295_v17 }
 0xe74   :  { %v1742_v48 = vsel %vm1732_vm8, %v3691_v40, %v2540_v47  ;;  %v2299_v16 = vsel %vm1897_vm13, %v2297_v57, -1e+09 }
 0xe75   :  { %v2303_v43 = vsel %vm372_vm2, %v2299_v16, -inf }
 0xe7b   :  { %2301 = vmax.xlane.f32.xlu1 %v2300_v32 }
 0xe81   :  { %2068 = vadd.xlane.f32.xlu2 %v2067_v53 }
 0xe82   :  { %1745 = vrot.lane.b32.xlu0 %v1741_v33, %s2825_s21 }
 0xe83   :  { %2191 = vadd.xlane.f32.xlu1 %v2190_v55 }
 0xe99   :  { %1747 = vrot.lane.b32.xlu2 %v1742_v48, %s2825_s21 }
 0xea3   :  { %v2060_v49 = vpop.xlane.xlu1 %2059 }
 0xea4   :  { %v2062_v54 = vsub.f32 %v3695_v37, %v2060_v49 }
 0xea6   :  { %v2065_v58 = vmul.f32 1.442695, %v2062_v54 }
 0xea8   :  { %2750 = vpow2.f32 %v2065_v58 }
 0xeab   :  { %v2183_v59 = vpop.xlane.xlu2 %2182 }
 0xeac   :  { %v2185_v39 = vsub.f32 %v3704_v52, %v2183_v59  ;;  %2304 = vmax.xlane.f32.xlu0 %v2303_v43 }
 0xeae   :  { %v2188_v40 = vmul.f32 1.442695, %v2185_v39  ;;  %v2751_v13 = vpop.eup %2750 }
 0xeaf   :  { %v2070_v26 = vsel %vm372_vm2, %v2751_v13, 0.0 }
 0xeb0   :  { %2752 = vpow2.f32 %v2188_v40 }
 0xeb3   :  { %v1624_v4 = vpop.permute.xlu2 %1623 }
 0xeb4   :  { %v1629_v37 = vadd.f32 %v1624_v4, %v3368_v62  ;;  %2071 = vadd.xlane.f32.xlu0 %v2070_v26 }
 0xeb6   :  { %1631 = vst.msk [vmem:[#allocation2] sm:$0xff] %vm559_vm15, %v1629_v37  ;;  %v3761_v63 = vpop.eup %2752 }
 0xeb7   :  { %v2193_v35 = vsel %vm372_vm2, %v3761_v63, 0.0 }
 0xebb   :  { %v1834_v0 = vpop.permute.xlu2 %1833  ;;  %v1626_v1 = vpop.permute.xlu1 %1625 }
 0xebc   :  { %v1630_v52 = vadd.f32 %v1626_v1, %v3370_v22  ;;  %1846 = vmatpush.bf16.msrb.mxu3 %v1834_v0  ;;  %2194 = vadd.xlane.f32.xlu0 %v2193_v35 }
 0xebe   :  { %1632 = vst.msk [vmem:[#allocation2 + $0x8] sm:$0xff] %vm559_vm15, %v1630_v52 }
 0xed0   :  { %2079 = vrot.lane.b32.xlu0 %v3631_v2, %s2823_s3 }
 0xee1   :  { %v1824_v3 = vpop.xlane.xlu0 %1823 }
 0xee2   :  { %2754 = vrcp.f32 %v1824_v3 }
 0xee6   :  { %v1827_v56 = vpop.xlane.xlu1 %1826 }
 0xee7   :  { %2756 = vrcp.f32 %v1827_v56 }
 0xee8   :  { %v2755_v5 = vpop.eup %2754 }
 0xee9   :  { %v1830_v8 = vmul.f32 %v2755_v5, %v3721_v41 }
 0xeed   :  { %v2757_v44 = vpop.eup %2756 }
 0xeee   :  { %v1831_v45 = vmul.f32 %v2757_v44, %v3726_v23  ;;  %v2302_v7 = vpop.xlane.xlu1 %2301 }
 0xeef   :  { %v2306_v12 = vsub.f32 %v3734_v28, %v2302_v7 }
 0xef0   :  { %v1832_v20 = vpack.c.bf16 %v1831_v45, %v1830_v8 }
 0xef1   :  { %v2308_v11 = vmul.f32 1.442695, %v2306_v12 }
 0xef2   :  { %2544 = vmatmul.msk.bf16.vlgmr.msrb.gmra.mxu3 %vm372_vm2, %v1832_v20 }
 0xef3   :  { %2758 = vpow2.f32 %v2308_v11 }
 0xef4   :  { %v2069_v34 = vpop.xlane.xlu2 %2068  ;;  %v1746_v46 = vpop.permute.xlu0 %1745 }
 0xef5   :  { %v1751_v21 = vadd.f32 %v1746_v46, %v3368_v62 }
 0xef6   :  { %v2192_v55 = vpop.xlane.xlu1 %2191 }
 0xef7   :  { %1753 = vst.msk [vmem:[#allocation2] sm:$0xff] %vm690_vm4, %v1751_v21 }
 0xef9   :  { %v2759_v36 = vpop.eup %2758 }
 0xefa   :  { %v2312_v29 = vsel %vm372_vm2, %v2759_v36, 0.0 }
 0xefb   :  { %2313 = vadd.xlane.f32.xlu1 %v2312_v29 }
 0xefc   :  { %v1748_v41 = vpop.permute.xlu2 %1747 }
 0xefd   :  { %v1752_v23 = vadd.f32 %v1748_v41, %v3370_v22 }
 0xeff   :  { %1754 = vst.msk [vmem:[#allocation2 + $0x8] sm:$0xff] %vm690_vm4, %v1752_v23 }
 0xf14   :  { %2201 = vrot.lane.b32.xlu1 %v3631_v2, %s2825_s21 }
 0xf1f   :  { %v2305_v14 = vpop.xlane.xlu0 %2304 }
 0xf20   :  { %v2307_v24 = vsub.f32 %v2299_v16, %v2305_v14 }
 0xf22   :  { %v2310_v25 = vmul.f32 1.442695, %v2307_v24 }
 0xf24   :  { %2760 = vpow2.f32 %v2310_v25 }
 0xf27   :  { %v2072_v60 = vpop.xlane.xlu0 %2071 }
 0xf28   :  { %2762 = vrcp.f32 %v2072_v60 }
 0xf29   :  { %2764 = vrcp.f32 %v2069_v34 }
 0xf2a   :  { %v2761_v18 = vpop.eup %2760 }
 0xf2b   :  { %v2315_v27 = vsel %vm372_vm2, %v2761_v18, 0.0 }
 0xf2c   :  { %2316 = vadd.xlane.f32.xlu2 %v2315_v27 }
 0xf2e   :  { %v2763_v9 = vpop.eup %2762 }
 0xf2f   :  { %v2195_v50 = vpop.xlane.xlu0 %2194  ;;  %v2765_v28 = vpop.eup %2764  ;;  %v2076_v61 = vmul.f32 %v2763_v9, %v2751_v13 }
 0xf30   :  { %v2075_v32 = vmul.f32 %v2765_v28, %v3738_v15 }
 0xf32   :  { %v2077_v53 = vpack.c.bf16 %v2076_v61, %v2075_v32 }
 0xf42   :  { %v2080_v30 = vpop.permute.xlu0 %2079 }
 0xf43   :  { %2092 = vmatpush.bf16.msra.mxu3 %v2080_v30 }
 0xf44   :  { %2323 = vrot.lane.b32.xlu2 %v3631_v2, %s2824_s20 }
 0xf46   :  { %2556 = vmatmul.msk.bf16.vlgmr.msra.gmra.mxu3 %vm372_vm2, %v2077_v53 }
 0xf6e   :  { %v2314_v47 = vpop.xlane.xlu1 %2313 }
 0xf75   :  { %v1848_v33 = vpop.f32.mrf.mxu3 }
 0xf76   :  { %v1855_v10 = vmin.f32 %v1848_v33, 0.0  ;;  %vm1853_vm13 = vcmp.gt.f32.partialorder %v1848_v33, 0.0 }
 0xf78   :  { %v1857_v38 = vmul.f32 1.442695, %v1855_v10 }
 0xf7a   :  { %2766 = vpow2.f32 %v1857_v38 }
 0xf7b   :  { %2768 = vrcp.f32 %v2195_v50 }
 0xf7c   :  { %2770 = vrcp.f32 %v2192_v55 }
 0xf7d   :  { %v1850_v42 = vpop.f32.mrf.mxu3 }
 0xf7e   :  { %v1856_v48 = vmin.f32 %v1850_v42, 0.0  ;;  %vm1854_vm10 = vcmp.gt.f32.partialorder %v1850_v42, 0.0 }
 0xf80   :  { %v2767_v51 = vpop.eup %2766  ;;  %v1859_v15 = vmul.f32 1.442695, %v1856_v48 }
 0xf81   :  { %v2769_v17 = vpop.eup %2768  ;;  %v2545_v49 = vadd.f32 -1.0, %v2767_v51 }
 0xf82   :  { %2772 = vpow2.f32 %v1859_v15  ;;  %v2771_v54 = vpop.eup %2770  ;;  %v2199_v57 = vmul.f32 %v2769_v17, %v3761_v63 }
 0xf83   :  { %v1863_v2 = vsel %vm1853_vm13, %v1848_v33, %v2545_v49  ;;  %v2198_v58 = vmul.f32 %v2771_v54, %v3740_v31  ;;  %2774 = vrcp.f32 %v2314_v47 }
 0xf84   :  { %1867 = vrot.lane.b32.xlu0 %v1863_v2, %s2823_s3 }
 0xf85   :  { %v2200_v43 = vpack.c.bf16 %v2199_v57, %v2198_v58 }
 0xf86   :  { %v2202_v16 = vpop.permute.xlu1 %2201 }
 0xf87   :  { %2214 = vmatpush.bf16.msrb.mxu2 %v2202_v16 }
 0xf88   :  { %v2773_v59 = vpop.eup %2772 }
 0xf89   :  { %v2546_v39 = vadd.f32 -1.0, %v2773_v59  ;;  %v2775_v4 = vpop.eup %2774 }
 0xf8a   :  { %2562 = vmatmul.msk.bf16.vlgmr.msrb.gmra.mxu2 %vm372_vm2, %v2200_v43  ;;  %v2320_v37 = vmul.f32 %v2775_v4, %v2759_v36 }
 0xf8b   :  { %v1864_v40 = vsel %vm1854_vm10, %v1850_v42, %v2546_v39 }
 0xf8c   :  { %1869 = vrot.lane.b32.xlu0 %v1864_v40, %s2823_s3 }
 0xf9f   :  { %v2317_v13 = vpop.xlane.xlu2 %2316 }
 0xfa0   :  { %2776 = vrcp.f32 %v2317_v13 }
 0xfa6   :  { %v2777_v26 = vpop.eup %2776 }
 0xfa7   :  { %v2321_v63 = vmul.f32 %v2777_v26, %v2761_v18  ;;  %v2324_v0 = vpop.permute.xlu2 %2323 }
 0xfa8   :  { %2336 = vmatpush.bf16.msrb.mxu1 %v2324_v0 }
 0xfa9   :  { %v2322_v31 = vpack.c.bf16 %v2321_v63, %v2320_v37 }
 0xfab   :  { %2568 = vmatmul.msk.bf16.vlgmr.msrb.gmra.mxu1 %vm372_vm2, %v2322_v31 }
 0xfc9   :  { %v2094_v1 = vpop.f32.mrf.mxu3 }
 0xfca   :  { %v2101_v35 = vmin.f32 %v2094_v1, 0.0  ;;  %vm2099_vm1 = vcmp.gt.f32.partialorder %v2094_v1, 0.0 }
 0xfcc   :  { %v2103_v52 = vmul.f32 1.442695, %v2101_v35 }
 0xfce   :  { %2778 = vpow2.f32 %v2103_v52 }
 0xfd1   :  { %v2096_v3 = vpop.f32.mrf.mxu3 }
 0xfd2   :  { %v2102_v56 = vmin.f32 %v2096_v3, 0.0  ;;  %vm2100_vm7 = vcmp.gt.f32.partialorder %v2096_v3, 0.0 }
 0xfd4   :  { %v2779_v5 = vpop.eup %2778  ;;  %v2105_v44 = vmul.f32 1.442695, %v2102_v56 }
 0xfd5   :  { %v2557_v8 = vadd.f32 -1.0, %v2779_v5 }
 0xfd6   :  { %2780 = vpow2.f32 %v2105_v44 }
 0xfd7   :  { %v2109_v45 = vsel %vm2099_vm1, %v2094_v1, %v2557_v8 }
 0xfd8   :  { %2113 = vrot.lane.b32.xlu1 %v2109_v45, %s2824_s20 }
 0xfdc   :  { %v2781_v7 = vpop.eup %2780 }
 0xfdd   :  { %v2558_v12 = vadd.f32 -1.0, %v2781_v7 }
 0xfdf   :  { %v2110_v20 = vsel %vm2100_vm7, %v2096_v3, %v2558_v12 }
 0xfe0   :  { %2115 = vrot.lane.b32.xlu2 %v2110_v20, %s2824_s20 }
 0xff6   :  { %v1868_v11 = vpop.permute.xlu0 %1867 }
 0xff7   :  { %v1873_v34 = vadd.f32 %v1868_v11, %v3368_v62 }
 0xff9   :  { %1875 = vst.msk [vmem:[#allocation2] sm:$0xff] %vm821_vm5, %v1873_v34 }
 0xffe   :  { %v1870_v46 = vpop.permute.xlu0 %1869 }
 0xfff   :  { %v1874_v21 = vadd.f32 %v1870_v46, %v3370_v22 }
0x1000   :  { %v2367_v36 = vld [vmem:[#allocation2] sm:$0xff] }
0x1001   :  { %2371 = vst [vmem:[%s3832_s7] sm:$0xff] %v2367_v36 }
0x1002   :  { %1876 = vst.msk [vmem:[#allocation2 + $0x8] sm:$0xff] %vm821_vm5, %v1874_v21 }
0x1009   :  { %v2368_v29 = vld [vmem:[#allocation2 + $0x8] sm:$0xff] }
0x100a   :  { %2372 = vst [vmem:[%s3832_s7 + $0x8] sm:$0xff] %v2368_v29 }
0x100d   :  { %v2216_v41 = vpop.f32.mrf.mxu2 }
0x100e   :  { %v2223_v23 = vmin.f32 %v2216_v41, 0.0  ;;  %vm2221_vm2 = vcmp.gt.f32.partialorder %v2216_v41, 0.0 }
0x1010   :  { %v2225_v62 = vmul.f32 1.442695, %v2223_v23 }
0x1012   :  { %2782 = vpow2.f32 %v2225_v62 }
0x1015   :  { %v2218_v14 = vpop.f32.mrf.mxu2 }
0x1016   :  { %v2224_v24 = vmin.f32 %v2218_v14, 0.0  ;;  %vm2222_vm11 = vcmp.gt.f32.partialorder %v2218_v14, 0.0 }
0x1018   :  { %v2783_v25 = vpop.eup %2782  ;;  %v2227_v22 = vmul.f32 1.442695, %v2224_v24 }
0x1019   :  { %v2563_v18 = vadd.f32 -1.0, %v2783_v25 }
0x101a   :  { %2784 = vpow2.f32 %v2227_v22 }
0x101b   :  { %v2231_v27 = vsel %vm2221_vm2, %v2216_v41, %v2563_v18 }
0x101c   :  { %2235 = vrot.lane.b32.xlu0 %v2231_v27, %s2825_s21 }
0x1020   :  { %v2785_v60 = vpop.eup %2784 }
0x1021   :  { %v2564_v50 = vadd.f32 -1.0, %v2785_v60 }
0x1023   :  { %v2232_v9 = vsel %vm2222_vm11, %v2218_v14, %v2564_v50 }
0x1024   :  { %2237 = vrot.lane.b32.xlu1 %v2232_v9, %s2825_s21 }
0x1028   :  { %v2338_v28 = vpop.f32.mrf.mxu1 }
0x1029   :  { %v2345_v61 = vmin.f32 %v2338_v28, 0.0  ;;  %vm2343_vm12 = vcmp.gt.f32.partialorder %v2338_v28, 0.0 }
0x102b   :  { %v2347_v32 = vmul.f32 1.442695, %v2345_v61 }
0x102d   :  { %2786 = vpow2.f32 %v2347_v32 }
0x1030   :  { %v2340_v30 = vpop.f32.mrf.mxu1 }
0x1031   :  { %v2346_v53 = vmin.f32 %v2340_v30, 0.0  ;;  %vm2344_vm6 = vcmp.gt.f32.partialorder %v2340_v30, 0.0 }
0x1033   :  { %v2787_v33 = vpop.eup %2786  ;;  %v2349_v55 = vmul.f32 1.442695, %v2346_v53 }
0x1034   :  { %v2569_v10 = vadd.f32 -1.0, %v2787_v33 }
0x1035   :  { %2788 = vpow2.f32 %v2349_v55 }
0x1036   :  { %v2353_v38 = vsel %vm2343_vm12, %v2338_v28, %v2569_v10 }
0x1037   :  { %2357 = vrot.lane.b32.xlu2 %v2353_v38, %s2823_s3 }
0x103a   :  { %v2116_v42 = vpop.permute.xlu2 %2115 }
0x103b   :  { %v2789_v47 = vpop.eup %2788  ;;  %v2120_v48 = vadd.f32 %v2116_v42, %v3478_v19 }
0x103c   :  { %v2570_v51 = vadd.f32 -1.0, %v2789_v47 }
0x103d   :  { %2122 = vst.msk [vmem:[#allocation2 + $0x18] sm:$0xff] %vm559_vm15, %v2120_v48 }
0x103e   :  { %v2354_v15 = vsel %vm2344_vm6, %v2340_v30, %v2570_v51 }
0x103f   :  { %2359 = vrot.lane.b32.xlu0 %v2354_v15, %s2823_s3 }
0x104a   :  { %v2114_v17 = vpop.permute.xlu1 %2113 }
0x104b   :  { %v2119_v49 = vadd.f32 %v2114_v17, %v3476_v6 }
0x104d   :  { %2121 = vst.msk [vmem:[#allocation2 + $0x10] sm:$0xff] %vm559_vm15, %v2119_v49 }
0x108e   :  { %v2236_v54 = vpop.permute.xlu0 %2235 }
0x108f   :  { %v2241_v2 = vadd.f32 %v2236_v54, %v3476_v6 }
0x1091   :  { %2243 = vst.msk [vmem:[#allocation2 + $0x10] sm:$0xff] %vm690_vm4, %v2241_v2  ;;  %v2358_v57 = vpop.permute.xlu2 %2357 }
0x1092   :  { %v2363_v58 = vadd.f32 %v2358_v57, %v3476_v6 }
0x1094   :  { %2365 = vst.msk [vmem:[#allocation2 + $0x10] sm:$0xff] %vm821_vm5, %v2363_v58 }
0x1096   :  { %v2238_v16 = vpop.permute.xlu1 %2237 }
0x1097   :  { %v2242_v59 = vadd.f32 %v2238_v16, %v3478_v19 }
0x1099   :  { %2244 = vst.msk [vmem:[#allocation2 + $0x18] sm:$0xff] %vm690_vm4, %v2242_v59 }
0x109b   :  { %v2369_v43 = vld [vmem:[#allocation2 + $0x10] sm:$0xff] }
0x109c   :  { %2373 = vst [vmem:[%s3832_s7 + $0x10] sm:$0xff] %v2369_v43 }
0x10b1   :  { %v2360_v39 = vpop.permute.xlu0 %2359 }
0x10b2   :  { %v2364_v40 = vadd.f32 %v2360_v39, %v3478_v19 }
0x10b4   :  { %2366 = vst.msk [vmem:[#allocation2 + $0x18] sm:$0xff] %vm821_vm5, %v2364_v40 }
0x10bb   :  { %v2370_v13 = vld [vmem:[#allocation2 + $0x18] sm:$0xff] }
0x10bc   :  { %2374 = vst [vmem:[%s3832_s7 + $0x18] sm:$0xff] %v2370_v13 }

</bundles_post_ra>
